<compile_context>
chip_gen: v5e
topology: v5e:2x2
jax: 0.10.0
libtpu: 0.0.40
codegen_flags: <defaults>
</compile_context>

<pallas_src>
import numpy as np
import jax
import jax.numpy as jnp
from jax import lax
from jax.experimental import pallas as pl
from jax.experimental.pallas import tpu as pltpu


NUM_CLASSES = 3
NUM_ANCHORS = 2
HEAD_N = NUM_ANCHORS * NUM_CLASSES + NUM_ANCHORS * 4      # 6 + 8 = 14

# (name, Cin, Cout, H_in, W_in, stride); every conv is 3x3, pad=1, + ReLU.
BACKBONE = [
    ("m0_0", 3, 8, 32, 32, 2),
    ("m0_1", 8, 16, 16, 16, 1),
    ("m1_0", 16, 32, 16, 16, 2),
    ("e0", 32, 32, 8, 8, 2),
    ("e1", 32, 32, 4, 4, 2),
    ("e2", 32, 32, 2, 2, 2),
    ("e3", 32, 32, 1, 1, 2),
]


def _conv_out(n, s):
    return (n + 2 - 3) // s + 1


# Output (H, W, C) of each backbone layer.
BACKBONE_OUT = [(_conv_out(h, s), _conv_out(w, s), co)
                for (_, ci, co, h, w, s) in BACKBONE]
# SSD header levels = outputs of backbone layers 1..6 (m0_1, m1_0, e0..e3).
HEAD_LAYERS = [1, 2, 3, 4, 5, 6]


# ----------------------- host-side weight packing ---------------------------

def _toeplitz(w, b, w_in, w_out, stride):
    """Expand a 3x3 conv weight into 3 lane-Toeplitz GEMM operands.

    T_i[(p*Cin + c), (wo*Cout + co)] = w[i, j, c, co]  with  p = stride*wo+j-1
    (out-of-range p == horizontal zero padding).  Bias is tiled per pixel.
    """
    w = np.asarray(w, np.float32)
    b = np.asarray(b, np.float32)
    kh, kw, cin, cout = w.shape
    t = np.zeros((kh, w_in * cin, w_out * cout), np.float32)
    for i in range(kh):
        for j in range(kw):
            for wo in range(w_out):
                p = stride * wo + j - 1
                if 0 <= p < w_in:
                    t[i, p * cin:(p + 1) * cin,
                      wo * cout:(wo + 1) * cout] = w[i, j]
    brow = np.tile(b, w_out).reshape(1, w_out * cout)
    return jnp.asarray(t, jnp.bfloat16), jnp.asarray(brow, jnp.float32)


def _toeplitz_head(cls_w, cls_b, reg_w, reg_b, w_sp):
    """Fused cls+reg header weights with BLOCKED columns: [cls | reg].

    Column layout: [0, W*6): lane = wo*6 + (a*3+cls)   (confidence block)
                   [W*6, W*14): lane = wo*8 + (a*4+k)  (location block)
    which flattens exactly like PyTorch's permute(0,2,3,1).view(B,-1,C).
    """
    cw = np.asarray(cls_w, np.float32)
    rw = np.asarray(reg_w, np.float32)
    cb = np.asarray(cls_b, np.float32)
    rb = np.asarray(reg_b, np.float32)
    kh, kw, cin, nc = cw.shape
    nr = rw.shape[3]
    off = w_sp * nc
    t = np.zeros((kh, w_sp * cin, w_sp * (nc + nr)), np.float32)
    for i in range(kh):
        for j in range(kw):
            for wo in range(w_sp):
                p = wo + j - 1
                if 0 <= p < w_sp:
                    t[i, p * cin:(p + 1) * cin, wo * nc:(wo + 1) * nc] = cw[i, j]
                    t[i, p * cin:(p + 1) * cin,
                      off + wo * nr:off + (wo + 1) * nr] = rw[i, j]
    brow = np.concatenate([np.tile(cb, w_sp), np.tile(rb, w_sp)])
    brow = brow.reshape(1, w_sp * (nc + nr))
    return jnp.asarray(t, jnp.bfloat16), jnp.asarray(brow, jnp.float32)


def _backbone_param(params, li):
    name = BACKBONE[li][0]
    if name.startswith("e"):
        return params["extras"][int(name[1])]
    return params[name]


def prepare_weights(params):
    """One-time (host-side, outside jit) packing of all conv weights."""
    backbone = []
    for li in range(len(BACKBONE)):
        _, ci, co, hi, wi, s = BACKBONE[li]
        p = _backbone_param(params, li)
        backbone.append(_toeplitz(p["w"], p["b"], wi, _conv_out(wi, s), s))
    heads = []
    for lvl, layer in enumerate(HEAD_LAYERS):
        _, wo, _ = BACKBONE_OUT[layer]
        cp = params["cls_heads"][lvl]
        rp = params["reg_heads"][lvl]
        heads.append(_toeplitz_head(cp["w"], cp["b"], rp["w"], rp["b"], wo))
    return {"backbone": backbone, "heads": heads}


# ------------------------------ parameters ----------------------------------

def _conv_param(key, kh, kw, cin, cout):
    kw_key, kb_key = jax.random.split(key)
    scale = 1.0 / jnp.sqrt(float(kh * kw * cin))
    w = jax.random.normal(kw_key, (kh, kw, cin, cout), jnp.float32) * scale
    b = jax.random.normal(kb_key, (cout,), jnp.float32) * 0.01
    return {"w": w, "b": b}


def init_params(key):
    keys = jax.random.split(key, 20)
    params = {
        "m0_0": _conv_param(keys[0], 3, 3, 3, 8),
        "m0_1": _conv_param(keys[1], 3, 3, 8, 16),
        "m1_0": _conv_param(keys[2], 3, 3, 16, 32),
        "extras": [_conv_param(keys[3 + i], 3, 3, 32, 32) for i in range(4)],
    }
    head_cin = [16, 32, 32, 32, 32, 32]
    params["cls_heads"] = [
        _conv_param(keys[7 + i], 3, 3, head_cin[i], NUM_ANCHORS * NUM_CLASSES)
        for i in range(6)]
    params["reg_heads"] = [
        _conv_param(keys[13 + i], 3, 3, head_cin[i], NUM_ANCHORS * 4)
        for i in range(6)]
    return params


# -------------------------------- forward -----------------------------------

def myssd_forward(packed, x_nchw):
    """Training-path forward: returns (confidences, locations)."""
    B, C, H, W = x_nchw.shape
    nlev = len(HEAD_LAYERS)

    # NCHW -> NHWC -> (B, H, W*C): rows on sublanes, (w, c) packed on lanes.
    x = jnp.transpose(x_nchw, (0, 2, 3, 1)).reshape(B, H, W * C)
    x = x.astype(jnp.float32)

    def _const_spec(a):
        nd = a.ndim
        return pl.BlockSpec(a.shape, lambda b: (0,) * nd)

    inputs = [x]
    in_specs = [pl.BlockSpec((1, H, W * C), lambda b: (b, 0, 0))]
    for (t, brow) in packed["backbone"]:
        inputs += [t, brow]
        in_specs += [_const_spec(t), _const_spec(brow)]
    for (t, brow) in packed["heads"]:
        inputs += [t, brow]
        in_specs += [_const_spec(t), _const_spec(brow)]
    n_in = len(inputs)

    out_shape = []
    for layer in HEAD_LAYERS:      # confidences first ...
        ho, wo, _ = BACKBONE_OUT[layer]
        out_shape.append(jax.ShapeDtypeStruct(
            (B, ho, wo * NUM_ANCHORS * NUM_CLASSES), jnp.float32))
    for layer in HEAD_LAYERS:      # ... then locations
        ho, wo, _ = BACKBONE_OUT[layer]
        out_shape.append(jax.ShapeDtypeStruct(
            (B, ho, wo * NUM_ANCHORS * 4), jnp.float32))
    out_specs = [pl.BlockSpec((1,) + s.shape[1:], lambda b: (b, 0, 0))
                 for s in out_shape]
    n_out = len(out_shape)

    # Vertically zero-padded feature buffers; the whole backbone lives here.
    scratch_shapes = [pltpu.VMEM((H + 2, W * C), jnp.float32)]
    for (ho, wo, co) in BACKBONE_OUT:
        scratch_shapes.append(pltpu.VMEM((ho + 2, wo * co), jnp.float32))

    def kernel(*refs):
        in_refs = refs[:n_in]
        out_refs = refs[n_in:n_in + n_out]
        bufs = refs[n_in + n_out:]

        # Establish the zero padding rows (scratch is uninitialized).
        for buf in bufs:
            buf[...] = jnp.zeros_like(buf)

        # TransformInput: (x - 127) / 128, computed exactly in f32.
        xin = in_refs[0][0]                                  # (H, W*C) f32
        bufs[0][1:1 + H, :] = (xin - 127.0) * (1.0 / 128.0)

        def conv3x3(src, w_ref, b_ref, h_out, stride):
            """pad-1 3x3 conv = 3 lane-Toeplitz MXU matmuls (+ bias)."""
            m_z = stride * (h_out - 1) + 1
            acc = None
            for i in range(3):
                a = src[i:i + m_z, :].astype(jnp.bfloat16)
                p = jnp.dot(a, w_ref[i], preferred_element_type=jnp.float32)
                acc = p if acc is None else acc + p
            if m_z != h_out:
                # vertical stride: keep rows 0, stride, 2*stride, ...
                r = lax.broadcasted_iota(jnp.int32, (h_out, m_z), 0)
                c = lax.broadcasted_iota(jnp.int32, (h_out, m_z), 1)
                sel = (c == stride * r).astype(jnp.float32)
                acc = jnp.dot(sel, acc, preferred_element_type=jnp.float32)
            return acc + b_ref[...]

        # ---- backbone: 7 convs, all VMEM resident ----
        arg = 1
        for li in range(len(BACKBONE)):
            stride = BACKBONE[li][5]
            h_out = BACKBONE_OUT[li][0]
            y = conv3x3(bufs[li], in_refs[arg], in_refs[arg + 1], h_out, stride)
            arg += 2
            bufs[li + 1][1:1 + h_out, :] = jnp.maximum(y, 0.0)

        # ---- SSD headers: fused cls+reg GEMM per level, blocked columns ----
        for lvl, layer in enumerate(HEAD_LAYERS):
            h_out, w_out, _ = BACKBONE_OUT[layer]
            hv = conv3x3(bufs[layer + 1], in_refs[arg], in_refs[arg + 1],
                         h_out, 1)
            arg += 2
            n_cls = w_out * NUM_ANCHORS * NUM_CLASSES
            out_refs[lvl][0] = hv[:, :n_cls]                 # confidences
            out_refs[nlev + lvl][0] = hv[:, n_cls:]          # locations

    # Rough cost hint for the XLA scheduler.
    flops = 0
    for li, (_, ci, co, hi, wi, s) in enumerate(BACKBONE):
        ho, wo, _ = BACKBONE_OUT[li]
        m_z = s * (ho - 1) + 1
        flops += 3 * 2 * m_z * (wi * ci) * (wo * co)
        if m_z != ho:
            flops += 2 * ho * m_z * (wo * co)
    for layer in HEAD_LAYERS:
        ho, wo, co = BACKBONE_OUT[layer]
        flops += 3 * 2 * ho * (wo * co) * (wo * HEAD_N)
    flops *= B
    bytes_accessed = sum(int(a.size) * a.dtype.itemsize for a in inputs)
    bytes_accessed += sum(int(np.prod(s_.shape)) * 4 for s_ in out_shape)

    outs = pl.pallas_call(
        kernel,
        out_shape=out_shape,
        grid_spec=pltpu.PrefetchScalarGridSpec(
            num_scalar_prefetch=0,
            grid=(B,),
            in_specs=in_specs,
            out_specs=out_specs,
            scratch_shapes=scratch_shapes),
        compiler_params=pltpu.CompilerParams(
            dimension_semantics=("parallel",)),
        cost_estimate=pl.CostEstimate(flops=int(flops), transcendentals=0,
                                      bytes_accessed=int(bytes_accessed)),
    )(*inputs)

    confidences, locations = [], []
    for lvl, layer in enumerate(HEAD_LAYERS):
        ho, wo, _ = BACKBONE_OUT[layer]
        confidences.append(
            outs[lvl].reshape(B, ho * wo * NUM_ANCHORS, NUM_CLASSES))
        locations.append(
            outs[nlev + lvl].reshape(B, ho * wo * NUM_ANCHORS, 4))
    return (jnp.concatenate(confidences, axis=1),
            jnp.concatenate(locations, axis=1))


# ---------------------------------- main -------------------------------------

if __name__ == "__main__":
    key = jax.random.PRNGKey(0)
    pkey, xkey = jax.random.split(key)
    params = init_params(pkey)
    packed = prepare_weights(params)      # one-time host-side weight packing

    # Small image-like input, NCHW like the PyTorch module expects.
    x = jax.random.uniform(xkey, (2, 3, 32, 32), jnp.float32, 0.0, 255.0)

    fwd = jax.jit(myssd_forward)
    conf, loc = fwd(packed, x)
    conf = jax.block_until_ready(conf)
    loc = jax.block_until_ready(loc)

    # priors: 2*(16*16 + 8*8 + 4*4 + 2*2 + 1 + 1) = 684
    assert conf.shape == (2, 684, NUM_CLASSES), conf.shape
    assert loc.shape == (2, 684, 4), loc.shape
    assert bool(jnp.all(jnp.isfinite(conf))) and bool(jnp.all(jnp.isfinite(loc)))
    print("KERNEL_OK")
</pallas_src>

<mosaic_0001>
module attributes {stable_mosaic.version = 11 : i64} {
  func.func @kernel(%arg0: i32, %arg1: memref<1x32x96xf32, #tpu.memory_space<vmem>>, %arg2: memref<3x96x128xbf16, #tpu.memory_space<vmem>>, %arg3: memref<1x128xf32, #tpu.memory_space<vmem>>, %arg4: memref<3x128x256xbf16, #tpu.memory_space<vmem>>, %arg5: memref<1x256xf32, #tpu.memory_space<vmem>>, %arg6: memref<3x256x256xbf16, #tpu.memory_space<vmem>>, %arg7: memref<1x256xf32, #tpu.memory_space<vmem>>, %arg8: memref<3x256x128xbf16, #tpu.memory_space<vmem>>, %arg9: memref<1x128xf32, #tpu.memory_space<vmem>>, %arg10: memref<3x128x64xbf16, #tpu.memory_space<vmem>>, %arg11: memref<1x64xf32, #tpu.memory_space<vmem>>, %arg12: memref<3x64x32xbf16, #tpu.memory_space<vmem>>, %arg13: memref<1x32xf32, #tpu.memory_space<vmem>>, %arg14: memref<3x32x32xbf16, #tpu.memory_space<vmem>>, %arg15: memref<1x32xf32, #tpu.memory_space<vmem>>, %arg16: memref<3x256x224xbf16, #tpu.memory_space<vmem>>, %arg17: memref<1x224xf32, #tpu.memory_space<vmem>>, %arg18: memref<3x256x112xbf16, #tpu.memory_space<vmem>>, %arg19: memref<1x112xf32, #tpu.memory_space<vmem>>, %arg20: memref<3x128x56xbf16, #tpu.memory_space<vmem>>, %arg21: memref<1x56xf32, #tpu.memory_space<vmem>>, %arg22: memref<3x64x28xbf16, #tpu.memory_space<vmem>>, %arg23: memref<1x28xf32, #tpu.memory_space<vmem>>, %arg24: memref<3x32x14xbf16, #tpu.memory_space<vmem>>, %arg25: memref<1x14xf32, #tpu.memory_space<vmem>>, %arg26: memref<3x32x14xbf16, #tpu.memory_space<vmem>>, %arg27: memref<1x14xf32, #tpu.memory_space<vmem>>, %arg28: memref<1x16x96xf32, #tpu.memory_space<vmem>>, %arg29: memref<1x8x48xf32, #tpu.memory_space<vmem>>, %arg30: memref<1x4x24xf32, #tpu.memory_space<vmem>>, %arg31: memref<1x2x12xf32, #tpu.memory_space<vmem>>, %arg32: memref<1x1x6xf32, #tpu.memory_space<vmem>>, %arg33: memref<1x1x6xf32, #tpu.memory_space<vmem>>, %arg34: memref<1x16x128xf32, #tpu.memory_space<vmem>>, %arg35: memref<1x8x64xf32, #tpu.memory_space<vmem>>, %arg36: memref<1x4x32xf32, #tpu.memory_space<vmem>>, %arg37: memref<1x2x16xf32, #tpu.memory_space<vmem>>, %arg38: memref<1x1x8xf32, #tpu.memory_space<vmem>>, %arg39: memref<1x1x8xf32, #tpu.memory_space<vmem>>, %arg40: memref<34x96xf32, #tpu.memory_space<vmem>>, %arg41: memref<18x128xf32, #tpu.memory_space<vmem>>, %arg42: memref<18x256xf32, #tpu.memory_space<vmem>>, %arg43: memref<10x256xf32, #tpu.memory_space<vmem>>, %arg44: memref<6x128xf32, #tpu.memory_space<vmem>>, %arg45: memref<4x64xf32, #tpu.memory_space<vmem>>, %arg46: memref<3x32xf32, #tpu.memory_space<vmem>>, %arg47: memref<3x32xf32, #tpu.memory_space<vmem>>) attributes {dimension_semantics = [#tpu.dimension_semantics<parallel>], iteration_bounds = array<i64: 2>, scalar_prefetch = 0 : i64, scratch_operands = 8 : i64, tpu.core_type = #tpu.core_type<tc>, window_params = [{transform_indices = @transform_0, window_bounds = array<i64: 1, 32, 96>}, {pipeline_mode = #tpu.pipeline_mode<synchronous>, transform_indices = @transform_1, window_bounds = array<i64: 3, 96, 128>}, {pipeline_mode = #tpu.pipeline_mode<synchronous>, transform_indices = @transform_2, window_bounds = array<i64: 1, 128>}, {pipeline_mode = #tpu.pipeline_mode<synchronous>, transform_indices = @transform_3, window_bounds = array<i64: 3, 128, 256>}, {pipeline_mode = #tpu.pipeline_mode<synchronous>, transform_indices = @transform_4, window_bounds = array<i64: 1, 256>}, {pipeline_mode = #tpu.pipeline_mode<synchronous>, transform_indices = @transform_5, window_bounds = array<i64: 3, 256, 256>}, {pipeline_mode = #tpu.pipeline_mode<synchronous>, transform_indices = @transform_6, window_bounds = array<i64: 1, 256>}, {pipeline_mode = #tpu.pipeline_mode<synchronous>, transform_indices = @transform_7, window_bounds = array<i64: 3, 256, 128>}, {pipeline_mode = #tpu.pipeline_mode<synchronous>, transform_indices = @transform_8, window_bounds = array<i64: 1, 128>}, {pipeline_mode = #tpu.pipeline_mode<synchronous>, transform_indices = @transform_9, window_bounds = array<i64: 3, 128, 64>}, {pipeline_mode = #tpu.pipeline_mode<synchronous>, transform_indices = @transform_10, window_bounds = array<i64: 1, 64>}, {pipeline_mode = #tpu.pipeline_mode<synchronous>, transform_indices = @transform_11, window_bounds = array<i64: 3, 64, 32>}, {pipeline_mode = #tpu.pipeline_mode<synchronous>, transform_indices = @transform_12, window_bounds = array<i64: 1, 32>}, {pipeline_mode = #tpu.pipeline_mode<synchronous>, transform_indices = @transform_13, window_bounds = array<i64: 3, 32, 32>}, {pipeline_mode = #tpu.pipeline_mode<synchronous>, transform_indices = @transform_14, window_bounds = array<i64: 1, 32>}, {pipeline_mode = #tpu.pipeline_mode<synchronous>, transform_indices = @transform_15, window_bounds = array<i64: 3, 256, 224>}, {pipeline_mode = #tpu.pipeline_mode<synchronous>, transform_indices = @transform_16, window_bounds = array<i64: 1, 224>}, {pipeline_mode = #tpu.pipeline_mode<synchronous>, transform_indices = @transform_17, window_bounds = array<i64: 3, 256, 112>}, {pipeline_mode = #tpu.pipeline_mode<synchronous>, transform_indices = @transform_18, window_bounds = array<i64: 1, 112>}, {pipeline_mode = #tpu.pipeline_mode<synchronous>, transform_indices = @transform_19, window_bounds = array<i64: 3, 128, 56>}, {pipeline_mode = #tpu.pipeline_mode<synchronous>, transform_indices = @transform_20, window_bounds = array<i64: 1, 56>}, {pipeline_mode = #tpu.pipeline_mode<synchronous>, transform_indices = @transform_21, window_bounds = array<i64: 3, 64, 28>}, {pipeline_mode = #tpu.pipeline_mode<synchronous>, transform_indices = @transform_22, window_bounds = array<i64: 1, 28>}, {pipeline_mode = #tpu.pipeline_mode<synchronous>, transform_indices = @transform_23, window_bounds = array<i64: 3, 32, 14>}, {pipeline_mode = #tpu.pipeline_mode<synchronous>, transform_indices = @transform_24, window_bounds = array<i64: 1, 14>}, {pipeline_mode = #tpu.pipeline_mode<synchronous>, transform_indices = @transform_25, window_bounds = array<i64: 3, 32, 14>}, {pipeline_mode = #tpu.pipeline_mode<synchronous>, transform_indices = @transform_26, window_bounds = array<i64: 1, 14>}, {transform_indices = @transform_27, window_bounds = array<i64: 1, 16, 96>}, {transform_indices = @transform_28, window_bounds = array<i64: 1, 8, 48>}, {transform_indices = @transform_29, window_bounds = array<i64: 1, 4, 24>}, {transform_indices = @transform_30, window_bounds = array<i64: 1, 2, 12>}, {transform_indices = @transform_31, window_bounds = array<i64: 1, 1, 6>}, {transform_indices = @transform_32, window_bounds = array<i64: 1, 1, 6>}, {transform_indices = @transform_33, window_bounds = array<i64: 1, 16, 128>}, {transform_indices = @transform_34, window_bounds = array<i64: 1, 8, 64>}, {transform_indices = @transform_35, window_bounds = array<i64: 1, 4, 32>}, {transform_indices = @transform_36, window_bounds = array<i64: 1, 2, 16>}, {transform_indices = @transform_37, window_bounds = array<i64: 1, 1, 8>}, {transform_indices = @transform_38, window_bounds = array<i64: 1, 1, 8>}]} {
    %cst = arith.constant 0.000000e+00 : f32
    %0 = vector.broadcast %cst : f32 to vector<34x96xf32>
    %c0 = arith.constant 0 : index
    %c0_0 = arith.constant 0 : index
    %1 = vector.load %arg40[%c0, %c0_0] : memref<34x96xf32, #tpu.memory_space<vmem>>, vector<34x96xf32>
    tpu.vector_store %arg40[%c0, %c0_0], %0 {strides = array<i32>} : memref<34x96xf32, #tpu.memory_space<vmem>>, vector<34x96xf32>,
    %cst_1 = arith.constant 0.000000e+00 : f32
    %2 = vector.broadcast %cst_1 : f32 to vector<18x128xf32>
    %c0_2 = arith.constant 0 : index
    %c0_3 = arith.constant 0 : index
    %3 = vector.load %arg41[%c0_2, %c0_3] : memref<18x128xf32, #tpu.memory_space<vmem>>, vector<18x128xf32>
    tpu.vector_store %arg41[%c0_2, %c0_3], %2 {strides = array<i32>} : memref<18x128xf32, #tpu.memory_space<vmem>>, vector<18x128xf32>,
    %cst_4 = arith.constant 0.000000e+00 : f32
    %4 = vector.broadcast %cst_4 : f32 to vector<18x256xf32>
    %c0_5 = arith.constant 0 : index
    %c0_6 = arith.constant 0 : index
    %5 = vector.load %arg42[%c0_5, %c0_6] : memref<18x256xf32, #tpu.memory_space<vmem>>, vector<18x256xf32>
    tpu.vector_store %arg42[%c0_5, %c0_6], %4 {strides = array<i32>} : memref<18x256xf32, #tpu.memory_space<vmem>>, vector<18x256xf32>,
    %cst_7 = arith.constant 0.000000e+00 : f32
    %6 = vector.broadcast %cst_7 : f32 to vector<10x256xf32>
    %c0_8 = arith.constant 0 : index
    %c0_9 = arith.constant 0 : index
    %7 = vector.load %arg43[%c0_8, %c0_9] : memref<10x256xf32, #tpu.memory_space<vmem>>, vector<10x256xf32>
    tpu.vector_store %arg43[%c0_8, %c0_9], %6 {strides = array<i32>} : memref<10x256xf32, #tpu.memory_space<vmem>>, vector<10x256xf32>,
    %cst_10 = arith.constant 0.000000e+00 : f32
    %8 = vector.broadcast %cst_10 : f32 to vector<6x128xf32>
    %c0_11 = arith.constant 0 : index
    %c0_12 = arith.constant 0 : index
    %9 = vector.load %arg44[%c0_11, %c0_12] : memref<6x128xf32, #tpu.memory_space<vmem>>, vector<6x128xf32>
    tpu.vector_store %arg44[%c0_11, %c0_12], %8 {strides = array<i32>} : memref<6x128xf32, #tpu.memory_space<vmem>>, vector<6x128xf32>,
    %cst_13 = arith.constant 0.000000e+00 : f32
    %10 = vector.broadcast %cst_13 : f32 to vector<4x64xf32>
    %c0_14 = arith.constant 0 : index
    %c0_15 = arith.constant 0 : index
    %11 = vector.load %arg45[%c0_14, %c0_15] : memref<4x64xf32, #tpu.memory_space<vmem>>, vector<4x64xf32>
    tpu.vector_store %arg45[%c0_14, %c0_15], %10 {strides = array<i32>} : memref<4x64xf32, #tpu.memory_space<vmem>>, vector<4x64xf32>,
    %cst_16 = arith.constant 0.000000e+00 : f32
    %12 = vector.broadcast %cst_16 : f32 to vector<3x32xf32>
    %c0_17 = arith.constant 0 : index
    %c0_18 = arith.constant 0 : index
    %13 = vector.load %arg46[%c0_17, %c0_18] : memref<3x32xf32, #tpu.memory_space<vmem>>, vector<3x32xf32>
    tpu.vector_store %arg46[%c0_17, %c0_18], %12 {strides = array<i32>} : memref<3x32xf32, #tpu.memory_space<vmem>>, vector<3x32xf32>,
    %cst_19 = arith.constant 0.000000e+00 : f32
    %14 = vector.broadcast %cst_19 : f32 to vector<3x32xf32>
    %c0_20 = arith.constant 0 : index
    %c0_21 = arith.constant 0 : index
    %15 = vector.load %arg47[%c0_20, %c0_21] : memref<3x32xf32, #tpu.memory_space<vmem>>, vector<3x32xf32>
    tpu.vector_store %arg47[%c0_20, %c0_21], %14 {strides = array<i32>} : memref<3x32xf32, #tpu.memory_space<vmem>>, vector<3x32xf32>,
    %c0_22 = arith.constant 0 : index
    %c0_23 = arith.constant 0 : index
    %c0_24 = arith.constant 0 : index
    %16 = vector.load %arg1[%c0_22, %c0_23, %c0_24] : memref<1x32x96xf32, #tpu.memory_space<vmem>>, vector<1x32x96xf32>
    %17 = vector.shape_cast %16 : vector<1x32x96xf32> to vector<32x96xf32>
    %cst_25 = arith.constant 1.270000e+02 : f32
    %18 = vector.broadcast %cst_25 : f32 to vector<32x96xf32>
    %19 = arith.subf %17, %18 : vector<32x96xf32>
    %cst_26 = arith.constant 7.812500e-03 : f32
    %20 = vector.broadcast %cst_26 : f32 to vector<32x96xf32>
    %21 = arith.mulf %19, %20 : vector<32x96xf32>
    %c1 = arith.constant 1 : index
    %c0_27 = arith.constant 0 : index
    %22 = vector.load %arg40[%c1, %c0_27] : memref<34x96xf32, #tpu.memory_space<vmem>>, vector<32x96xf32>
    tpu.vector_store %arg40[%c1, %c0_27], %21 {strides = array<i32>} : memref<34x96xf32, #tpu.memory_space<vmem>>, vector<32x96xf32>,
    %c0_28 = arith.constant 0 : index
    %c0_29 = arith.constant 0 : index
    %23 = vector.load %arg40[%c0_28, %c0_29] : memref<34x96xf32, #tpu.memory_space<vmem>>, vector<31x96xf32>
    %24 = arith.truncf %23 : vector<31x96xf32> to vector<31x96xbf16>
    %c0_30 = arith.constant 0 : index
    %c0_31 = arith.constant 0 : index
    %c0_32 = arith.constant 0 : index
    %25 = vector.load %arg2[%c0_30, %c0_31, %c0_32] : memref<3x96x128xbf16, #tpu.memory_space<vmem>>, vector<1x96x128xbf16>
    %26 = vector.shape_cast %25 : vector<1x96x128xbf16> to vector<96x128xbf16>
    %cst_33 = arith.constant dense<0.000000e+00> : vector<31x128xf32>
    %27 = tpu.matmul %24, %26, %cst_33 {dimension_numbers = #tpu.dot_dimension_numbers<[1], [0], [0], [1], [0, 0, 1, 1], [], []>} : vector<31x96xbf16>, vector<96x128xbf16>, vector<31x128xf32> -> vector<31x128xf32>
    %c1_34 = arith.constant 1 : index
    %c0_35 = arith.constant 0 : index
    %28 = vector.load %arg40[%c1_34, %c0_35] : memref<34x96xf32, #tpu.memory_space<vmem>>, vector<31x96xf32>
    %29 = arith.truncf %28 : vector<31x96xf32> to vector<31x96xbf16>
    %c1_36 = arith.constant 1 : index
    %c0_37 = arith.constant 0 : index
    %c0_38 = arith.constant 0 : index
    %30 = vector.load %arg2[%c1_36, %c0_37, %c0_38] : memref<3x96x128xbf16, #tpu.memory_space<vmem>>, vector<1x96x128xbf16>
    %31 = vector.shape_cast %30 : vector<1x96x128xbf16> to vector<96x128xbf16>
    %cst_39 = arith.constant dense<0.000000e+00> : vector<31x128xf32>
    %32 = tpu.matmul %29, %31, %cst_39 {dimension_numbers = #tpu.dot_dimension_numbers<[1], [0], [0], [1], [0, 0, 1, 1], [], []>} : vector<31x96xbf16>, vector<96x128xbf16>, vector<31x128xf32> -> vector<31x128xf32>
    %33 = arith.addf %27, %32 : vector<31x128xf32>
    %c2 = arith.constant 2 : index
    %c0_40 = arith.constant 0 : index
    %34 = vector.load %arg40[%c2, %c0_40] : memref<34x96xf32, #tpu.memory_space<vmem>>, vector<31x96xf32>
    %35 = arith.truncf %34 : vector<31x96xf32> to vector<31x96xbf16>
    %c2_41 = arith.constant 2 : index
    %c0_42 = arith.constant 0 : index
    %c0_43 = arith.constant 0 : index
    %36 = vector.load %arg2[%c2_41, %c0_42, %c0_43] : memref<3x96x128xbf16, #tpu.memory_space<vmem>>, vector<1x96x128xbf16>
    %37 = vector.shape_cast %36 : vector<1x96x128xbf16> to vector<96x128xbf16>
    %cst_44 = arith.constant dense<0.000000e+00> : vector<31x128xf32>
    %38 = tpu.matmul %35, %37, %cst_44 {dimension_numbers = #tpu.dot_dimension_numbers<[1], [0], [0], [1], [0, 0, 1, 1], [], []>} : vector<31x96xbf16>, vector<96x128xbf16>, vector<31x128xf32> -> vector<31x128xf32>
    %39 = arith.addf %33, %38 : vector<31x128xf32>
    %40 = tpu.iota {dimensions = array<i32: 0>} : vector<16x31xi32>
    %41 = tpu.iota {dimensions = array<i32: 1>} : vector<16x31xi32>
    %c2_i32 = arith.constant 2 : i32
    %42 = vector.broadcast %c2_i32 : i32 to vector<16x31xi32>
    %43 = arith.muli %42, %40 : vector<16x31xi32>
    %44 = arith.cmpi eq, %41, %43 : vector<16x31xi32>
    %45 = arith.extui %44 : vector<16x31xi1> to vector<16x31xi32>
    %46 = arith.sitofp %45 : vector<16x31xi32> to vector<16x31xf32>
    %cst_45 = arith.constant dense<0.000000e+00> : vector<16x128xf32>
    %47 = tpu.matmul %46, %39, %cst_45 {dimension_numbers = #tpu.dot_dimension_numbers<[1], [0], [0], [1], [0, 0, 1, 1], [], []>} : vector<16x31xf32>, vector<31x128xf32>, vector<16x128xf32> -> vector<16x128xf32>
    %c0_46 = arith.constant 0 : index
    %c0_47 = arith.constant 0 : index
    %48 = vector.load %arg3[%c0_46, %c0_47] : memref<1x128xf32, #tpu.memory_space<vmem>>, vector<1x128xf32>
    %49 = vector.broadcast %48 : vector<1x128xf32> to vector<16x128xf32>
    %50 = arith.addf %47, %49 : vector<16x128xf32>
    %cst_48 = arith.constant 0.000000e+00 : f32
    %51 = vector.broadcast %cst_48 : f32 to vector<16x128xf32>
    %52 = arith.maximumf %50, %51 : vector<16x128xf32>
    %c1_49 = arith.constant 1 : index
    %c0_50 = arith.constant 0 : index
    %53 = vector.load %arg41[%c1_49, %c0_50] : memref<18x128xf32, #tpu.memory_space<vmem>>, vector<16x128xf32>
    tpu.vector_store %arg41[%c1_49, %c0_50], %52 {strides = array<i32>} : memref<18x128xf32, #tpu.memory_space<vmem>>, vector<16x128xf32>,
    %c0_51 = arith.constant 0 : index
    %c0_52 = arith.constant 0 : index
    %54 = vector.load %arg41[%c0_51, %c0_52] : memref<18x128xf32, #tpu.memory_space<vmem>>, vector<16x128xf32>
    %55 = arith.truncf %54 : vector<16x128xf32> to vector<16x128xbf16>
    %c0_53 = arith.constant 0 : index
    %c0_54 = arith.constant 0 : index
    %c0_55 = arith.constant 0 : index
    %56 = vector.load %arg4[%c0_53, %c0_54, %c0_55] : memref<3x128x256xbf16, #tpu.memory_space<vmem>>, vector<1x128x256xbf16>
    %57 = vector.shape_cast %56 : vector<1x128x256xbf16> to vector<128x256xbf16>
    %cst_56 = arith.constant dense<0.000000e+00> : vector<16x256xf32>
    %58 = tpu.matmul %55, %57, %cst_56 {dimension_numbers = #tpu.dot_dimension_numbers<[1], [0], [0], [1], [0, 0, 1, 1], [], []>} : vector<16x128xbf16>, vector<128x256xbf16>, vector<16x256xf32> -> vector<16x256xf32>
    %c1_57 = arith.constant 1 : index
    %c0_58 = arith.constant 0 : index
    %59 = vector.load %arg41[%c1_57, %c0_58] : memref<18x128xf32, #tpu.memory_space<vmem>>, vector<16x128xf32>
    %60 = arith.truncf %59 : vector<16x128xf32> to vector<16x128xbf16>
    %c1_59 = arith.constant 1 : index
    %c0_60 = arith.constant 0 : index
    %c0_61 = arith.constant 0 : index
    %61 = vector.load %arg4[%c1_59, %c0_60, %c0_61] : memref<3x128x256xbf16, #tpu.memory_space<vmem>>, vector<1x128x256xbf16>
    %62 = vector.shape_cast %61 : vector<1x128x256xbf16> to vector<128x256xbf16>
    %cst_62 = arith.constant dense<0.000000e+00> : vector<16x256xf32>
    %63 = tpu.matmul %60, %62, %cst_62 {dimension_numbers = #tpu.dot_dimension_numbers<[1], [0], [0], [1], [0, 0, 1, 1], [], []>} : vector<16x128xbf16>, vector<128x256xbf16>, vector<16x256xf32> -> vector<16x256xf32>
    %64 = arith.addf %58, %63 : vector<16x256xf32>
    %c2_63 = arith.constant 2 : index
    %c0_64 = arith.constant 0 : index
    %65 = vector.load %arg41[%c2_63, %c0_64] : memref<18x128xf32, #tpu.memory_space<vmem>>, vector<16x128xf32>
    %66 = arith.truncf %65 : vector<16x128xf32> to vector<16x128xbf16>
    %c2_65 = arith.constant 2 : index
    %c0_66 = arith.constant 0 : index
    %c0_67 = arith.constant 0 : index
    %67 = vector.load %arg4[%c2_65, %c0_66, %c0_67] : memref<3x128x256xbf16, #tpu.memory_space<vmem>>, vector<1x128x256xbf16>
    %68 = vector.shape_cast %67 : vector<1x128x256xbf16> to vector<128x256xbf16>
    %cst_68 = arith.constant dense<0.000000e+00> : vector<16x256xf32>
    %69 = tpu.matmul %66, %68, %cst_68 {dimension_numbers = #tpu.dot_dimension_numbers<[1], [0], [0], [1], [0, 0, 1, 1], [], []>} : vector<16x128xbf16>, vector<128x256xbf16>, vector<16x256xf32> -> vector<16x256xf32>
    %70 = arith.addf %64, %69 : vector<16x256xf32>
    %c0_69 = arith.constant 0 : index
    %c0_70 = arith.constant 0 : index
    %71 = vector.load %arg5[%c0_69, %c0_70] : memref<1x256xf32, #tpu.memory_space<vmem>>, vector<1x256xf32>
    %72 = vector.broadcast %71 : vector<1x256xf32> to vector<16x256xf32>
    %73 = arith.addf %70, %72 : vector<16x256xf32>
    %cst_71 = arith.constant 0.000000e+00 : f32
    %74 = vector.broadcast %cst_71 : f32 to vector<16x256xf32>
    %75 = arith.maximumf %73, %74 : vector<16x256xf32>
    %c1_72 = arith.constant 1 : index
    %c0_73 = arith.constant 0 : index
    %76 = vector.load %arg42[%c1_72, %c0_73] : memref<18x256xf32, #tpu.memory_space<vmem>>, vector<16x256xf32>
    tpu.vector_store %arg42[%c1_72, %c0_73], %75 {strides = array<i32>} : memref<18x256xf32, #tpu.memory_space<vmem>>, vector<16x256xf32>,
    %c0_74 = arith.constant 0 : index
    %c0_75 = arith.constant 0 : index
    %77 = vector.load %arg42[%c0_74, %c0_75] : memref<18x256xf32, #tpu.memory_space<vmem>>, vector<15x256xf32>
    %78 = arith.truncf %77 : vector<15x256xf32> to vector<15x256xbf16>
    %c0_76 = arith.constant 0 : index
    %c0_77 = arith.constant 0 : index
    %c0_78 = arith.constant 0 : index
    %79 = vector.load %arg6[%c0_76, %c0_77, %c0_78] : memref<3x256x256xbf16, #tpu.memory_space<vmem>>, vector<1x256x256xbf16>
    %80 = vector.shape_cast %79 : vector<1x256x256xbf16> to vector<256x256xbf16>
    %cst_79 = arith.constant dense<0.000000e+00> : vector<15x256xf32>
    %81 = tpu.matmul %78, %80, %cst_79 {dimension_numbers = #tpu.dot_dimension_numbers<[1], [0], [0], [1], [0, 0, 1, 1], [], []>} : vector<15x256xbf16>, vector<256x256xbf16>, vector<15x256xf32> -> vector<15x256xf32>
    %c1_80 = arith.constant 1 : index
    %c0_81 = arith.constant 0 : index
    %82 = vector.load %arg42[%c1_80, %c0_81] : memref<18x256xf32, #tpu.memory_space<vmem>>, vector<15x256xf32>
    %83 = arith.truncf %82 : vector<15x256xf32> to vector<15x256xbf16>
    %c1_82 = arith.constant 1 : index
    %c0_83 = arith.constant 0 : index
    %c0_84 = arith.constant 0 : index
    %84 = vector.load %arg6[%c1_82, %c0_83, %c0_84] : memref<3x256x256xbf16, #tpu.memory_space<vmem>>, vector<1x256x256xbf16>
    %85 = vector.shape_cast %84 : vector<1x256x256xbf16> to vector<256x256xbf16>
    %cst_85 = arith.constant dense<0.000000e+00> : vector<15x256xf32>
    %86 = tpu.matmul %83, %85, %cst_85 {dimension_numbers = #tpu.dot_dimension_numbers<[1], [0], [0], [1], [0, 0, 1, 1], [], []>} : vector<15x256xbf16>, vector<256x256xbf16>, vector<15x256xf32> -> vector<15x256xf32>
    %87 = arith.addf %81, %86 : vector<15x256xf32>
    %c2_86 = arith.constant 2 : index
    %c0_87 = arith.constant 0 : index
    %88 = vector.load %arg42[%c2_86, %c0_87] : memref<18x256xf32, #tpu.memory_space<vmem>>, vector<15x256xf32>
    %89 = arith.truncf %88 : vector<15x256xf32> to vector<15x256xbf16>
    %c2_88 = arith.constant 2 : index
    %c0_89 = arith.constant 0 : index
    %c0_90 = arith.constant 0 : index
    %90 = vector.load %arg6[%c2_88, %c0_89, %c0_90] : memref<3x256x256xbf16, #tpu.memory_space<vmem>>, vector<1x256x256xbf16>
    %91 = vector.shape_cast %90 : vector<1x256x256xbf16> to vector<256x256xbf16>
    %cst_91 = arith.constant dense<0.000000e+00> : vector<15x256xf32>
    %92 = tpu.matmul %89, %91, %cst_91 {dimension_numbers = #tpu.dot_dimension_numbers<[1], [0], [0], [1], [0, 0, 1, 1], [], []>} : vector<15x256xbf16>, vector<256x256xbf16>, vector<15x256xf32> -> vector<15x256xf32>
    %93 = arith.addf %87, %92 : vector<15x256xf32>
    %94 = tpu.iota {dimensions = array<i32: 0>} : vector<8x15xi32>
    %95 = tpu.iota {dimensions = array<i32: 1>} : vector<8x15xi32>
    %c2_i32_92 = arith.constant 2 : i32
    %96 = vector.broadcast %c2_i32_92 : i32 to vector<8x15xi32>
    %97 = arith.muli %96, %94 : vector<8x15xi32>
    %98 = arith.cmpi eq, %95, %97 : vector<8x15xi32>
    %99 = arith.extui %98 : vector<8x15xi1> to vector<8x15xi32>
    %100 = arith.sitofp %99 : vector<8x15xi32> to vector<8x15xf32>
    %cst_93 = arith.constant dense<0.000000e+00> : vector<8x256xf32>
    %101 = tpu.matmul %100, %93, %cst_93 {dimension_numbers = #tpu.dot_dimension_numbers<[1], [0], [0], [1], [0, 0, 1, 1], [], []>} : vector<8x15xf32>, vector<15x256xf32>, vector<8x256xf32> -> vector<8x256xf32>
    %c0_94 = arith.constant 0 : index
    %c0_95 = arith.constant 0 : index
    %102 = vector.load %arg7[%c0_94, %c0_95] : memref<1x256xf32, #tpu.memory_space<vmem>>, vector<1x256xf32>
    %103 = vector.broadcast %102 : vector<1x256xf32> to vector<8x256xf32>
    %104 = arith.addf %101, %103 : vector<8x256xf32>
    %cst_96 = arith.constant 0.000000e+00 : f32
    %105 = vector.broadcast %cst_96 : f32 to vector<8x256xf32>
    %106 = arith.maximumf %104, %105 : vector<8x256xf32>
    %c1_97 = arith.constant 1 : index
    %c0_98 = arith.constant 0 : index
    %107 = vector.load %arg43[%c1_97, %c0_98] : memref<10x256xf32, #tpu.memory_space<vmem>>, vector<8x256xf32>
    tpu.vector_store %arg43[%c1_97, %c0_98], %106 {strides = array<i32>} : memref<10x256xf32, #tpu.memory_space<vmem>>, vector<8x256xf32>,
    %c0_99 = arith.constant 0 : index
    %c0_100 = arith.constant 0 : index
    %108 = vector.load %arg43[%c0_99, %c0_100] : memref<10x256xf32, #tpu.memory_space<vmem>>, vector<7x256xf32>
    %109 = arith.truncf %108 : vector<7x256xf32> to vector<7x256xbf16>
    %c0_101 = arith.constant 0 : index
    %c0_102 = arith.constant 0 : index
    %c0_103 = arith.constant 0 : index
    %110 = vector.load %arg8[%c0_101, %c0_102, %c0_103] : memref<3x256x128xbf16, #tpu.memory_space<vmem>>, vector<1x256x128xbf16>
    %111 = vector.shape_cast %110 : vector<1x256x128xbf16> to vector<256x128xbf16>
    %cst_104 = arith.constant dense<0.000000e+00> : vector<7x128xf32>
    %112 = tpu.matmul %109, %111, %cst_104 {dimension_numbers = #tpu.dot_dimension_numbers<[1], [0], [0], [1], [0, 0, 1, 1], [], []>} : vector<7x256xbf16>, vector<256x128xbf16>, vector<7x128xf32> -> vector<7x128xf32>
    %c1_105 = arith.constant 1 : index
    %c0_106 = arith.constant 0 : index
    %113 = vector.load %arg43[%c1_105, %c0_106] : memref<10x256xf32, #tpu.memory_space<vmem>>, vector<7x256xf32>
    %114 = arith.truncf %113 : vector<7x256xf32> to vector<7x256xbf16>
    %c1_107 = arith.constant 1 : index
    %c0_108 = arith.constant 0 : index
    %c0_109 = arith.constant 0 : index
    %115 = vector.load %arg8[%c1_107, %c0_108, %c0_109] : memref<3x256x128xbf16, #tpu.memory_space<vmem>>, vector<1x256x128xbf16>
    %116 = vector.shape_cast %115 : vector<1x256x128xbf16> to vector<256x128xbf16>
    %cst_110 = arith.constant dense<0.000000e+00> : vector<7x128xf32>
    %117 = tpu.matmul %114, %116, %cst_110 {dimension_numbers = #tpu.dot_dimension_numbers<[1], [0], [0], [1], [0, 0, 1, 1], [], []>} : vector<7x256xbf16>, vector<256x128xbf16>, vector<7x128xf32> -> vector<7x128xf32>
    %118 = arith.addf %112, %117 : vector<7x128xf32>
    %c2_111 = arith.constant 2 : index
    %c0_112 = arith.constant 0 : index
    %119 = vector.load %arg43[%c2_111, %c0_112] : memref<10x256xf32, #tpu.memory_space<vmem>>, vector<7x256xf32>
    %120 = arith.truncf %119 : vector<7x256xf32> to vector<7x256xbf16>
    %c2_113 = arith.constant 2 : index
    %c0_114 = arith.constant 0 : index
    %c0_115 = arith.constant 0 : index
    %121 = vector.load %arg8[%c2_113, %c0_114, %c0_115] : memref<3x256x128xbf16, #tpu.memory_space<vmem>>, vector<1x256x128xbf16>
    %122 = vector.shape_cast %121 : vector<1x256x128xbf16> to vector<256x128xbf16>
    %cst_116 = arith.constant dense<0.000000e+00> : vector<7x128xf32>
    %123 = tpu.matmul %120, %122, %cst_116 {dimension_numbers = #tpu.dot_dimension_numbers<[1], [0], [0], [1], [0, 0, 1, 1], [], []>} : vector<7x256xbf16>, vector<256x128xbf16>, vector<7x128xf32> -> vector<7x128xf32>
    %124 = arith.addf %118, %123 : vector<7x128xf32>
    %125 = tpu.iota {dimensions = array<i32: 0>} : vector<4x7xi32>
    %126 = tpu.iota {dimensions = array<i32: 1>} : vector<4x7xi32>
    %c2_i32_117 = arith.constant 2 : i32
    %127 = vector.broadcast %c2_i32_117 : i32 to vector<4x7xi32>
    %128 = arith.muli %127, %125 : vector<4x7xi32>
    %129 = arith.cmpi eq, %126, %128 : vector<4x7xi32>
    %130 = arith.extui %129 : vector<4x7xi1> to vector<4x7xi32>
    %131 = arith.sitofp %130 : vector<4x7xi32> to vector<4x7xf32>
    %cst_118 = arith.constant dense<0.000000e+00> : vector<4x128xf32>
    %132 = tpu.matmul %131, %124, %cst_118 {dimension_numbers = #tpu.dot_dimension_numbers<[1], [0], [0], [1], [0, 0, 1, 1], [], []>} : vector<4x7xf32>, vector<7x128xf32>, vector<4x128xf32> -> vector<4x128xf32>
    %c0_119 = arith.constant 0 : index
    %c0_120 = arith.constant 0 : index
    %133 = vector.load %arg9[%c0_119, %c0_120] : memref<1x128xf32, #tpu.memory_space<vmem>>, vector<1x128xf32>
    %134 = vector.broadcast %133 : vector<1x128xf32> to vector<4x128xf32>
    %135 = arith.addf %132, %134 : vector<4x128xf32>
    %cst_121 = arith.constant 0.000000e+00 : f32
    %136 = vector.broadcast %cst_121 : f32 to vector<4x128xf32>
    %137 = arith.maximumf %135, %136 : vector<4x128xf32>
    %c1_122 = arith.constant 1 : index
    %c0_123 = arith.constant 0 : index
    %138 = vector.load %arg44[%c1_122, %c0_123] : memref<6x128xf32, #tpu.memory_space<vmem>>, vector<4x128xf32>
    tpu.vector_store %arg44[%c1_122, %c0_123], %137 {strides = array<i32>} : memref<6x128xf32, #tpu.memory_space<vmem>>, vector<4x128xf32>,
    %c0_124 = arith.constant 0 : index
    %c0_125 = arith.constant 0 : index
    %139 = vector.load %arg44[%c0_124, %c0_125] : memref<6x128xf32, #tpu.memory_space<vmem>>, vector<3x128xf32>
    %140 = arith.truncf %139 : vector<3x128xf32> to vector<3x128xbf16>
    %c0_126 = arith.constant 0 : index
    %c0_127 = arith.constant 0 : index
    %c0_128 = arith.constant 0 : index
    %141 = vector.load %arg10[%c0_126, %c0_127, %c0_128] : memref<3x128x64xbf16, #tpu.memory_space<vmem>>, vector<1x128x64xbf16>
    %142 = vector.shape_cast %141 : vector<1x128x64xbf16> to vector<128x64xbf16>
    %cst_129 = arith.constant dense<0.000000e+00> : vector<3x64xf32>
    %143 = tpu.matmul %140, %142, %cst_129 {dimension_numbers = #tpu.dot_dimension_numbers<[1], [0], [0], [1], [0, 0, 1, 1], [], []>} : vector<3x128xbf16>, vector<128x64xbf16>, vector<3x64xf32> -> vector<3x64xf32>
    %c1_130 = arith.constant 1 : index
    %c0_131 = arith.constant 0 : index
    %144 = vector.load %arg44[%c1_130, %c0_131] : memref<6x128xf32, #tpu.memory_space<vmem>>, vector<3x128xf32>
    %145 = arith.truncf %144 : vector<3x128xf32> to vector<3x128xbf16>
    %c1_132 = arith.constant 1 : index
    %c0_133 = arith.constant 0 : index
    %c0_134 = arith.constant 0 : index
    %146 = vector.load %arg10[%c1_132, %c0_133, %c0_134] : memref<3x128x64xbf16, #tpu.memory_space<vmem>>, vector<1x128x64xbf16>
    %147 = vector.shape_cast %146 : vector<1x128x64xbf16> to vector<128x64xbf16>
    %cst_135 = arith.constant dense<0.000000e+00> : vector<3x64xf32>
    %148 = tpu.matmul %145, %147, %cst_135 {dimension_numbers = #tpu.dot_dimension_numbers<[1], [0], [0], [1], [0, 0, 1, 1], [], []>} : vector<3x128xbf16>, vector<128x64xbf16>, vector<3x64xf32> -> vector<3x64xf32>
    %149 = arith.addf %143, %148 : vector<3x64xf32>
    %c2_136 = arith.constant 2 : index
    %c0_137 = arith.constant 0 : index
    %150 = vector.load %arg44[%c2_136, %c0_137] : memref<6x128xf32, #tpu.memory_space<vmem>>, vector<3x128xf32>
    %151 = arith.truncf %150 : vector<3x128xf32> to vector<3x128xbf16>
    %c2_138 = arith.constant 2 : index
    %c0_139 = arith.constant 0 : index
    %c0_140 = arith.constant 0 : index
    %152 = vector.load %arg10[%c2_138, %c0_139, %c0_140] : memref<3x128x64xbf16, #tpu.memory_space<vmem>>, vector<1x128x64xbf16>
    %153 = vector.shape_cast %152 : vector<1x128x64xbf16> to vector<128x64xbf16>
    %cst_141 = arith.constant dense<0.000000e+00> : vector<3x64xf32>
    %154 = tpu.matmul %151, %153, %cst_141 {dimension_numbers = #tpu.dot_dimension_numbers<[1], [0], [0], [1], [0, 0, 1, 1], [], []>} : vector<3x128xbf16>, vector<128x64xbf16>, vector<3x64xf32> -> vector<3x64xf32>
    %155 = arith.addf %149, %154 : vector<3x64xf32>
    %156 = tpu.iota {dimensions = array<i32: 0>} : vector<2x3xi32>
    %157 = tpu.iota {dimensions = array<i32: 1>} : vector<2x3xi32>
    %c2_i32_142 = arith.constant 2 : i32
    %158 = vector.broadcast %c2_i32_142 : i32 to vector<2x3xi32>
    %159 = arith.muli %158, %156 : vector<2x3xi32>
    %160 = arith.cmpi eq, %157, %159 : vector<2x3xi32>
    %161 = arith.extui %160 : vector<2x3xi1> to vector<2x3xi32>
    %162 = arith.sitofp %161 : vector<2x3xi32> to vector<2x3xf32>
    %cst_143 = arith.constant dense<0.000000e+00> : vector<2x64xf32>
    %163 = tpu.matmul %162, %155, %cst_143 {dimension_numbers = #tpu.dot_dimension_numbers<[1], [0], [0], [1], [0, 0, 1, 1], [], []>} : vector<2x3xf32>, vector<3x64xf32>, vector<2x64xf32> -> vector<2x64xf32>
    %c0_144 = arith.constant 0 : index
    %c0_145 = arith.constant 0 : index
    %164 = vector.load %arg11[%c0_144, %c0_145] : memref<1x64xf32, #tpu.memory_space<vmem>>, vector<1x64xf32>
    %165 = vector.broadcast %164 : vector<1x64xf32> to vector<2x64xf32>
    %166 = arith.addf %163, %165 : vector<2x64xf32>
    %cst_146 = arith.constant 0.000000e+00 : f32
    %167 = vector.broadcast %cst_146 : f32 to vector<2x64xf32>
    %168 = arith.maximumf %166, %167 : vector<2x64xf32>
    %c1_147 = arith.constant 1 : index
    %c0_148 = arith.constant 0 : index
    %169 = vector.load %arg45[%c1_147, %c0_148] : memref<4x64xf32, #tpu.memory_space<vmem>>, vector<2x64xf32>
    tpu.vector_store %arg45[%c1_147, %c0_148], %168 {strides = array<i32>} : memref<4x64xf32, #tpu.memory_space<vmem>>, vector<2x64xf32>,
    %c0_149 = arith.constant 0 : index
    %c0_150 = arith.constant 0 : index
    %170 = vector.load %arg45[%c0_149, %c0_150] : memref<4x64xf32, #tpu.memory_space<vmem>>, vector<1x64xf32>
    %171 = arith.truncf %170 : vector<1x64xf32> to vector<1x64xbf16>
    %c0_151 = arith.constant 0 : index
    %c0_152 = arith.constant 0 : index
    %c0_153 = arith.constant 0 : index
    %172 = vector.load %arg12[%c0_151, %c0_152, %c0_153] : memref<3x64x32xbf16, #tpu.memory_space<vmem>>, vector<1x64x32xbf16>
    %173 = vector.shape_cast %172 : vector<1x64x32xbf16> to vector<64x32xbf16>
    %cst_154 = arith.constant dense<0.000000e+00> : vector<1x32xf32>
    %174 = tpu.matmul %171, %173, %cst_154 {dimension_numbers = #tpu.dot_dimension_numbers<[1], [0], [0], [1], [0, 0, 1, 1], [], []>} : vector<1x64xbf16>, vector<64x32xbf16>, vector<1x32xf32> -> vector<1x32xf32>
    %c1_155 = arith.constant 1 : index
    %c0_156 = arith.constant 0 : index
    %175 = vector.load %arg45[%c1_155, %c0_156] : memref<4x64xf32, #tpu.memory_space<vmem>>, vector<1x64xf32>
    %176 = arith.truncf %175 : vector<1x64xf32> to vector<1x64xbf16>
    %c1_157 = arith.constant 1 : index
    %c0_158 = arith.constant 0 : index
    %c0_159 = arith.constant 0 : index
    %177 = vector.load %arg12[%c1_157, %c0_158, %c0_159] : memref<3x64x32xbf16, #tpu.memory_space<vmem>>, vector<1x64x32xbf16>
    %178 = vector.shape_cast %177 : vector<1x64x32xbf16> to vector<64x32xbf16>
    %cst_160 = arith.constant dense<0.000000e+00> : vector<1x32xf32>
    %179 = tpu.matmul %176, %178, %cst_160 {dimension_numbers = #tpu.dot_dimension_numbers<[1], [0], [0], [1], [0, 0, 1, 1], [], []>} : vector<1x64xbf16>, vector<64x32xbf16>, vector<1x32xf32> -> vector<1x32xf32>
    %180 = arith.addf %174, %179 : vector<1x32xf32>
    %c2_161 = arith.constant 2 : index
    %c0_162 = arith.constant 0 : index
    %181 = vector.load %arg45[%c2_161, %c0_162] : memref<4x64xf32, #tpu.memory_space<vmem>>, vector<1x64xf32>
    %182 = arith.truncf %181 : vector<1x64xf32> to vector<1x64xbf16>
    %c2_163 = arith.constant 2 : index
    %c0_164 = arith.constant 0 : index
    %c0_165 = arith.constant 0 : index
    %183 = vector.load %arg12[%c2_163, %c0_164, %c0_165] : memref<3x64x32xbf16, #tpu.memory_space<vmem>>, vector<1x64x32xbf16>
    %184 = vector.shape_cast %183 : vector<1x64x32xbf16> to vector<64x32xbf16>
    %cst_166 = arith.constant dense<0.000000e+00> : vector<1x32xf32>
    %185 = tpu.matmul %182, %184, %cst_166 {dimension_numbers = #tpu.dot_dimension_numbers<[1], [0], [0], [1], [0, 0, 1, 1], [], []>} : vector<1x64xbf16>, vector<64x32xbf16>, vector<1x32xf32> -> vector<1x32xf32>
    %186 = arith.addf %180, %185 : vector<1x32xf32>
    %c0_167 = arith.constant 0 : index
    %c0_168 = arith.constant 0 : index
    %187 = vector.load %arg13[%c0_167, %c0_168] : memref<1x32xf32, #tpu.memory_space<vmem>>, vector<1x32xf32>
    %188 = arith.addf %186, %187 : vector<1x32xf32>
    %cst_169 = arith.constant 0.000000e+00 : f32
    %189 = vector.broadcast %cst_169 : f32 to vector<1x32xf32>
    %190 = arith.maximumf %188, %189 : vector<1x32xf32>
    %c1_170 = arith.constant 1 : index
    %c0_171 = arith.constant 0 : index
    %191 = vector.load %arg46[%c1_170, %c0_171] : memref<3x32xf32, #tpu.memory_space<vmem>>, vector<1x32xf32>
    tpu.vector_store %arg46[%c1_170, %c0_171], %190 {strides = array<i32>} : memref<3x32xf32, #tpu.memory_space<vmem>>, vector<1x32xf32>,
    %c0_172 = arith.constant 0 : index
    %c0_173 = arith.constant 0 : index
    %192 = vector.load %arg46[%c0_172, %c0_173] : memref<3x32xf32, #tpu.memory_space<vmem>>, vector<1x32xf32>
    %193 = arith.truncf %192 : vector<1x32xf32> to vector<1x32xbf16>
    %c0_174 = arith.constant 0 : index
    %c0_175 = arith.constant 0 : index
    %c0_176 = arith.constant 0 : index
    %194 = vector.load %arg14[%c0_174, %c0_175, %c0_176] : memref<3x32x32xbf16, #tpu.memory_space<vmem>>, vector<1x32x32xbf16>
    %195 = vector.shape_cast %194 : vector<1x32x32xbf16> to vector<32x32xbf16>
    %cst_177 = arith.constant dense<0.000000e+00> : vector<1x32xf32>
    %196 = tpu.matmul %193, %195, %cst_177 {dimension_numbers = #tpu.dot_dimension_numbers<[1], [0], [0], [1], [0, 0, 1, 1], [], []>} : vector<1x32xbf16>, vector<32x32xbf16>, vector<1x32xf32> -> vector<1x32xf32>
    %c1_178 = arith.constant 1 : index
    %c0_179 = arith.constant 0 : index
    %197 = vector.load %arg46[%c1_178, %c0_179] : memref<3x32xf32, #tpu.memory_space<vmem>>, vector<1x32xf32>
    %198 = arith.truncf %197 : vector<1x32xf32> to vector<1x32xbf16>
    %c1_180 = arith.constant 1 : index
    %c0_181 = arith.constant 0 : index
    %c0_182 = arith.constant 0 : index
    %199 = vector.load %arg14[%c1_180, %c0_181, %c0_182] : memref<3x32x32xbf16, #tpu.memory_space<vmem>>, vector<1x32x32xbf16>
    %200 = vector.shape_cast %199 : vector<1x32x32xbf16> to vector<32x32xbf16>
    %cst_183 = arith.constant dense<0.000000e+00> : vector<1x32xf32>
    %201 = tpu.matmul %198, %200, %cst_183 {dimension_numbers = #tpu.dot_dimension_numbers<[1], [0], [0], [1], [0, 0, 1, 1], [], []>} : vector<1x32xbf16>, vector<32x32xbf16>, vector<1x32xf32> -> vector<1x32xf32>
    %202 = arith.addf %196, %201 : vector<1x32xf32>
    %c2_184 = arith.constant 2 : index
    %c0_185 = arith.constant 0 : index
    %203 = vector.load %arg46[%c2_184, %c0_185] : memref<3x32xf32, #tpu.memory_space<vmem>>, vector<1x32xf32>
    %204 = arith.truncf %203 : vector<1x32xf32> to vector<1x32xbf16>
    %c2_186 = arith.constant 2 : index
    %c0_187 = arith.constant 0 : index
    %c0_188 = arith.constant 0 : index
    %205 = vector.load %arg14[%c2_186, %c0_187, %c0_188] : memref<3x32x32xbf16, #tpu.memory_space<vmem>>, vector<1x32x32xbf16>
    %206 = vector.shape_cast %205 : vector<1x32x32xbf16> to vector<32x32xbf16>
    %cst_189 = arith.constant dense<0.000000e+00> : vector<1x32xf32>
    %207 = tpu.matmul %204, %206, %cst_189 {dimension_numbers = #tpu.dot_dimension_numbers<[1], [0], [0], [1], [0, 0, 1, 1], [], []>} : vector<1x32xbf16>, vector<32x32xbf16>, vector<1x32xf32> -> vector<1x32xf32>
    %208 = arith.addf %202, %207 : vector<1x32xf32>
    %c0_190 = arith.constant 0 : index
    %c0_191 = arith.constant 0 : index
    %209 = vector.load %arg15[%c0_190, %c0_191] : memref<1x32xf32, #tpu.memory_space<vmem>>, vector<1x32xf32>
    %210 = arith.addf %208, %209 : vector<1x32xf32>
    %cst_192 = arith.constant 0.000000e+00 : f32
    %211 = vector.broadcast %cst_192 : f32 to vector<1x32xf32>
    %212 = arith.maximumf %210, %211 : vector<1x32xf32>
    %c1_193 = arith.constant 1 : index
    %c0_194 = arith.constant 0 : index
    %213 = vector.load %arg47[%c1_193, %c0_194] : memref<3x32xf32, #tpu.memory_space<vmem>>, vector<1x32xf32>
    tpu.vector_store %arg47[%c1_193, %c0_194], %212 {strides = array<i32>} : memref<3x32xf32, #tpu.memory_space<vmem>>, vector<1x32xf32>,
    %c0_195 = arith.constant 0 : index
    %c0_196 = arith.constant 0 : index
    %214 = vector.load %arg42[%c0_195, %c0_196] : memref<18x256xf32, #tpu.memory_space<vmem>>, vector<16x256xf32>
    %215 = arith.truncf %214 : vector<16x256xf32> to vector<16x256xbf16>
    %c0_197 = arith.constant 0 : index
    %c0_198 = arith.constant 0 : index
    %c0_199 = arith.constant 0 : index
    %216 = vector.load %arg16[%c0_197, %c0_198, %c0_199] : memref<3x256x224xbf16, #tpu.memory_space<vmem>>, vector<1x256x224xbf16>
    %217 = vector.shape_cast %216 : vector<1x256x224xbf16> to vector<256x224xbf16>
    %cst_200 = arith.constant dense<0.000000e+00> : vector<16x224xf32>
    %218 = tpu.matmul %215, %217, %cst_200 {dimension_numbers = #tpu.dot_dimension_numbers<[1], [0], [0], [1], [0, 0, 1, 1], [], []>} : vector<16x256xbf16>, vector<256x224xbf16>, vector<16x224xf32> -> vector<16x224xf32>
    %c1_201 = arith.constant 1 : index
    %c0_202 = arith.constant 0 : index
    %219 = vector.load %arg42[%c1_201, %c0_202] : memref<18x256xf32, #tpu.memory_space<vmem>>, vector<16x256xf32>
    %220 = arith.truncf %219 : vector<16x256xf32> to vector<16x256xbf16>
    %c1_203 = arith.constant 1 : index
    %c0_204 = arith.constant 0 : index
    %c0_205 = arith.constant 0 : index
    %221 = vector.load %arg16[%c1_203, %c0_204, %c0_205] : memref<3x256x224xbf16, #tpu.memory_space<vmem>>, vector<1x256x224xbf16>
    %222 = vector.shape_cast %221 : vector<1x256x224xbf16> to vector<256x224xbf16>
    %cst_206 = arith.constant dense<0.000000e+00> : vector<16x224xf32>
    %223 = tpu.matmul %220, %222, %cst_206 {dimension_numbers = #tpu.dot_dimension_numbers<[1], [0], [0], [1], [0, 0, 1, 1], [], []>} : vector<16x256xbf16>, vector<256x224xbf16>, vector<16x224xf32> -> vector<16x224xf32>
    %224 = arith.addf %218, %223 : vector<16x224xf32>
    %c2_207 = arith.constant 2 : index
    %c0_208 = arith.constant 0 : index
    %225 = vector.load %arg42[%c2_207, %c0_208] : memref<18x256xf32, #tpu.memory_space<vmem>>, vector<16x256xf32>
    %226 = arith.truncf %225 : vector<16x256xf32> to vector<16x256xbf16>
    %c2_209 = arith.constant 2 : index
    %c0_210 = arith.constant 0 : index
    %c0_211 = arith.constant 0 : index
    %227 = vector.load %arg16[%c2_209, %c0_210, %c0_211] : memref<3x256x224xbf16, #tpu.memory_space<vmem>>, vector<1x256x224xbf16>
    %228 = vector.shape_cast %227 : vector<1x256x224xbf16> to vector<256x224xbf16>
    %cst_212 = arith.constant dense<0.000000e+00> : vector<16x224xf32>
    %229 = tpu.matmul %226, %228, %cst_212 {dimension_numbers = #tpu.dot_dimension_numbers<[1], [0], [0], [1], [0, 0, 1, 1], [], []>} : vector<16x256xbf16>, vector<256x224xbf16>, vector<16x224xf32> -> vector<16x224xf32>
    %230 = arith.addf %224, %229 : vector<16x224xf32>
    %c0_213 = arith.constant 0 : index
    %c0_214 = arith.constant 0 : index
    %231 = vector.load %arg17[%c0_213, %c0_214] : memref<1x224xf32, #tpu.memory_space<vmem>>, vector<1x224xf32>
    %232 = vector.broadcast %231 : vector<1x224xf32> to vector<16x224xf32>
    %233 = arith.addf %230, %232 : vector<16x224xf32>
    %234 = vector.extract_strided_slice %233 {offsets = [0, 0], sizes = [16, 96], strides = [1, 1]} : vector<16x224xf32> to vector<16x96xf32>
    %c0_215 = arith.constant 0 : index
    %c0_216 = arith.constant 0 : index
    %c0_217 = arith.constant 0 : index
    %235 = vector.load %arg28[%c0_215, %c0_216, %c0_217] : memref<1x16x96xf32, #tpu.memory_space<vmem>>, vector<1x16x96xf32>
    %236 = vector.shape_cast %235 : vector<1x16x96xf32> to vector<16x96xf32>
    %237 = vector.shape_cast %234 : vector<16x96xf32> to vector<1x16x96xf32>
    tpu.vector_store %arg28[%c0_215, %c0_216, %c0_217], %237 {strides = array<i32>} : memref<1x16x96xf32, #tpu.memory_space<vmem>>, vector<1x16x96xf32>,
    %238 = vector.extract_strided_slice %233 {offsets = [0, 96], sizes = [16, 128], strides = [1, 1]} : vector<16x224xf32> to vector<16x128xf32>
    %c0_218 = arith.constant 0 : index
    %c0_219 = arith.constant 0 : index
    %c0_220 = arith.constant 0 : index
    %239 = vector.load %arg34[%c0_218, %c0_219, %c0_220] : memref<1x16x128xf32, #tpu.memory_space<vmem>>, vector<1x16x128xf32>
    %240 = vector.shape_cast %239 : vector<1x16x128xf32> to vector<16x128xf32>
    %241 = vector.shape_cast %238 : vector<16x128xf32> to vector<1x16x128xf32>
    tpu.vector_store %arg34[%c0_218, %c0_219, %c0_220], %241 {strides = array<i32>} : memref<1x16x128xf32, #tpu.memory_space<vmem>>, vector<1x16x128xf32>,
    %c0_221 = arith.constant 0 : index
    %c0_222 = arith.constant 0 : index
    %242 = vector.load %arg43[%c0_221, %c0_222] : memref<10x256xf32, #tpu.memory_space<vmem>>, vector<8x256xf32>
    %243 = arith.truncf %242 : vector<8x256xf32> to vector<8x256xbf16>
    %c0_223 = arith.constant 0 : index
    %c0_224 = arith.constant 0 : index
    %c0_225 = arith.constant 0 : index
    %244 = vector.load %arg18[%c0_223, %c0_224, %c0_225] : memref<3x256x112xbf16, #tpu.memory_space<vmem>>, vector<1x256x112xbf16>
    %245 = vector.shape_cast %244 : vector<1x256x112xbf16> to vector<256x112xbf16>
    %cst_226 = arith.constant dense<0.000000e+00> : vector<8x112xf32>
    %246 = tpu.matmul %243, %245, %cst_226 {dimension_numbers = #tpu.dot_dimension_numbers<[1], [0], [0], [1], [0, 0, 1, 1], [], []>} : vector<8x256xbf16>, vector<256x112xbf16>, vector<8x112xf32> -> vector<8x112xf32>
    %c1_227 = arith.constant 1 : index
    %c0_228 = arith.constant 0 : index
    %247 = vector.load %arg43[%c1_227, %c0_228] : memref<10x256xf32, #tpu.memory_space<vmem>>, vector<8x256xf32>
    %248 = arith.truncf %247 : vector<8x256xf32> to vector<8x256xbf16>
    %c1_229 = arith.constant 1 : index
    %c0_230 = arith.constant 0 : index
    %c0_231 = arith.constant 0 : index
    %249 = vector.load %arg18[%c1_229, %c0_230, %c0_231] : memref<3x256x112xbf16, #tpu.memory_space<vmem>>, vector<1x256x112xbf16>
    %250 = vector.shape_cast %249 : vector<1x256x112xbf16> to vector<256x112xbf16>
    %cst_232 = arith.constant dense<0.000000e+00> : vector<8x112xf32>
    %251 = tpu.matmul %248, %250, %cst_232 {dimension_numbers = #tpu.dot_dimension_numbers<[1], [0], [0], [1], [0, 0, 1, 1], [], []>} : vector<8x256xbf16>, vector<256x112xbf16>, vector<8x112xf32> -> vector<8x112xf32>
    %252 = arith.addf %246, %251 : vector<8x112xf32>
    %c2_233 = arith.constant 2 : index
    %c0_234 = arith.constant 0 : index
    %253 = vector.load %arg43[%c2_233, %c0_234] : memref<10x256xf32, #tpu.memory_space<vmem>>, vector<8x256xf32>
    %254 = arith.truncf %253 : vector<8x256xf32> to vector<8x256xbf16>
    %c2_235 = arith.constant 2 : index
    %c0_236 = arith.constant 0 : index
    %c0_237 = arith.constant 0 : index
    %255 = vector.load %arg18[%c2_235, %c0_236, %c0_237] : memref<3x256x112xbf16, #tpu.memory_space<vmem>>, vector<1x256x112xbf16>
    %256 = vector.shape_cast %255 : vector<1x256x112xbf16> to vector<256x112xbf16>
    %cst_238 = arith.constant dense<0.000000e+00> : vector<8x112xf32>
    %257 = tpu.matmul %254, %256, %cst_238 {dimension_numbers = #tpu.dot_dimension_numbers<[1], [0], [0], [1], [0, 0, 1, 1], [], []>} : vector<8x256xbf16>, vector<256x112xbf16>, vector<8x112xf32> -> vector<8x112xf32>
    %258 = arith.addf %252, %257 : vector<8x112xf32>
    %c0_239 = arith.constant 0 : index
    %c0_240 = arith.constant 0 : index
    %259 = vector.load %arg19[%c0_239, %c0_240] : memref<1x112xf32, #tpu.memory_space<vmem>>, vector<1x112xf32>
    %260 = vector.broadcast %259 : vector<1x112xf32> to vector<8x112xf32>
    %261 = arith.addf %258, %260 : vector<8x112xf32>
    %262 = vector.extract_strided_slice %261 {offsets = [0, 0], sizes = [8, 48], strides = [1, 1]} : vector<8x112xf32> to vector<8x48xf32>
    %c0_241 = arith.constant 0 : index
    %c0_242 = arith.constant 0 : index
    %c0_243 = arith.constant 0 : index
    %263 = vector.load %arg29[%c0_241, %c0_242, %c0_243] : memref<1x8x48xf32, #tpu.memory_space<vmem>>, vector<1x8x48xf32>
    %264 = vector.shape_cast %263 : vector<1x8x48xf32> to vector<8x48xf32>
    %265 = vector.shape_cast %262 : vector<8x48xf32> to vector<1x8x48xf32>
    tpu.vector_store %arg29[%c0_241, %c0_242, %c0_243], %265 {strides = array<i32>} : memref<1x8x48xf32, #tpu.memory_space<vmem>>, vector<1x8x48xf32>,
    %266 = vector.extract_strided_slice %261 {offsets = [0, 48], sizes = [8, 64], strides = [1, 1]} : vector<8x112xf32> to vector<8x64xf32>
    %c0_244 = arith.constant 0 : index
    %c0_245 = arith.constant 0 : index
    %c0_246 = arith.constant 0 : index
    %267 = vector.load %arg35[%c0_244, %c0_245, %c0_246] : memref<1x8x64xf32, #tpu.memory_space<vmem>>, vector<1x8x64xf32>
    %268 = vector.shape_cast %267 : vector<1x8x64xf32> to vector<8x64xf32>
    %269 = vector.shape_cast %266 : vector<8x64xf32> to vector<1x8x64xf32>
    tpu.vector_store %arg35[%c0_244, %c0_245, %c0_246], %269 {strides = array<i32>} : memref<1x8x64xf32, #tpu.memory_space<vmem>>, vector<1x8x64xf32>,
    %c0_247 = arith.constant 0 : index
    %c0_248 = arith.constant 0 : index
    %270 = vector.load %arg44[%c0_247, %c0_248] : memref<6x128xf32, #tpu.memory_space<vmem>>, vector<4x128xf32>
    %271 = arith.truncf %270 : vector<4x128xf32> to vector<4x128xbf16>
    %c0_249 = arith.constant 0 : index
    %c0_250 = arith.constant 0 : index
    %c0_251 = arith.constant 0 : index
    %272 = vector.load %arg20[%c0_249, %c0_250, %c0_251] : memref<3x128x56xbf16, #tpu.memory_space<vmem>>, vector<1x128x56xbf16>
    %273 = vector.shape_cast %272 : vector<1x128x56xbf16> to vector<128x56xbf16>
    %cst_252 = arith.constant dense<0.000000e+00> : vector<4x56xf32>
    %274 = tpu.matmul %271, %273, %cst_252 {dimension_numbers = #tpu.dot_dimension_numbers<[1], [0], [0], [1], [0, 0, 1, 1], [], []>} : vector<4x128xbf16>, vector<128x56xbf16>, vector<4x56xf32> -> vector<4x56xf32>
    %c1_253 = arith.constant 1 : index
    %c0_254 = arith.constant 0 : index
    %275 = vector.load %arg44[%c1_253, %c0_254] : memref<6x128xf32, #tpu.memory_space<vmem>>, vector<4x128xf32>
    %276 = arith.truncf %275 : vector<4x128xf32> to vector<4x128xbf16>
    %c1_255 = arith.constant 1 : index
    %c0_256 = arith.constant 0 : index
    %c0_257 = arith.constant 0 : index
    %277 = vector.load %arg20[%c1_255, %c0_256, %c0_257] : memref<3x128x56xbf16, #tpu.memory_space<vmem>>, vector<1x128x56xbf16>
    %278 = vector.shape_cast %277 : vector<1x128x56xbf16> to vector<128x56xbf16>
    %cst_258 = arith.constant dense<0.000000e+00> : vector<4x56xf32>
    %279 = tpu.matmul %276, %278, %cst_258 {dimension_numbers = #tpu.dot_dimension_numbers<[1], [0], [0], [1], [0, 0, 1, 1], [], []>} : vector<4x128xbf16>, vector<128x56xbf16>, vector<4x56xf32> -> vector<4x56xf32>
    %280 = arith.addf %274, %279 : vector<4x56xf32>
    %c2_259 = arith.constant 2 : index
    %c0_260 = arith.constant 0 : index
    %281 = vector.load %arg44[%c2_259, %c0_260] : memref<6x128xf32, #tpu.memory_space<vmem>>, vector<4x128xf32>
    %282 = arith.truncf %281 : vector<4x128xf32> to vector<4x128xbf16>
    %c2_261 = arith.constant 2 : index
    %c0_262 = arith.constant 0 : index
    %c0_263 = arith.constant 0 : index
    %283 = vector.load %arg20[%c2_261, %c0_262, %c0_263] : memref<3x128x56xbf16, #tpu.memory_space<vmem>>, vector<1x128x56xbf16>
    %284 = vector.shape_cast %283 : vector<1x128x56xbf16> to vector<128x56xbf16>
    %cst_264 = arith.constant dense<0.000000e+00> : vector<4x56xf32>
    %285 = tpu.matmul %282, %284, %cst_264 {dimension_numbers = #tpu.dot_dimension_numbers<[1], [0], [0], [1], [0, 0, 1, 1], [], []>} : vector<4x128xbf16>, vector<128x56xbf16>, vector<4x56xf32> -> vector<4x56xf32>
    %286 = arith.addf %280, %285 : vector<4x56xf32>
    %c0_265 = arith.constant 0 : index
    %c0_266 = arith.constant 0 : index
    %287 = vector.load %arg21[%c0_265, %c0_266] : memref<1x56xf32, #tpu.memory_space<vmem>>, vector<1x56xf32>
    %288 = vector.broadcast %287 : vector<1x56xf32> to vector<4x56xf32>
    %289 = arith.addf %286, %288 : vector<4x56xf32>
    %290 = vector.extract_strided_slice %289 {offsets = [0, 0], sizes = [4, 24], strides = [1, 1]} : vector<4x56xf32> to vector<4x24xf32>
    %c0_267 = arith.constant 0 : index
    %c0_268 = arith.constant 0 : index
    %c0_269 = arith.constant 0 : index
    %291 = vector.load %arg30[%c0_267, %c0_268, %c0_269] : memref<1x4x24xf32, #tpu.memory_space<vmem>>, vector<1x4x24xf32>
    %292 = vector.shape_cast %291 : vector<1x4x24xf32> to vector<4x24xf32>
    %293 = vector.shape_cast %290 : vector<4x24xf32> to vector<1x4x24xf32>
    tpu.vector_store %arg30[%c0_267, %c0_268, %c0_269], %293 {strides = array<i32>} : memref<1x4x24xf32, #tpu.memory_space<vmem>>, vector<1x4x24xf32>,
    %294 = vector.extract_strided_slice %289 {offsets = [0, 24], sizes = [4, 32], strides = [1, 1]} : vector<4x56xf32> to vector<4x32xf32>
    %c0_270 = arith.constant 0 : index
    %c0_271 = arith.constant 0 : index
    %c0_272 = arith.constant 0 : index
    %295 = vector.load %arg36[%c0_270, %c0_271, %c0_272] : memref<1x4x32xf32, #tpu.memory_space<vmem>>, vector<1x4x32xf32>
    %296 = vector.shape_cast %295 : vector<1x4x32xf32> to vector<4x32xf32>
    %297 = vector.shape_cast %294 : vector<4x32xf32> to vector<1x4x32xf32>
    tpu.vector_store %arg36[%c0_270, %c0_271, %c0_272], %297 {strides = array<i32>} : memref<1x4x32xf32, #tpu.memory_space<vmem>>, vector<1x4x32xf32>,
    %c0_273 = arith.constant 0 : index
    %c0_274 = arith.constant 0 : index
    %298 = vector.load %arg45[%c0_273, %c0_274] : memref<4x64xf32, #tpu.memory_space<vmem>>, vector<2x64xf32>
    %299 = arith.truncf %298 : vector<2x64xf32> to vector<2x64xbf16>
    %c0_275 = arith.constant 0 : index
    %c0_276 = arith.constant 0 : index
    %c0_277 = arith.constant 0 : index
    %300 = vector.load %arg22[%c0_275, %c0_276, %c0_277] : memref<3x64x28xbf16, #tpu.memory_space<vmem>>, vector<1x64x28xbf16>
    %301 = vector.shape_cast %300 : vector<1x64x28xbf16> to vector<64x28xbf16>
    %cst_278 = arith.constant dense<0.000000e+00> : vector<2x28xf32>
    %302 = tpu.matmul %299, %301, %cst_278 {dimension_numbers = #tpu.dot_dimension_numbers<[1], [0], [0], [1], [0, 0, 1, 1], [], []>} : vector<2x64xbf16>, vector<64x28xbf16>, vector<2x28xf32> -> vector<2x28xf32>
    %c1_279 = arith.constant 1 : index
    %c0_280 = arith.constant 0 : index
    %303 = vector.load %arg45[%c1_279, %c0_280] : memref<4x64xf32, #tpu.memory_space<vmem>>, vector<2x64xf32>
    %304 = arith.truncf %303 : vector<2x64xf32> to vector<2x64xbf16>
    %c1_281 = arith.constant 1 : index
    %c0_282 = arith.constant 0 : index
    %c0_283 = arith.constant 0 : index
    %305 = vector.load %arg22[%c1_281, %c0_282, %c0_283] : memref<3x64x28xbf16, #tpu.memory_space<vmem>>, vector<1x64x28xbf16>
    %306 = vector.shape_cast %305 : vector<1x64x28xbf16> to vector<64x28xbf16>
    %cst_284 = arith.constant dense<0.000000e+00> : vector<2x28xf32>
    %307 = tpu.matmul %304, %306, %cst_284 {dimension_numbers = #tpu.dot_dimension_numbers<[1], [0], [0], [1], [0, 0, 1, 1], [], []>} : vector<2x64xbf16>, vector<64x28xbf16>, vector<2x28xf32> -> vector<2x28xf32>
    %308 = arith.addf %302, %307 : vector<2x28xf32>
    %c2_285 = arith.constant 2 : index
    %c0_286 = arith.constant 0 : index
    %309 = vector.load %arg45[%c2_285, %c0_286] : memref<4x64xf32, #tpu.memory_space<vmem>>, vector<2x64xf32>
    %310 = arith.truncf %309 : vector<2x64xf32> to vector<2x64xbf16>
    %c2_287 = arith.constant 2 : index
    %c0_288 = arith.constant 0 : index
    %c0_289 = arith.constant 0 : index
    %311 = vector.load %arg22[%c2_287, %c0_288, %c0_289] : memref<3x64x28xbf16, #tpu.memory_space<vmem>>, vector<1x64x28xbf16>
    %312 = vector.shape_cast %311 : vector<1x64x28xbf16> to vector<64x28xbf16>
    %cst_290 = arith.constant dense<0.000000e+00> : vector<2x28xf32>
    %313 = tpu.matmul %310, %312, %cst_290 {dimension_numbers = #tpu.dot_dimension_numbers<[1], [0], [0], [1], [0, 0, 1, 1], [], []>} : vector<2x64xbf16>, vector<64x28xbf16>, vector<2x28xf32> -> vector<2x28xf32>
    %314 = arith.addf %308, %313 : vector<2x28xf32>
    %c0_291 = arith.constant 0 : index
    %c0_292 = arith.constant 0 : index
    %315 = vector.load %arg23[%c0_291, %c0_292] : memref<1x28xf32, #tpu.memory_space<vmem>>, vector<1x28xf32>
    %316 = vector.broadcast %315 : vector<1x28xf32> to vector<2x28xf32>
    %317 = arith.addf %314, %316 : vector<2x28xf32>
    %318 = vector.extract_strided_slice %317 {offsets = [0, 0], sizes = [2, 12], strides = [1, 1]} : vector<2x28xf32> to vector<2x12xf32>
    %c0_293 = arith.constant 0 : index
    %c0_294 = arith.constant 0 : index
    %c0_295 = arith.constant 0 : index
    %319 = vector.load %arg31[%c0_293, %c0_294, %c0_295] : memref<1x2x12xf32, #tpu.memory_space<vmem>>, vector<1x2x12xf32>
    %320 = vector.shape_cast %319 : vector<1x2x12xf32> to vector<2x12xf32>
    %321 = vector.shape_cast %318 : vector<2x12xf32> to vector<1x2x12xf32>
    tpu.vector_store %arg31[%c0_293, %c0_294, %c0_295], %321 {strides = array<i32>} : memref<1x2x12xf32, #tpu.memory_space<vmem>>, vector<1x2x12xf32>,
    %322 = vector.extract_strided_slice %317 {offsets = [0, 12], sizes = [2, 16], strides = [1, 1]} : vector<2x28xf32> to vector<2x16xf32>
    %c0_296 = arith.constant 0 : index
    %c0_297 = arith.constant 0 : index
    %c0_298 = arith.constant 0 : index
    %323 = vector.load %arg37[%c0_296, %c0_297, %c0_298] : memref<1x2x16xf32, #tpu.memory_space<vmem>>, vector<1x2x16xf32>
    %324 = vector.shape_cast %323 : vector<1x2x16xf32> to vector<2x16xf32>
    %325 = vector.shape_cast %322 : vector<2x16xf32> to vector<1x2x16xf32>
    tpu.vector_store %arg37[%c0_296, %c0_297, %c0_298], %325 {strides = array<i32>} : memref<1x2x16xf32, #tpu.memory_space<vmem>>, vector<1x2x16xf32>,
    %c0_299 = arith.constant 0 : index
    %c0_300 = arith.constant 0 : index
    %326 = vector.load %arg46[%c0_299, %c0_300] : memref<3x32xf32, #tpu.memory_space<vmem>>, vector<1x32xf32>
    %327 = arith.truncf %326 : vector<1x32xf32> to vector<1x32xbf16>
    %c0_301 = arith.constant 0 : index
    %c0_302 = arith.constant 0 : index
    %c0_303 = arith.constant 0 : index
    %328 = vector.load %arg24[%c0_301, %c0_302, %c0_303] : memref<3x32x14xbf16, #tpu.memory_space<vmem>>, vector<1x32x14xbf16>
    %329 = vector.shape_cast %328 : vector<1x32x14xbf16> to vector<32x14xbf16>
    %cst_304 = arith.constant dense<0.000000e+00> : vector<1x14xf32>
    %330 = tpu.matmul %327, %329, %cst_304 {dimension_numbers = #tpu.dot_dimension_numbers<[1], [0], [0], [1], [0, 0, 1, 1], [], []>} : vector<1x32xbf16>, vector<32x14xbf16>, vector<1x14xf32> -> vector<1x14xf32>
    %c1_305 = arith.constant 1 : index
    %c0_306 = arith.constant 0 : index
    %331 = vector.load %arg46[%c1_305, %c0_306] : memref<3x32xf32, #tpu.memory_space<vmem>>, vector<1x32xf32>
    %332 = arith.truncf %331 : vector<1x32xf32> to vector<1x32xbf16>
    %c1_307 = arith.constant 1 : index
    %c0_308 = arith.constant 0 : index
    %c0_309 = arith.constant 0 : index
    %333 = vector.load %arg24[%c1_307, %c0_308, %c0_309] : memref<3x32x14xbf16, #tpu.memory_space<vmem>>, vector<1x32x14xbf16>
    %334 = vector.shape_cast %333 : vector<1x32x14xbf16> to vector<32x14xbf16>
    %cst_310 = arith.constant dense<0.000000e+00> : vector<1x14xf32>
    %335 = tpu.matmul %332, %334, %cst_310 {dimension_numbers = #tpu.dot_dimension_numbers<[1], [0], [0], [1], [0, 0, 1, 1], [], []>} : vector<1x32xbf16>, vector<32x14xbf16>, vector<1x14xf32> -> vector<1x14xf32>
    %336 = arith.addf %330, %335 : vector<1x14xf32>
    %c2_311 = arith.constant 2 : index
    %c0_312 = arith.constant 0 : index
    %337 = vector.load %arg46[%c2_311, %c0_312] : memref<3x32xf32, #tpu.memory_space<vmem>>, vector<1x32xf32>
    %338 = arith.truncf %337 : vector<1x32xf32> to vector<1x32xbf16>
    %c2_313 = arith.constant 2 : index
    %c0_314 = arith.constant 0 : index
    %c0_315 = arith.constant 0 : index
    %339 = vector.load %arg24[%c2_313, %c0_314, %c0_315] : memref<3x32x14xbf16, #tpu.memory_space<vmem>>, vector<1x32x14xbf16>
    %340 = vector.shape_cast %339 : vector<1x32x14xbf16> to vector<32x14xbf16>
    %cst_316 = arith.constant dense<0.000000e+00> : vector<1x14xf32>
    %341 = tpu.matmul %338, %340, %cst_316 {dimension_numbers = #tpu.dot_dimension_numbers<[1], [0], [0], [1], [0, 0, 1, 1], [], []>} : vector<1x32xbf16>, vector<32x14xbf16>, vector<1x14xf32> -> vector<1x14xf32>
    %342 = arith.addf %336, %341 : vector<1x14xf32>
    %c0_317 = arith.constant 0 : index
    %c0_318 = arith.constant 0 : index
    %343 = vector.load %arg25[%c0_317, %c0_318] : memref<1x14xf32, #tpu.memory_space<vmem>>, vector<1x14xf32>
    %344 = arith.addf %342, %343 : vector<1x14xf32>
    %345 = vector.extract_strided_slice %344 {offsets = [0, 0], sizes = [1, 6], strides = [1, 1]} : vector<1x14xf32> to vector<1x6xf32>
    %c0_319 = arith.constant 0 : index
    %c0_320 = arith.constant 0 : index
    %c0_321 = arith.constant 0 : index
    %346 = vector.load %arg32[%c0_319, %c0_320, %c0_321] : memref<1x1x6xf32, #tpu.memory_space<vmem>>, vector<1x1x6xf32>
    %347 = vector.shape_cast %346 : vector<1x1x6xf32> to vector<1x6xf32>
    %348 = vector.shape_cast %345 : vector<1x6xf32> to vector<1x1x6xf32>
    tpu.vector_store %arg32[%c0_319, %c0_320, %c0_321], %348 {strides = array<i32>} : memref<1x1x6xf32, #tpu.memory_space<vmem>>, vector<1x1x6xf32>,
    %349 = vector.extract_strided_slice %344 {offsets = [0, 6], sizes = [1, 8], strides = [1, 1]} : vector<1x14xf32> to vector<1x8xf32>
    %c0_322 = arith.constant 0 : index
    %c0_323 = arith.constant 0 : index
    %c0_324 = arith.constant 0 : index
    %350 = vector.load %arg38[%c0_322, %c0_323, %c0_324] : memref<1x1x8xf32, #tpu.memory_space<vmem>>, vector<1x1x8xf32>
    %351 = vector.shape_cast %350 : vector<1x1x8xf32> to vector<1x8xf32>
    %352 = vector.shape_cast %349 : vector<1x8xf32> to vector<1x1x8xf32>
    tpu.vector_store %arg38[%c0_322, %c0_323, %c0_324], %352 {strides = array<i32>} : memref<1x1x8xf32, #tpu.memory_space<vmem>>, vector<1x1x8xf32>,
    %c0_325 = arith.constant 0 : index
    %c0_326 = arith.constant 0 : index
    %353 = vector.load %arg47[%c0_325, %c0_326] : memref<3x32xf32, #tpu.memory_space<vmem>>, vector<1x32xf32>
    %354 = arith.truncf %353 : vector<1x32xf32> to vector<1x32xbf16>
    %c0_327 = arith.constant 0 : index
    %c0_328 = arith.constant 0 : index
    %c0_329 = arith.constant 0 : index
    %355 = vector.load %arg26[%c0_327, %c0_328, %c0_329] : memref<3x32x14xbf16, #tpu.memory_space<vmem>>, vector<1x32x14xbf16>
    %356 = vector.shape_cast %355 : vector<1x32x14xbf16> to vector<32x14xbf16>
    %cst_330 = arith.constant dense<0.000000e+00> : vector<1x14xf32>
    %357 = tpu.matmul %354, %356, %cst_330 {dimension_numbers = #tpu.dot_dimension_numbers<[1], [0], [0], [1], [0, 0, 1, 1], [], []>} : vector<1x32xbf16>, vector<32x14xbf16>, vector<1x14xf32> -> vector<1x14xf32>
    %c1_331 = arith.constant 1 : index
    %c0_332 = arith.constant 0 : index
    %358 = vector.load %arg47[%c1_331, %c0_332] : memref<3x32xf32, #tpu.memory_space<vmem>>, vector<1x32xf32>
    %359 = arith.truncf %358 : vector<1x32xf32> to vector<1x32xbf16>
    %c1_333 = arith.constant 1 : index
    %c0_334 = arith.constant 0 : index
    %c0_335 = arith.constant 0 : index
    %360 = vector.load %arg26[%c1_333, %c0_334, %c0_335] : memref<3x32x14xbf16, #tpu.memory_space<vmem>>, vector<1x32x14xbf16>
    %361 = vector.shape_cast %360 : vector<1x32x14xbf16> to vector<32x14xbf16>
    %cst_336 = arith.constant dense<0.000000e+00> : vector<1x14xf32>
    %362 = tpu.matmul %359, %361, %cst_336 {dimension_numbers = #tpu.dot_dimension_numbers<[1], [0], [0], [1], [0, 0, 1, 1], [], []>} : vector<1x32xbf16>, vector<32x14xbf16>, vector<1x14xf32> -> vector<1x14xf32>
    %363 = arith.addf %357, %362 : vector<1x14xf32>
    %c2_337 = arith.constant 2 : index
    %c0_338 = arith.constant 0 : index
    %364 = vector.load %arg47[%c2_337, %c0_338] : memref<3x32xf32, #tpu.memory_space<vmem>>, vector<1x32xf32>
    %365 = arith.truncf %364 : vector<1x32xf32> to vector<1x32xbf16>
    %c2_339 = arith.constant 2 : index
    %c0_340 = arith.constant 0 : index
    %c0_341 = arith.constant 0 : index
    %366 = vector.load %arg26[%c2_339, %c0_340, %c0_341] : memref<3x32x14xbf16, #tpu.memory_space<vmem>>, vector<1x32x14xbf16>
    %367 = vector.shape_cast %366 : vector<1x32x14xbf16> to vector<32x14xbf16>
    %cst_342 = arith.constant dense<0.000000e+00> : vector<1x14xf32>
    %368 = tpu.matmul %365, %367, %cst_342 {dimension_numbers = #tpu.dot_dimension_numbers<[1], [0], [0], [1], [0, 0, 1, 1], [], []>} : vector<1x32xbf16>, vector<32x14xbf16>, vector<1x14xf32> -> vector<1x14xf32>
    %369 = arith.addf %363, %368 : vector<1x14xf32>
    %c0_343 = arith.constant 0 : index
    %c0_344 = arith.constant 0 : index
    %370 = vector.load %arg27[%c0_343, %c0_344] : memref<1x14xf32, #tpu.memory_space<vmem>>, vector<1x14xf32>
    %371 = arith.addf %369, %370 : vector<1x14xf32>
    %372 = vector.extract_strided_slice %371 {offsets = [0, 0], sizes = [1, 6], strides = [1, 1]} : vector<1x14xf32> to vector<1x6xf32>
    %c0_345 = arith.constant 0 : index
    %c0_346 = arith.constant 0 : index
    %c0_347 = arith.constant 0 : index
    %373 = vector.load %arg33[%c0_345, %c0_346, %c0_347] : memref<1x1x6xf32, #tpu.memory_space<vmem>>, vector<1x1x6xf32>
    %374 = vector.shape_cast %373 : vector<1x1x6xf32> to vector<1x6xf32>
    %375 = vector.shape_cast %372 : vector<1x6xf32> to vector<1x1x6xf32>
    tpu.vector_store %arg33[%c0_345, %c0_346, %c0_347], %375 {strides = array<i32>} : memref<1x1x6xf32, #tpu.memory_space<vmem>>, vector<1x1x6xf32>,
    %376 = vector.extract_strided_slice %371 {offsets = [0, 6], sizes = [1, 8], strides = [1, 1]} : vector<1x14xf32> to vector<1x8xf32>
    %c0_348 = arith.constant 0 : index
    %c0_349 = arith.constant 0 : index
    %c0_350 = arith.constant 0 : index
    %377 = vector.load %arg39[%c0_348, %c0_349, %c0_350] : memref<1x1x8xf32, #tpu.memory_space<vmem>>, vector<1x1x8xf32>
    %378 = vector.shape_cast %377 : vector<1x1x8xf32> to vector<1x8xf32>
    %379 = vector.shape_cast %376 : vector<1x8xf32> to vector<1x1x8xf32>
    tpu.vector_store %arg39[%c0_348, %c0_349, %c0_350], %379 {strides = array<i32>} : memref<1x1x8xf32, #tpu.memory_space<vmem>>, vector<1x1x8xf32>,
    return
  }
  func.func @transform_0(%arg0: i32) -> (i32, i32, i32) {
    %c0_i32 = arith.constant 0 : i32
    %c0_i32_0 = arith.constant 0 : i32
    %c0_i32_1 = arith.constant 0 : i32
    return %arg0, %c0_i32, %c0_i32_0 : i32, i32, i32
  }
  func.func @transform_1(%arg0: i32) -> (i32, i32, i32) {
    %c0_i32 = arith.constant 0 : i32
    %c0_i32_0 = arith.constant 0 : i32
    %c0_i32_1 = arith.constant 0 : i32
    %c0_i32_2 = arith.constant 0 : i32
    return %c0_i32, %c0_i32_0, %c0_i32_1 : i32, i32, i32
  }
  func.func @transform_2(%arg0: i32) -> (i32, i32) {
    %c0_i32 = arith.constant 0 : i32
    %c0_i32_0 = arith.constant 0 : i32
    %c0_i32_1 = arith.constant 0 : i32
    return %c0_i32, %c0_i32_0 : i32, i32
  }
  func.func @transform_3(%arg0: i32) -> (i32, i32, i32) {
    %c0_i32 = arith.constant 0 : i32
    %c0_i32_0 = arith.constant 0 : i32
    %c0_i32_1 = arith.constant 0 : i32
    %c0_i32_2 = arith.constant 0 : i32
    return %c0_i32, %c0_i32_0, %c0_i32_1 : i32, i32, i32
  }
  func.func @transform_4(%arg0: i32) -> (i32, i32) {
    %c0_i32 = arith.constant 0 : i32
    %c0_i32_0 = arith.constant 0 : i32
    %c0_i32_1 = arith.constant 0 : i32
    return %c0_i32, %c0_i32_0 : i32, i32
  }
  func.func @transform_5(%arg0: i32) -> (i32, i32, i32) {
    %c0_i32 = arith.constant 0 : i32
    %c0_i32_0 = arith.constant 0 : i32
    %c0_i32_1 = arith.constant 0 : i32
    %c0_i32_2 = arith.constant 0 : i32
    return %c0_i32, %c0_i32_0, %c0_i32_1 : i32, i32, i32
  }
  func.func @transform_6(%arg0: i32) -> (i32, i32) {
    %c0_i32 = arith.constant 0 : i32
    %c0_i32_0 = arith.constant 0 : i32
    %c0_i32_1 = arith.constant 0 : i32
    return %c0_i32, %c0_i32_0 : i32, i32
  }
  func.func @transform_7(%arg0: i32) -> (i32, i32, i32) {
    %c0_i32 = arith.constant 0 : i32
    %c0_i32_0 = arith.constant 0 : i32
    %c0_i32_1 = arith.constant 0 : i32
    %c0_i32_2 = arith.constant 0 : i32
    return %c0_i32, %c0_i32_0, %c0_i32_1 : i32, i32, i32
  }
  func.func @transform_8(%arg0: i32) -> (i32, i32) {
    %c0_i32 = arith.constant 0 : i32
    %c0_i32_0 = arith.constant 0 : i32
    %c0_i32_1 = arith.constant 0 : i32
    return %c0_i32, %c0_i32_0 : i32, i32
  }
  func.func @transform_9(%arg0: i32) -> (i32, i32, i32) {
    %c0_i32 = arith.constant 0 : i32
    %c0_i32_0 = arith.constant 0 : i32
    %c0_i32_1 = arith.constant 0 : i32
    %c0_i32_2 = arith.constant 0 : i32
    return %c0_i32, %c0_i32_0, %c0_i32_1 : i32, i32, i32
  }
  func.func @transform_10(%arg0: i32) -> (i32, i32) {
    %c0_i32 = arith.constant 0 : i32
    %c0_i32_0 = arith.constant 0 : i32
    %c0_i32_1 = arith.constant 0 : i32
    return %c0_i32, %c0_i32_0 : i32, i32
  }
  func.func @transform_11(%arg0: i32) -> (i32, i32, i32) {
    %c0_i32 = arith.constant 0 : i32
    %c0_i32_0 = arith.constant 0 : i32
    %c0_i32_1 = arith.constant 0 : i32
    %c0_i32_2 = arith.constant 0 : i32
    return %c0_i32, %c0_i32_0, %c0_i32_1 : i32, i32, i32
  }
  func.func @transform_12(%arg0: i32) -> (i32, i32) {
    %c0_i32 = arith.constant 0 : i32
    %c0_i32_0 = arith.constant 0 : i32
    %c0_i32_1 = arith.constant 0 : i32
    return %c0_i32, %c0_i32_0 : i32, i32
  }
  func.func @transform_13(%arg0: i32) -> (i32, i32, i32) {
    %c0_i32 = arith.constant 0 : i32
    %c0_i32_0 = arith.constant 0 : i32
    %c0_i32_1 = arith.constant 0 : i32
    %c0_i32_2 = arith.constant 0 : i32
    return %c0_i32, %c0_i32_0, %c0_i32_1 : i32, i32, i32
  }
  func.func @transform_14(%arg0: i32) -> (i32, i32) {
    %c0_i32 = arith.constant 0 : i32
    %c0_i32_0 = arith.constant 0 : i32
    %c0_i32_1 = arith.constant 0 : i32
    return %c0_i32, %c0_i32_0 : i32, i32
  }
  func.func @transform_15(%arg0: i32) -> (i32, i32, i32) {
    %c0_i32 = arith.constant 0 : i32
    %c0_i32_0 = arith.constant 0 : i32
    %c0_i32_1 = arith.constant 0 : i32
    %c0_i32_2 = arith.constant 0 : i32
    return %c0_i32, %c0_i32_0, %c0_i32_1 : i32, i32, i32
  }
  func.func @transform_16(%arg0: i32) -> (i32, i32) {
    %c0_i32 = arith.constant 0 : i32
    %c0_i32_0 = arith.constant 0 : i32
    %c0_i32_1 = arith.constant 0 : i32
    return %c0_i32, %c0_i32_0 : i32, i32
  }
  func.func @transform_17(%arg0: i32) -> (i32, i32, i32) {
    %c0_i32 = arith.constant 0 : i32
    %c0_i32_0 = arith.constant 0 : i32
    %c0_i32_1 = arith.constant 0 : i32
    %c0_i32_2 = arith.constant 0 : i32
    return %c0_i32, %c0_i32_0, %c0_i32_1 : i32, i32, i32
  }
  func.func @transform_18(%arg0: i32) -> (i32, i32) {
    %c0_i32 = arith.constant 0 : i32
    %c0_i32_0 = arith.constant 0 : i32
    %c0_i32_1 = arith.constant 0 : i32
    return %c0_i32, %c0_i32_0 : i32, i32
  }
  func.func @transform_19(%arg0: i32) -> (i32, i32, i32) {
    %c0_i32 = arith.constant 0 : i32
    %c0_i32_0 = arith.constant 0 : i32
    %c0_i32_1 = arith.constant 0 : i32
    %c0_i32_2 = arith.constant 0 : i32
    return %c0_i32, %c0_i32_0, %c0_i32_1 : i32, i32, i32
  }
  func.func @transform_20(%arg0: i32) -> (i32, i32) {
    %c0_i32 = arith.constant 0 : i32
    %c0_i32_0 = arith.constant 0 : i32
    %c0_i32_1 = arith.constant 0 : i32
    return %c0_i32, %c0_i32_0 : i32, i32
  }
  func.func @transform_21(%arg0: i32) -> (i32, i32, i32) {
    %c0_i32 = arith.constant 0 : i32
    %c0_i32_0 = arith.constant 0 : i32
    %c0_i32_1 = arith.constant 0 : i32
    %c0_i32_2 = arith.constant 0 : i32
    return %c0_i32, %c0_i32_0, %c0_i32_1 : i32, i32, i32
  }
  func.func @transform_22(%arg0: i32) -> (i32, i32) {
    %c0_i32 = arith.constant 0 : i32
    %c0_i32_0 = arith.constant 0 : i32
    %c0_i32_1 = arith.constant 0 : i32
    return %c0_i32, %c0_i32_0 : i32, i32
  }
  func.func @transform_23(%arg0: i32) -> (i32, i32, i32) {
    %c0_i32 = arith.constant 0 : i32
    %c0_i32_0 = arith.constant 0 : i32
    %c0_i32_1 = arith.constant 0 : i32
    %c0_i32_2 = arith.constant 0 : i32
    return %c0_i32, %c0_i32_0, %c0_i32_1 : i32, i32, i32
  }
  func.func @transform_24(%arg0: i32) -> (i32, i32) {
    %c0_i32 = arith.constant 0 : i32
    %c0_i32_0 = arith.constant 0 : i32
    %c0_i32_1 = arith.constant 0 : i32
    return %c0_i32, %c0_i32_0 : i32, i32
  }
  func.func @transform_25(%arg0: i32) -> (i32, i32, i32) {
    %c0_i32 = arith.constant 0 : i32
    %c0_i32_0 = arith.constant 0 : i32
    %c0_i32_1 = arith.constant 0 : i32
    %c0_i32_2 = arith.constant 0 : i32
    return %c0_i32, %c0_i32_0, %c0_i32_1 : i32, i32, i32
  }
  func.func @transform_26(%arg0: i32) -> (i32, i32) {
    %c0_i32 = arith.constant 0 : i32
    %c0_i32_0 = arith.constant 0 : i32
    %c0_i32_1 = arith.constant 0 : i32
    return %c0_i32, %c0_i32_0 : i32, i32
  }
  func.func @transform_27(%arg0: i32) -> (i32, i32, i32) {
    %c0_i32 = arith.constant 0 : i32
    %c0_i32_0 = arith.constant 0 : i32
    %c0_i32_1 = arith.constant 0 : i32
    return %arg0, %c0_i32, %c0_i32_0 : i32, i32, i32
  }
  func.func @transform_28(%arg0: i32) -> (i32, i32, i32) {
    %c0_i32 = arith.constant 0 : i32
    %c0_i32_0 = arith.constant 0 : i32
    %c0_i32_1 = arith.constant 0 : i32
    return %arg0, %c0_i32, %c0_i32_0 : i32, i32, i32
  }
  func.func @transform_29(%arg0: i32) -> (i32, i32, i32) {
    %c0_i32 = arith.constant 0 : i32
    %c0_i32_0 = arith.constant 0 : i32
    %c0_i32_1 = arith.constant 0 : i32
    return %arg0, %c0_i32, %c0_i32_0 : i32, i32, i32
  }
  func.func @transform_30(%arg0: i32) -> (i32, i32, i32) {
    %c0_i32 = arith.constant 0 : i32
    %c0_i32_0 = arith.constant 0 : i32
    %c0_i32_1 = arith.constant 0 : i32
    return %arg0, %c0_i32, %c0_i32_0 : i32, i32, i32
  }
  func.func @transform_31(%arg0: i32) -> (i32, i32, i32) {
    %c0_i32 = arith.constant 0 : i32
    %c0_i32_0 = arith.constant 0 : i32
    %c0_i32_1 = arith.constant 0 : i32
    return %arg0, %c0_i32, %c0_i32_0 : i32, i32, i32
  }
  func.func @transform_32(%arg0: i32) -> (i32, i32, i32) {
    %c0_i32 = arith.constant 0 : i32
    %c0_i32_0 = arith.constant 0 : i32
    %c0_i32_1 = arith.constant 0 : i32
    return %arg0, %c0_i32, %c0_i32_0 : i32, i32, i32
  }
  func.func @transform_33(%arg0: i32) -> (i32, i32, i32) {
    %c0_i32 = arith.constant 0 : i32
    %c0_i32_0 = arith.constant 0 : i32
    %c0_i32_1 = arith.constant 0 : i32
    return %arg0, %c0_i32, %c0_i32_0 : i32, i32, i32
  }
  func.func @transform_34(%arg0: i32) -> (i32, i32, i32) {
    %c0_i32 = arith.constant 0 : i32
    %c0_i32_0 = arith.constant 0 : i32
    %c0_i32_1 = arith.constant 0 : i32
    return %arg0, %c0_i32, %c0_i32_0 : i32, i32, i32
  }
  func.func @transform_35(%arg0: i32) -> (i32, i32, i32) {
    %c0_i32 = arith.constant 0 : i32
    %c0_i32_0 = arith.constant 0 : i32
    %c0_i32_1 = arith.constant 0 : i32
    return %arg0, %c0_i32, %c0_i32_0 : i32, i32, i32
  }
  func.func @transform_36(%arg0: i32) -> (i32, i32, i32) {
    %c0_i32 = arith.constant 0 : i32
    %c0_i32_0 = arith.constant 0 : i32
    %c0_i32_1 = arith.constant 0 : i32
    return %arg0, %c0_i32, %c0_i32_0 : i32, i32, i32
  }
  func.func @transform_37(%arg0: i32) -> (i32, i32, i32) {
    %c0_i32 = arith.constant 0 : i32
    %c0_i32_0 = arith.constant 0 : i32
    %c0_i32_1 = arith.constant 0 : i32
    return %arg0, %c0_i32, %c0_i32_0 : i32, i32, i32
  }
  func.func @transform_38(%arg0: i32) -> (i32, i32, i32) {
    %c0_i32 = arith.constant 0 : i32
    %c0_i32_0 = arith.constant 0 : i32
    %c0_i32_1 = arith.constant 0 : i32
    return %arg0, %c0_i32, %c0_i32_0 : i32, i32, i32
  }
}

</mosaic_0001>

<bundles_post_ra>
// kernel: myssd_forward.1
= control target key start
LH: loop header
LB: loop body
LE: loop exit
PB: predicated region body
PF: predicated region fallthrough
CT: control target
= control target key end

     0   :  { %s9162_s6 = smov 1   ;;  %s9163_s10 = smov 2   ;;  %s10359_s0 = inlined_call_operand.smem [shape: u32[39], index: -1, kind: input, shape index: {}] }
   0x1   :  { %s9214_s5 = sld [smem:[%s10359_s0]]   ;;  %s9164_s14 = smov 3  }
   0x2   :  { %s9219_s9 = sld [smem:[%s10359_s0 + %s9162_s6]]   ;;  %s9165_s18 = smov 4  }
   0x3   :  { %s9224_s13 = sld [smem:[%s10359_s0 + %s9163_s10]]   ;;  %s9166_s22 = smov 5  }
   0x4   :  { %s9229_s17 = sld [smem:[%s10359_s0 + %s9164_s14]]   ;;  %s9167_s26 = smov 6  }
   0x5   :  { %s9234_s21 = sld [smem:[%s10359_s0 + %s9165_s18]]   ;;  %s9168_s30 = smov 7  }
   0x6   :  { %s9239_s25 = sld [smem:[%s10359_s0 + %s9166_s22]]   ;;  %s9169_s4 = smov 8  }
   0x7   :  { %10368 = sst [smem:[#allocation10_spill]] %s9214_s5  ;;  %s9170_s10 = smov 9  }
   0x8   :  { %s9244_s29 = sld [smem:[%s10359_s0 + %s9167_s26]]   ;;  %s9171_s15 = smov 10  }
   0x9   :  { %s9249_s3 = sld [smem:[%s10359_s0 + %s9168_s30]]   ;;  %s9172_s20 = smov 11  }
   0xa   :  { %s9254_s8 = sld [smem:[%s10359_s0 + %s9169_s4]]   ;;  %s9173_s26 = smov 12  }
   0xb   :  { %s9259_s14 = sld [smem:[%s10359_s0 + %s9170_s10]]   ;;  %s9174_s1 = smov 13  }
   0xc   :  { %s9264_s19 = sld [smem:[%s10359_s0 + %s9171_s15]]   ;;  %s9175_s7 = smov 14  }
   0xd   :  { %s9269_s24 = sld [smem:[%s10359_s0 + %s9172_s20]]   ;;  %s9176_s15 = smov 15  }
   0xe   :  { %s9274_s30 = sld [smem:[%s10359_s0 + %s9173_s26]]   ;;  %s9177_s22 = smov 16  }
   0xf   :  { %10369 = sst [smem:[#allocation11_spill]] %s9249_s3  ;;  %s9178_s28 = smov 17  }
  0x10   :  { %s9279_s6 = sld [smem:[%s10359_s0 + %s9174_s1]]  }
  0x11   :  { %s9284_s12 = sld [smem:[%s10359_s0 + %s9175_s7]]   ;;  %s9179_s7 = smov 18  }
  0x12   :  { %10370 = sst [smem:[#allocation12_spill]] %s9264_s19 }
  0x13   :  { %10371 = sst [smem:[#allocation13_spill]] %s9269_s24 }
  0x14   :  { %10372 = sst [smem:[#allocation14_spill]] %s9274_s30 }
  0x15   :  { %s9289_s20 = sld [smem:[%s10359_s0 + %s9176_s15]]   ;;  %s9180_s15 = smov 19  }
  0x16   :  { %s9294_s27 = sld [smem:[%s10359_s0 + %s9177_s22]]   ;;  %s9181_s22 = smov 20  }
  0x17   :  { %10373 = sst [smem:[#allocation15_spill]] %s9284_s12 }
  0x18   :  { %s9299_s4 = sld [smem:[%s10359_s0 + %s9178_s28]]   ;;  %s9182_s28 = smov 21  }
  0x19   :  { %s9304_s12 = sld [smem:[%s10359_s0 + %s9179_s7]]   ;;  %s9183_s7 = smov 22  }
  0x1a   :  { %s9309_s30 = sld [smem:[%s10359_s0 + %s9180_s15]]   ;;  %s9184_s15 = smov 23  }
  0x1b   :  { %s9319_s19 = sld [smem:[%s10359_s0 + %s9182_s28]]   ;;  %s9186_s28 = smov 25  }
  0x1c   :  { %10374 = sst [smem:[#allocation16_spill]] %s9294_s27 }
  0x1d   :  { %s9314_s27 = sld [smem:[%s10359_s0 + %s9181_s22]]   ;;  %s9185_s22 = smov 24  }
  0x1e   :  { %10375 = sst [smem:[#allocation17_spill]] %s9299_s4 }
  0x1f   :  { %10376 = sst [smem:[#allocation18_spill]] %s9304_s12 }
  0x20   :  { %s9324_s12 = sld [smem:[%s10359_s0 + %s9183_s7]]   ;;  %s9187_s7 = smov 26  }
  0x21   :  { %10378 = sst [smem:[#allocation20_spill]] %s9319_s19 }
  0x22   :  { %s9329_s24 = sld [smem:[%s10359_s0 + %s9184_s15]]   ;;  %s9188_s15 = smov 27  }
  0x23   :  { %10377 = sst [smem:[#allocation19_spill]] %s9314_s27 }
  0x24   :  { %s9334_s27 = sld [smem:[%s10359_s0 + %s9185_s22]]   ;;  %s9189_s22 = smov 28  }
  0x25   :  { %s9339_s19 = sld [smem:[%s10359_s0 + %s9186_s28]]   ;;  %s9190_s28 = smov 29  }
  0x26   :  { %10379 = sst [smem:[#allocation21_spill]] %s9324_s12 }
  0x27   :  { %s9344_s12 = sld [smem:[%s10359_s0 + %s9187_s7]]   ;;  %s9191_s7 = smov 30  }
  0x28   :  { %10380 = sst [smem:[#allocation22_spill]] %s9329_s24 }
  0x29   :  { %s9349_s24 = sld [smem:[%s10359_s0 + %s9188_s15]]   ;;  %s9192_s15 = smov 31  }
  0x2a   :  { %10381 = sst [smem:[#allocation23_spill]] %s9334_s27 }
  0x2b   :  { %10382 = sst [smem:[#allocation24_spill]] %s9339_s19 }
  0x2c   :  { %s9354_s27 = sld [smem:[%s10359_s0 + %s9189_s22]]   ;;  %s9193_s22 = smov 32  }
  0x2d   :  { %10383 = sst [smem:[#allocation25_spill]] %s9344_s12 }
  0x2e   :  { %s9359_s19 = sld [smem:[%s10359_s0 + %s9190_s28]]   ;;  %s9194_s28 = smov 33  }
  0x2f   :  { %10384 = sst [smem:[#allocation26_spill]] %s9349_s24 }
  0x30   :  { %s9364_s12 = sld [smem:[%s10359_s0 + %s9191_s7]]   ;;  %s9195_s7 = smov 34  }
  0x31   :  { %s9369_s24 = sld [smem:[%s10359_s0 + %s9192_s15]]   ;;  %s9196_s15 = smov 35  }
  0x32   :  { %10385 = sst [smem:[#allocation27_spill]] %s9354_s27 }
  0x33   :  { %s9374_s27 = sld [smem:[%s10359_s0 + %s9193_s22]]   ;;  %s9197_s22 = smov 36  }
  0x34   :  { %10386 = sst [smem:[#allocation28_spill]] %s9359_s19 }
  0x35   :  { %s9379_s19 = sld [smem:[%s10359_s0 + %s9194_s28]]   ;;  %s9198_s28 = smov 37  }
  0x36   :  { %10387 = sst [smem:[#allocation29_spill]] %s9364_s12 }
  0x37   :  { %10388 = sst [smem:[#allocation30_spill]] %s9369_s24 }
  0x38   :  { %s9384_s12 = sld [smem:[%s10359_s0 + %s9195_s7]]   ;;  %s9199_s7 = smov 38  }
  0x39   :  { %10389 = sst [smem:[#allocation31_spill]] %s9374_s27 }
  0x3a   :  { %s9389_s24 = sld [smem:[%s10359_s0 + %s9196_s15]]   ;;  %s9406_s15 = smov 0  }
  0x3b   :  { %10390 = sst [smem:[#allocation32_spill]] %s9379_s19 }
  0x3c   :  { %s9394_s27 = sld [smem:[%s10359_s0 + %s9197_s22]]  }
  0x3d   :  { %s9399_s19 = sld [smem:[%s10359_s0 + %s9198_s28]]  }
  0x3e   :  { %10391 = sst [smem:[#allocation33_spill]] %s9384_s12 }
  0x3f   :  { %s9404_s12 = sld [smem:[%s10359_s0 + %s9199_s7]]  }
  0x40 LB: > { %s10392_s4 = sld [smem:[#allocation17_spill]]  ;;  %s6384_s16 = sadd.s32 4294967295, %s9160_s15   ;;  %s9160_s15 = sphi %s9406_s15, %s88_s15  }
  0x41   : > { %s10393_s3 = sld [smem:[#allocation11_spill]]  ;;  %p6388_p0 = scmp.ge.s32.totalorder %s9160_s15, 1 }
  0x42   : > { %p1074_p1 = scmp.lt.s32.totalorder %s9160_s15, 3 }
  0x44   : > { %p1075_p2 = pnand %p6388_p0, %p1074_p1 }
  0x45   : > { %p1209_p3 = scmp.lt.s32.totalorder (!%p1075_p2), %s6384_s16, 1  ;;  %s10394_s5 = sld [smem:[#allocation10_spill]] (!%p1075_p2) }
  0x46   : > { %1078 = sbr.rel (%p1075_p2) target bundleno = 2061 (0x80d), region = 128  ;;  %s10395_s22 = sld [smem:[#allocation13_spill]] (!%p1075_p2) }
  0x47   : > { %s10396_s23 = sld [smem:[#allocation20_spill]] (!%p1075_p2)  ;;  %s9201_s1 = smov (!%p1075_p2), 32  }
  0x48   : > { %s10397_s26 = sld [smem:[#allocation12_spill]] (!%p1075_p2) }
  0x49   : > { %s10398_s28 = sld [smem:[#allocation16_spill]] (!%p1075_p2) }
  0x4a   : > { %s10399_s2 = sld [smem:[#allocation14_spill]] (!%p1075_p2) }
  0x4b   : > { %v8663_v0 = vld [vmem:[%s9219_s9 + $0x58] sm:$0xff]  ;;  %v8657_v1 = vld [vmem:[%s9219_s9 + $0x28] sm:$0xff]  ;;  %vm1261_vm0 = vcmask 785408   ;;  %v9200_v3 = vmov 0.0   ;;  %v8662_v4 = vld [vmem:[%s9219_s9 + $0x50] sm:$0xff]  ;;  %s10419_s16 = smov (!%p1209_p3, %s6384_s16), 1  ;;  %v1546_v62 = vlaneseq }
  0x4c   : > { %v8669_v2 = vld [vmem:[%s9219_s9 + $0x88] sm:$0xff]  ;;  %1262 = vst.msk [vmem:[#allocation2] sm:$0xff] %vm1261_vm0, %v9200_v3  ;;  %1384 = vmatpush.bf16.msra.mxu0 %v8663_v0  ;;  %1445 = vmatpush.bf16.msra.mxu1 %v8657_v1  ;;  %v8656_v5 = vld [vmem:[%s9219_s9 + $0x20] sm:$0xff]  ;;  %s8649_s0 = sshll.u32 %s10419_s16, 5  ;;  %v8655_v8 = vld [vmem:[%s9219_s9 + $0x18] sm:$0xff]  ;;  %vm1266_vm1 = vcmask 779264  }
  0x4d   : > { %1263 = vst.msk [vmem:[#allocation2 + $0x8] sm:$0xff] %vm1261_vm0, %v9200_v3  ;;  %1525 = vmatpush.bf16.msra.mxu2 %v8669_v2  ;;  %v8668_v6 = vld [vmem:[%s9219_s9 + $0x80] sm:$0xff]  ;;  %v8661_v7 = vld [vmem:[%s9219_s9 + $0x48] sm:$0xff]  ;;  %s1213_s18 = scalar_lea.vmem %s10394_s5, %s8649_s0  ;;  %v8667_v11 = vld [vmem:[%s9219_s9 + $0x78] sm:$0xff]  ;;  %vm1570_vm2 = vcmask 1046528   ;;  %vm1563_vm4 = vcmask 252928  }
  0x4e   : > { %1264 = vst.msk [vmem:[#allocation2 + $0x10] sm:$0xff] %vm1261_vm0, %v9200_v3  ;;  %v1287_v9 = vld [vmem:[%s1213_s18] sm:$0xff]  ;;  %v1288_v10 = vld [vmem:[%s1213_s18 + $0x8] sm:$0xff]  ;;  %v1289_v15 = vld [vmem:[%s1213_s18 + $0x10] sm:$0xff]  ;;  %vm2006_vm6 = vcmask 1040384   ;;  %vm2832_vm7 = vcmask 121856  }
  0x4f   : > { %1265 = vst.msk [vmem:[#allocation2 + $0x18] sm:$0xff] %vm1261_vm0, %v9200_v3  ;;  %v6401_v12 = vadd.f32 -127.0, %v1287_v9  ;;  %v6402_v13 = vadd.f32 -127.0, %v1288_v10  ;;  %v8660_v14 = vld [vmem:[%s9219_s9 + $0x40] sm:$0xff]  ;;  %v8654_v16 = vld [vmem:[%s9219_s9 + $0x10] sm:$0xff]  ;;  %v1290_v20 = vld [vmem:[%s1213_s18 + $0x18] sm:$0xff] }
  0x50   : > { %1268 = vst [vmem:[#allocation3] sm:$0xff] %v9200_v3  ;;  %1385 = vmatpush.bf16.msra.mxu0 %v8662_v4  ;;  %1446 = vmatpush.bf16.msra.mxu1 %v8656_v5  ;;  %v8666_v19 = vld [vmem:[%s9219_s9 + $0x70] sm:$0xff]  ;;  %v6403_v21 = vadd.f32 -127.0, %v1289_v15  ;;  %v6404_v22 = vadd.f32 -127.0, %v1290_v20  ;;  %v8659_v23 = vld [vmem:[%s9219_s9 + $0x38] sm:$0xff]  ;;  %v8653_v24 = vld [vmem:[%s9219_s9 + $0x8] sm:$0xff] }
  0x51   : > { %1269 = vst [vmem:[#allocation3 + $0x8] sm:$0xff] %v9200_v3  ;;  %1526 = vmatpush.bf16.msra.mxu2 %v8668_v6  ;;  %v1295_v17 = vmul.f32 0.0078125, %v6401_v12  ;;  %v1296_v18 = vmul.f32 0.0078125, %v6402_v13  ;;  %v8665_v25 = vld [vmem:[%s9219_s9 + $0x68] sm:$0xff]  ;;  %v8658_v27 = vld [vmem:[%s9219_s9 + $0x30] sm:$0xff]  ;;  %v8652_v29 = vld [vmem:[%s9219_s9] sm:$0xff] }
  0x52   : > { %1270 = vst [vmem:[#allocation3 + $0x10] sm:$0x3] %v9200_v3  ;;  %v1297_v26 = vmul.f32 0.0078125, %v6403_v21  ;;  %v1298_v28 = vmul.f32 0.0078125, %v6404_v22  ;;  %v8664_v32 = vld [vmem:[%s9219_s9 + $0x60] sm:$0xff]  ;;  %v1547_v10 = vshrl.u32 %v1546_v62, 7 }
  0x53   : > { %1271 = vst [vmem:[#allocation4 + $0x28] sm:$0xff] %v9200_v3  ;;  %v8700_v57 = vld [vmem:[%s9229_s17 + $0xf4] sm:$0xf]  ;;  %v6588_v58 = vld [vmem:[%s9229_s17 + $0xf8] sm:$0xf0]  ;;  %vm3398_vm8 = vcmask 56320  }
  0x54   : > { %1272 = vst [vmem:[#allocation4 + $0x10] sm:$0xff] %v9200_v3  ;;  %1386 = vmatpush.bf16.msra.mxu0 %v8661_v7  ;;  %1447 = vmatpush.bf16.msra.mxu1 %v8655_v8  ;;  %v6591_v59 = vor.u32 %v8700_v57, %v6588_v58  ;;  %v8698_v60 = vld [vmem:[%s9229_s17 + $0xe4] sm:$0xf]  ;;  %v6580_v61 = vld [vmem:[%s9229_s17 + $0xe8] sm:$0xf0]  ;;  %vm1284_vm9 = vcmask 256000  }
  0x55   : > { %1275 = vst [vmem:[#allocation4 + $0x18] sm:$0x3] %v9200_v3  ;;  %1527 = vmatpush.bf16.msra.mxu2 %v8667_v11  ;;  %v6583_v63 = vor.u32 %v8698_v60, %v6580_v61  ;;  %v8696_v0 = vld [vmem:[%s9229_s17 + $0xd4] sm:$0xf]  ;;  %v6572_v1 = vld [vmem:[%s9229_s17 + $0xd8] sm:$0xf0] }
  0x56   : > { %1299 = vst.msk [vmem:[#allocation2 + $0x1] sm:$0xff] %vm1261_vm0, %v1295_v17  ;;  %v6650_v2 = vld [vmem:[%s9229_s17 + $0x70] sm:$0xf]  ;;  %v8685_v5 = vld [vmem:[%s9229_s17 + $0x74] sm:$0xf0]  ;;  %v6575_v11 = vor.u32 %v8696_v0, %v6572_v1  ;;  %vm3884_vm10 = vcmask 261120  }
  0x57   : > { %1300 = vst.msk [vmem:[#allocation2 + $0x9] sm:$0xff] %vm1261_vm0, %v1296_v18  ;;  %v8684_v6 = vld [vmem:[%s9229_s17 + $0x74] sm:$0xf]  ;;  %v6652_v7 = vld [vmem:[%s9229_s17 + $0x78] sm:$0xf0]  ;;  %v6651_v8 = vor.u32 %v8685_v5, %v6650_v2  ;;  %vm1282_vm12 = vcmask 519168  }
  0x58   : > { %1276 = vst [vmem:[#allocation4 + $0x20] sm:$0x3] %v9200_v3  ;;  %1387 = vmatpush.bf16.msra.mxu0 %v8660_v14  ;;  %1448 = vmatpush.bf16.msra.mxu1 %v8654_v16  ;;  %v6655_v9 = vor.u32 %v8684_v6, %v6652_v7  ;;  %v8694_v12 = vld [vmem:[%s9229_s17 + $0xc4] sm:$0xf]  ;;  %v6564_v13 = vld [vmem:[%s9229_s17 + $0xc8] sm:$0xf0] }
  0x59   : > { %1277 = vst [vmem:[#allocation5] sm:$0xff] %v9200_v3  ;;  %1528 = vmatpush.bf16.msra.mxu2 %v8666_v19  ;;  %v6642_v14 = vld [vmem:[%s9229_s17 + $0x60] sm:$0xf]  ;;  %v8683_v17 = vld [vmem:[%s9229_s17 + $0x64] sm:$0xf0]  ;;  %v6567_v22 = vor.u32 %v8694_v12, %v6564_v13  ;;  %vm3673_vm13 = vcmask 1042432  }
  0x5a   : > { %1278 = vst [vmem:[#allocation5 + $0x8] sm:$0xff] %v9200_v3  ;;  %v8682_v18 = vld [vmem:[%s9229_s17 + $0x64] sm:$0xf]  ;;  %v6644_v19 = vld [vmem:[%s9229_s17 + $0x68] sm:$0xf0]  ;;  %v6643_v20 = vor.u32 %v8683_v17, %v6642_v14  ;;  %vm3670_vm14 = vcmask 23552  }
  0x5b   : > { %1279 = vst [vmem:[#allocation5 + $0x10] sm:$0x3] %v9200_v3  ;;  %v6647_v21 = vor.u32 %v8682_v18, %v6644_v19  ;;  %v8693_v57 = vld [vmem:[%s9229_s17 + $0xb4] sm:$0xf0]  ;;  %v8691_v60 = vld [vmem:[%s9229_s17 + $0xa4] sm:$0xf0] }
  0x5c   : > { %1280 = vst [vmem:[#allocation5 + $0x18] sm:$0x3] %v9200_v3  ;;  %1388 = vmatpush.bf16.msra.mxu0 %v8659_v23  ;;  %1449 = vmatpush.bf16.msra.mxu1 %v8653_v24  ;;  %v8688_v0 = vld [vmem:[%s9229_s17 + $0x94] sm:$0xf]  ;;  %v6540_v2 = vld [vmem:[%s9229_s17 + $0x98] sm:$0xf0] }
  0x5d   : > { %v1321_v30 = vld [vmem:[#allocation2 + $0x1] sm:$0xff]  ;;  %1281 = vst [vmem:[#allocation6] sm:$0x3f] %v9200_v3  ;;  %1529 = vmatpush.bf16.msra.mxu2 %v8665_v25  ;;  %v8692_v25 = vld [vmem:[%s9229_s17 + $0xb4] sm:$0xf]  ;;  %vm3745_vm15 = vcmask 523264  }
  0x5e   : > { %v1303_v31 = vld [vmem:[#allocation2] sm:$0xff]  ;;  %v1322_v33 = vld [vmem:[#allocation2 + $0x9] sm:$0xff]  ;;  %1301 = vst.msk [vmem:[#allocation2 + $0x11] sm:$0xff] %vm1261_vm0, %v1297_v26  ;;  %v6556_v26 = vld [vmem:[%s9229_s17 + $0xb8] sm:$0xf0]  ;;  %s10400_s7 = sld [smem:[#allocation22_spill]] }
  0x5f   : > { %v1304_v34 = vld [vmem:[#allocation2 + $0x8] sm:$0xff]  ;;  %1267 = vst.msk [vmem:[#allocation2 + $0x20] sm:$0x3] %vm1266_vm1, %v9200_v3  ;;  %v1325_v35 = vpack.c.bf16 %v1322_v33, %v1321_v30  ;;  %v6530_v5 = vld [vmem:[%s9229_s17 + $0x80] sm:$0xf]  ;;  %vm3698_vm1 = vcmask 517120  }
  0x60   : > { %v1307_v36 = vpack.c.bf16 %v1304_v34, %v1303_v31  ;;  %1302 = vst.msk [vmem:[#allocation2 + $0x19] sm:$0xff] %vm1261_vm0, %v1298_v28  ;;  %1389 = vmatpush.bf16.msra.mxu0 %v8658_v27  ;;  %1450 = vmatpush.bf16.msra.mxu1 %v8652_v29  ;;  %v1462_v37 = vld [vmem:[#allocation2 + $0x2] sm:$0xff]  ;;  %v1550_v28 = vand.u32 127, %v1546_v62  ;;  %v1551_v29 = vmul.u32 2, %v1547_v10  ;;  %v6559_v31 = vor.u32 %v8692_v25, %v6556_v26  ;;  %v6538_v62 = vld [vmem:[%s9229_s17 + $0x90] sm:$0xf] }
  0x61   : > { %1530 = vmatpush.bf16.msra.mxu2 %v8664_v32  ;;  %v8687_v6 = vld [vmem:[%s9229_s17 + $0x84] sm:$0xf0]  ;;  %v8686_v7 = vld [vmem:[%s9229_s17 + $0x84] sm:$0xf]  ;;  %v6636_v13 = vld [vmem:[%s9229_s17 + $0x58] sm:$0xf0] }
  0x62   : > { %vm1553_vm3 = vcmp.eq.s32.totalorder %v1550_v28, %v1551_v29  ;;  %v6532_v14 = vld [vmem:[%s9229_s17 + $0x88] sm:$0xf0]  ;;  %v8717_v18 = vld [vmem:[%s9229_s17 + $0x174] sm:$0xf0]  ;;  %v8716_v19 = vld [vmem:[%s9229_s17 + $0x174] sm:$0xf] }
  0x63   : > { %6441 = vmatmul.msk.bf16.vlgmr.msra.gmra.mxu0 %vm1261_vm0, %v1325_v35  ;;  %6467 = vmatmul.msk.bf16.vlgmr.msra.gmra.mxu1 %vm1261_vm0, %v1307_v36  ;;  %v8690_v35 = vld [vmem:[%s9229_s17 + $0xa4] sm:$0xf]  ;;  %v6548_v36 = vld [vmem:[%s9229_s17 + $0xa8] sm:$0xf0]  ;;  %v6535_v17 = vor.u32 %v8686_v7, %v6532_v14  ;;  %v8715_v29 = vld [vmem:[%s9229_s17 + $0x164] sm:$0xf0] }
  0x64   : > { %1734 = vmatpush.bf16.msrb.mxu0 %v6591_v59  ;;  %1828 = vmatpush.bf16.msrb.mxu1 %v6651_v8  ;;  %v6546_v59 = vld [vmem:[%s9229_s17 + $0xa0] sm:$0xf]  ;;  %v6634_v8 = vld [vmem:[%s9229_s17 + $0x50] sm:$0xf]  ;;  %v8678_v25 = vld [vmem:[%s9229_s17 + $0x44] sm:$0xf] }
  0x65   : > { %v1463_v38 = vld [vmem:[#allocation2 + $0xa] sm:$0xff]  ;;  %1842 = vmatpush.bf16.msrb.mxu2 %v6655_v9  ;;  %v6547_v61 = vor.u32 %v8691_v60, %v6546_v59  ;;  %v8681_v9 = vld [vmem:[%s9229_s17 + $0x54] sm:$0xf0]  ;;  %1285 = vst.msk [vmem:[#allocation8] sm:$0x7] %vm1284_vm9, %v9200_v3  ;;  %s10401_s10 = sld [smem:[#allocation24_spill]] }
  0x66   : > { %v1466_v39 = vpack.c.bf16 %v1463_v38, %v1462_v37  ;;  %v1323_v40 = vld [vmem:[#allocation2 + $0x11] sm:$0xff]  ;;  %v1548_v37 = vadd.s32 8, %v1547_v10  ;;  %v6635_v12 = vor.u32 %v8681_v9, %v6634_v8  ;;  %1286 = vst.msk [vmem:[#allocation9] sm:$0x7] %vm1284_vm9, %v9200_v3  ;;  %vm4048_vm11 = vsmask.f32 7424 }
  0x67   : > { %v1324_v41 = vld [vmem:[#allocation2 + $0x19] sm:$0x7f]  ;;  %v1305_v42 = vld [vmem:[#allocation2 + $0x10] sm:$0xff]  ;;  %1283 = vst.msk [vmem:[#allocation7] sm:$0xf] %vm1282_vm12, %v9200_v3  ;;  %s10402_s11 = sld [smem:[#allocation15_spill]] }
  0x68   : > { %6505 = vmatmul.msk.bf16.vlgmr.msra.gmra.mxu2 %vm1261_vm0, %v1466_v39  ;;  %v1306_v43 = vld [vmem:[#allocation2 + $0x18] sm:$0x7f]  ;;  %v1326_v44 = vpack.c.bf16 %v1324_v41, %v1323_v40  ;;  %1735 = vmatpush.bf16.msrb.mxu0 %v6583_v63  ;;  %v6586_v38 = vld [vmem:[%s9229_s17 + $0xf0] sm:$0xf]  ;;  %v6551_v41 = vor.u32 %v8690_v35, %v6548_v36  ;;  %v8680_v10 = vld [vmem:[%s9229_s17 + $0x54] sm:$0xf] }
  0x69   : > { %v1308_v45 = vpack.c.bf16 %v1306_v43, %v1305_v42  ;;  %v1464_v46 = vld [vmem:[#allocation2 + $0x12] sm:$0xff]  ;;  %v1465_v47 = vld [vmem:[#allocation2 + $0x1a] sm:$0x7f]  ;;  %1829 = vmatpush.bf16.msrb.mxu1 %v6643_v20  ;;  %1843 = vmatpush.bf16.msrb.mxu2 %v6647_v21  ;;  %v9494_v43 = vsel %vm1553_vm3, 1.0, %v9200_v3  ;;  %s10403_s0 = sld [smem:[#allocation19_spill]]  ;;  %vm5570_vm3 = vcmask 191488  }
  0x6a   : > { %v1467_v48 = vpack.c.bf16 %v1465_v47, %v1464_v46  ;;  %v8701_v39 = vld [vmem:[%s9229_s17 + $0xf4] sm:$0xf0]  ;;  %v6578_v46 = vld [vmem:[%s9229_s17 + $0xe0] sm:$0xf]  ;;  %v8699_v47 = vld [vmem:[%s9229_s17 + $0xe4] sm:$0xf0] }
  0x6b   : > { %v8689_v63 = vld [vmem:[%s9229_s17 + $0x94] sm:$0xf0]  ;;  %v6732_v20 = vld [vmem:[%s9229_s17 + $0x178] sm:$0xf0]  ;;  %v6618_v35 = vld [vmem:[%s9229_s17 + $0x30] sm:$0xf] }
  0x6c   : > { %1736 = vmatpush.bf16.msrb.mxu0 %v6575_v11  ;;  %v6539_v1 = vor.u32 %v8689_v63, %v6538_v62  ;;  %v6531_v11 = vor.u32 %v8687_v6, %v6530_v5  ;;  %v8677_v36 = vld [vmem:[%s9229_s17 + $0x34] sm:$0xf0]  ;;  %v6602_v60 = vld [vmem:[%s9229_s17 + $0x10] sm:$0xf]  ;;  %v8672_v62 = vld [vmem:[%s9229_s17 + $0x14] sm:$0xf] }
  0x6d   : > { %1830 = vmatpush.bf16.msrb.mxu1 %v6635_v12  ;;  %v8670_v5 = vld [vmem:[%s9229_s17 + $0x4] sm:$0xf]  ;;  %v6596_v6 = vld [vmem:[%s9229_s17 + $0x8] sm:$0xf0]  ;;  %v6698_v7 = vld [vmem:[%s9229_s17 + $0x130] sm:$0xf] }
  0x6e   : > { %v8709_v9 = vld [vmem:[%s9229_s17 + $0x134] sm:$0xf0]  ;;  %v6599_v12 = vor.u32 %v8670_v5, %v6596_v6  ;;  %v8776_v5 = vld [vmem:[%s9239_s25 + $0x1d4] sm:$0xf]  ;;  %s10404_s18 = sld [smem:[#allocation28_spill]] }
  0x70   : > { %1737 = vmatpush.bf16.msrb.mxu0 %v6567_v22  ;;  %v6735_v22 = vor.u32 %v8716_v19, %v6732_v20 }
  0x73   : > { %6442 = vmatmul.msk.bf16.gmra.mxu0 %vm1261_vm0, %v1326_v44  ;;  %6468 = vmatmul.msk.bf16.gmra.mxu1 %vm1261_vm0, %v1308_v45  ;;  %v6587_v44 = vor.u32 %v8701_v39, %v6586_v38  ;;  %v1552_v45 = vmul.u32 2, %v1548_v37  ;;  %v8676_v37 = vld [vmem:[%s9229_s17 + $0x34] sm:$0xf]  ;;  %v6619_v38 = vor.u32 %v8677_v36, %v6618_v35  ;;  %v6620_v39 = vld [vmem:[%s9229_s17 + $0x38] sm:$0xf0] }
  0x74   : > { %1738 = vmatpush.bf16.msrb.mxu0 %v6559_v31  ;;  %v8781_v35 = vld [vmem:[%s9239_s25 + $0x1f4] sm:$0xf0] }
  0x75   : > { %vm1554_vm5 = vcmp.eq.s32.totalorder %v1550_v28, %v1552_v45  ;;  %v6722_v28 = vld [vmem:[%s9229_s17 + $0x160] sm:$0xf]  ;;  %v8712_v45 = vld [vmem:[%s9229_s17 + $0x154] sm:$0xf] }
  0x76   : > { %v6723_v31 = vor.u32 %v8715_v29, %v6722_v28  ;;  %v8703_v28 = vld [vmem:[%s9229_s17 + $0x104] sm:$0xf0]  ;;  %v8702_v29 = vld [vmem:[%s9229_s17 + $0x104] sm:$0xf] }
  0x78   : > { %6506 = vmatmul.msk.bf16.gmra.mxu2 %vm1261_vm0, %v1467_v48  ;;  %1739 = vmatpush.bf16.msrb.mxu0 %v6551_v41  ;;  %v6579_v48 = vor.u32 %v8699_v47, %v6578_v46  ;;  %v8713_v41 = vld [vmem:[%s9229_s17 + $0x154] sm:$0xf0]  ;;  %v6716_v46 = vld [vmem:[%s9229_s17 + $0x158] sm:$0xf0] }
  0x79   : > { %v6719_v47 = vor.u32 %v8712_v45, %v6716_v46 }
  0xe0   : > { %v1391_v49 = vpop.f32.mrf.mxu0  ;;  %v1452_v50 = vpop.f32.mrf.mxu1 }
  0xe1   : > { %v1453_v32 = vadd.f32 %v1452_v50, %v1391_v49  ;;  %v6570_v49 = vld [vmem:[%s9229_s17 + $0xd0] sm:$0xf]  ;;  %v8697_v50 = vld [vmem:[%s9229_s17 + $0xd4] sm:$0xf0] }
  0xe8   : > { %v1393_v51 = vpop.f32.mrf.mxu0  ;;  %v1454_v53 = vpop.f32.mrf.mxu1 }
  0xe9   : > { %v1455_v33 = vadd.f32 %v1454_v53, %v1393_v51  ;;  %v6508_v51 = vsel %vm1554_vm5, 1.0, %v9200_v3  ;;  %v6562_v53 = vld [vmem:[%s9229_s17 + $0xc0] sm:$0xf]  ;;  %vm5736_vm5 = vcmask 91136  }
  0xeb   : > { %v9467_v52 = vpop.f32.mrf.mxu2 }
  0xec   : > { %v1542_v42 = vadd.f32 %v9467_v52, %v1453_v32  ;;  %v6571_v52 = vor.u32 %v8697_v50, %v6570_v49  ;;  %v8714_v32 = vld [vmem:[%s9229_s17 + $0x164] sm:$0xf]  ;;  %v8675_v49 = vld [vmem:[%s9229_s17 + $0x24] sm:$0xf0] }
  0xed   : > { %v8674_v50 = vld [vmem:[%s9229_s17 + $0x24] sm:$0xf] }
  0xf0   : > { %v1396_v55 = vpop.f32.mrf.mxu0  ;;  %v1457_v56 = vpop.f32.mrf.mxu1 }
  0xf1   : > { %v1458_v23 = vadd.f32 %v1457_v56, %v1396_v55  ;;  %v6554_v56 = vld [vmem:[%s9229_s17 + $0xb0] sm:$0xf] }
  0xf2   : > { %v6555_v58 = vor.u32 %v8693_v57, %v6554_v56  ;;  %v8710_v57 = vld [vmem:[%s9229_s17 + $0x144] sm:$0xf] }
  0xf3   : > { %v1534_v54 = vpop.f32.mrf.mxu2 }
  0xf4   : > { %v1543_v40 = vadd.f32 %v1534_v54, %v1455_v33  ;;  %v8695_v54 = vld [vmem:[%s9229_s17 + $0xc4] sm:$0xf0]  ;;  %v6724_v33 = vld [vmem:[%s9229_s17 + $0x168] sm:$0xf0] }
  0xf5   : > { %v6563_v55 = vor.u32 %v8695_v54, %v6562_v53  ;;  %v6706_v53 = vld [vmem:[%s9229_s17 + $0x140] sm:$0xf]  ;;  %v8711_v54 = vld [vmem:[%s9229_s17 + $0x144] sm:$0xf0] }
  0xf6   : > { %v6707_v56 = vor.u32 %v8711_v54, %v6706_v53 }
  0xf8   : > { %v1398_v15 = vpop.f32.mrf.mxu0  ;;  %v1459_v16 = vpop.f32.mrf.mxu1 }
  0xf9   : > { %v1460_v24 = vadd.f32 %v1459_v16, %v1398_v15  ;;  %v6730_v15 = vld [vmem:[%s9229_s17 + $0x170] sm:$0xf]  ;;  %v6639_v16 = vor.u32 %v8680_v10, %v6636_v13  ;;  %v8708_v10 = vld [vmem:[%s9229_s17 + $0x134] sm:$0xf]  ;;  %v6699_v13 = vor.u32 %v8709_v9, %v6698_v7  ;;  %v6876_v7 = vld [vmem:[%s9239_s25 + $0x1d8] sm:$0xf0] }
  0xfa   : > { %v6731_v21 = vor.u32 %v8717_v18, %v6730_v15  ;;  %v6690_v15 = vld [vmem:[%s9229_s17 + $0x120] sm:$0xf]  ;;  %v6692_v18 = vld [vmem:[%s9229_s17 + $0x128] sm:$0xf0] }
  0xfb   : > { %v1537_v4 = vpop.f32.mrf.mxu2  ;;  %1844 = vmatpush.bf16.msrb.mxu2 %v6639_v16  ;;  %v8707_v16 = vld [vmem:[%s9229_s17 + $0x124] sm:$0xf0]  ;;  %v6818_v9 = vld [vmem:[%s9239_s25 + $0x160] sm:$0xf] }
  0xfc   : > { %v1544_v34 = vadd.f32 %v1537_v4, %v1458_v23  ;;  %v6543_v4 = vor.u32 %v8688_v0, %v6540_v2  ;;  %v6626_v23 = vld [vmem:[%s9229_s17 + $0x40] sm:$0xf]  ;;  %v6604_v0 = vld [vmem:[%s9229_s17 + $0x18] sm:$0xf0]  ;;  %v8671_v2 = vld [vmem:[%s9229_s17 + $0x4] sm:$0xf0]  ;;  %v6691_v19 = vor.u32 %v8707_v16, %v6690_v15 }
  0xfd   : > { %v6866_v15 = vld [vmem:[%s9239_s25 + $0x1c0] sm:$0xf]  ;;  %v8775_v16 = vld [vmem:[%s9239_s25 + $0x1c4] sm:$0xf0] }
  0xfe   : > { %1740 = vmatpush.bf16.msrb.mxu0 %v6543_v4  ;;  %v6607_v4 = vor.u32 %v8672_v62, %v6604_v0 }
 0x102   : > { %1741 = vmatpush.bf16.msrb.mxu0 %v6535_v17  ;;  %v8706_v17 = vld [vmem:[%s9229_s17 + $0x124] sm:$0xf] }
 0x103   : > { %v1539_v27 = vpop.f32.mrf.mxu2  ;;  %v6695_v20 = vor.u32 %v8706_v17, %v6692_v18  ;;  %v8774_v17 = vld [vmem:[%s9239_s25 + $0x1c4] sm:$0xf]  ;;  %v6867_v18 = vor.u32 %v8775_v16, %v6866_v15  ;;  %v8752_v15 = vld [vmem:[%s9239_s25 + $0x114] sm:$0xf]  ;;  %v6780_v16 = vld [vmem:[%s9239_s25 + $0x118] sm:$0xf0] }
 0x104   : > { %v1545_v30 = vadd.f32 %v1539_v27, %v1460_v24  ;;  %v8679_v24 = vld [vmem:[%s9229_s17 + $0x44] sm:$0xf0]  ;;  %v6628_v27 = vld [vmem:[%s9229_s17 + $0x48] sm:$0xf0] }
 0x105   : > { %v6627_v26 = vor.u32 %v8679_v24, %v6626_v23  ;;  %v8704_v23 = vld [vmem:[%s9229_s17 + $0x114] sm:$0xf]  ;;  %v6684_v24 = vld [vmem:[%s9229_s17 + $0x118] sm:$0xf0] }
 0x106   : > { %6509 = vmatpush.msk.msra.mxu3 %vm1570_vm2, %v1545_v30  ;;  %1970 = vmatpush.bf16.msra.mxu0 %v6735_v22  ;;  %v6631_v30 = vor.u32 %v8678_v25, %v6628_v27  ;;  %v8705_v22 = vld [vmem:[%s9229_s17 + $0x114] sm:$0xf0]  ;;  %v6674_v27 = vld [vmem:[%s9229_s17 + $0x100] sm:$0xf] }
 0x107   : > { %1831 = vmatpush.bf16.msrb.mxu1 %v6627_v26  ;;  %v6687_v26 = vor.u32 %v8704_v23, %v6684_v24  ;;  %v8760_v23 = vld [vmem:[%s9239_s25 + $0x154] sm:$0xf] }
 0x108   : > { %1587 = vmatpush.msra.mxu3 %v1544_v34  ;;  %v6727_v34 = vor.u32 %v8714_v32, %v6724_v33  ;;  %1845 = vmatpush.bf16.msrb.mxu2 %v6631_v30  ;;  %v6676_v30 = vld [vmem:[%s9229_s17 + $0x108] sm:$0xf0]  ;;  %v9148_v33 = vld [vmem:[%s9224_s13] ss:$0 sm:$0xff] }
 0x109   : > { %v6679_v32 = vor.u32 %v8702_v29, %v6676_v30  ;;  %v8772_v29 = vld [vmem:[%s9239_s25 + $0x1b4] sm:$0xf] }
 0x10a   : > { %1588 = vmatpush.msra.mxu3 %v1543_v40  ;;  %1971 = vmatpush.bf16.msra.mxu0 %v6727_v34  ;;  %v6714_v40 = vld [vmem:[%s9229_s17 + $0x150] sm:$0xf] }
 0x10b   : > { %1832 = vmatpush.bf16.msrb.mxu1 %v6619_v38  ;;  %v6890_v34 = vld [vmem:[%s9239_s25 + $0x1f0] sm:$0xf]  ;;  %v6882_v38 = vld [vmem:[%s9239_s25 + $0x1e0] sm:$0xf] }
 0x10c   : > { %1589 = vmatpush.msra.mxu3 %v1542_v42  ;;  %v6623_v42 = vor.u32 %v8676_v37, %v6620_v39  ;;  %v6891_v37 = vor.u32 %v8781_v35, %v6890_v34  ;;  %v8779_v39 = vld [vmem:[%s9239_s25 + $0x1e4] sm:$0xf0]  ;;  %v8758_v35 = vld [vmem:[%s9239_s25 + $0x144] sm:$0xf] }
 0x10d   : > { %6510 = vmatmul.msk.f32.vlgmr.msra.gmra.mxu3 %vm1563_vm4, %v9494_v43  ;;  %v8759_v34 = vld [vmem:[%s9239_s25 + $0x144] sm:$0xf0] }
 0x10e   : > { %1720 = vmatpush.bf16.msrb.mxu3 %v6587_v44  ;;  %v6715_v44 = vor.u32 %v8713_v41, %v6714_v40  ;;  %1846 = vmatpush.bf16.msrb.mxu2 %v6623_v42  ;;  %v6826_v41 = vld [vmem:[%s9239_s25 + $0x170] sm:$0xf]  ;;  %v6883_v42 = vor.u32 %v8779_v39, %v6882_v38  ;;  %v6850_v39 = vld [vmem:[%s9239_s25 + $0x1a0] sm:$0xf] }
 0x10f   : > { %1972 = vmatpush.bf16.msra.mxu0 %v6719_v47 }
 0x112   : > { %1721 = vmatpush.bf16.msrb.mxu3 %v6579_v48  ;;  %v6610_v48 = vld [vmem:[%s9229_s17 + $0x20] sm:$0xf] }
 0x115   : > { %6511 = vmatmul.msk.f32.gmra.mxu3 %vm1563_vm4, %v6508_v51  ;;  %v6611_v51 = vor.u32 %v8675_v49, %v6610_v48  ;;  %v8780_v48 = vld [vmem:[%s9239_s25 + $0x1f4] sm:$0xf]  ;;  %vm5576_vm4 = vcmask 257024  }
 0x116   : > { %1722 = vmatpush.bf16.msrb.mxu3 %v6571_v52  ;;  %v6612_v52 = vld [vmem:[%s9229_s17 + $0x28] sm:$0xf0] }
 0x117   : > { %1833 = vmatpush.bf16.msrb.mxu1 %v6611_v51  ;;  %v8764_v51 = vld [vmem:[%s9239_s25 + $0x174] sm:$0xf] }
 0x11a   : > { %1723 = vmatpush.bf16.msrb.mxu3 %v6563_v55  ;;  %v6615_v55 = vor.u32 %v8674_v50, %v6612_v52  ;;  %v6892_v50 = vld [vmem:[%s9239_s25 + $0x1f8] sm:$0xf0] }
 0x11b   : > { %v6828_v52 = vld [vmem:[%s9239_s25 + $0x178] sm:$0xf0]  ;;  %v6895_v54 = vor.u32 %v8780_v48, %v6892_v50  ;;  %v8756_v48 = vld [vmem:[%s9239_s25 + $0x134] sm:$0xf] }
 0x11c   : > { %1847 = vmatpush.bf16.msrb.mxu2 %v6615_v55  ;;  %v6831_v55 = vor.u32 %v8764_v51, %v6828_v52  ;;  %v6796_v50 = vld [vmem:[%s9239_s25 + $0x138] sm:$0xf0]  ;;  %v6842_v52 = vld [vmem:[%s9239_s25 + $0x190] sm:$0xf] }
 0x11d   : > { %v6799_v51 = vor.u32 %v8756_v48, %v6796_v50  ;;  %v6948_v48 = vld [vmem:[%s9239_s25 + $0x68] sm:$0xf0]  ;;  %v6994_v50 = vld [vmem:[%s9239_s25 + $0xc0] sm:$0xf] }
 0x11e   : > { %1724 = vmatpush.bf16.msrb.mxu3 %v6555_v58  ;;  %v6708_v58 = vld [vmem:[%s9229_s17 + $0x148] sm:$0xf0] }
 0x11f   : > { %v6711_v59 = vor.u32 %v8710_v57, %v6708_v58  ;;  %v8778_v57 = vld [vmem:[%s9239_s25 + $0x1e4] sm:$0xf]  ;;  %v6884_v58 = vld [vmem:[%s9239_s25 + $0x1e8] sm:$0xf0] }
 0x120   : > { %1848 = vmatpush.bf16.msrb.mxu2 %v6607_v4  ;;  %v8777_v4 = vld [vmem:[%s9239_s25 + $0x1d4] sm:$0xf0] }
 0x121   : > { %1973 = vmatpush.bf16.msra.mxu0 %v6711_v59  ;;  %v6887_v59 = vor.u32 %v8778_v57, %v6884_v58  ;;  %v6786_v58 = vld [vmem:[%s9239_s25 + $0x120] sm:$0xf] }
 0x122   : > { %1725 = vmatpush.bf16.msrb.mxu3 %v6547_v61  ;;  %v8673_v61 = vld [vmem:[%s9229_s17 + $0x14] sm:$0xf0] }
 0x123   : > { %v6603_v63 = vor.u32 %v8673_v61, %v6602_v60 }
 0x124   : > { %1849 = vmatpush.bf16.msrb.mxu2 %v6599_v12 }
 0x125   : > { %1834 = vmatpush.bf16.msrb.mxu1 %v6603_v63 }
 0x126   : > { %1726 = vmatpush.bf16.msrb.mxu3 %v6539_v1  ;;  %v6594_v1 = vld [vmem:[%s9229_s17] sm:$0xf] }
 0x127   : > { %v6595_v8 = vor.u32 %v8671_v2, %v6594_v1  ;;  %v6874_v2 = vld [vmem:[%s9239_s25 + $0x1d0] sm:$0xf] }
 0x128   : > { %2292 = vmatpush.bf16.msra.mxu2 %v6891_v37  ;;  %v6875_v6 = vor.u32 %v8777_v4, %v6874_v2  ;;  %v6804_v37 = vld [vmem:[%s9239_s25 + $0x148] sm:$0xf0]  ;;  %v8766_v2 = vld [vmem:[%s9239_s25 + $0x184] sm:$0xf] }
 0x129   : > { %1835 = vmatpush.bf16.msrb.mxu1 %v6595_v8  ;;  %v6879_v8 = vor.u32 %v8776_v5, %v6876_v7  ;;  %v6807_v38 = vor.u32 %v8758_v35, %v6804_v37  ;;  %v6836_v5 = vld [vmem:[%s9239_s25 + $0x188] sm:$0xf0]  ;;  %v8749_v7 = vld [vmem:[%s9239_s25 + $0xf4] sm:$0xf0]  ;;  %v6956_v35 = vld [vmem:[%s9239_s25 + $0x78] sm:$0xf0] }
 0x12a   : > { %1727 = vmatpush.bf16.msrb.mxu3 %v6531_v11  ;;  %v6700_v11 = vld [vmem:[%s9229_s17 + $0x138] sm:$0xf0] }
 0x12b   : > { %v6703_v14 = vor.u32 %v8708_v10, %v6700_v11  ;;  %v8763_v10 = vld [vmem:[%s9239_s25 + $0x164] sm:$0xf0]  ;;  %v8762_v11 = vld [vmem:[%s9239_s25 + $0x164] sm:$0xf] }
 0x12c   : > { %2293 = vmatpush.bf16.msra.mxu2 %v6883_v42  ;;  %v6819_v12 = vor.u32 %v8763_v10, %v6818_v9  ;;  %v8748_v10 = vld [vmem:[%s9239_s25 + $0xf4] sm:$0xf] }
 0x12d   : > { %1974 = vmatpush.bf16.msra.mxu0 %v6703_v14 }
 0x12e   : > { %1956 = vmatpush.bf16.msra.mxu3 %v6731_v21  ;;  %v6682_v21 = vld [vmem:[%s9229_s17 + $0x110] sm:$0xf] }
 0x12f   : > { %v6683_v25 = vor.u32 %v8705_v22, %v6682_v21  ;;  %v6810_v21 = vld [vmem:[%s9239_s25 + $0x150] sm:$0xf]  ;;  %v8761_v22 = vld [vmem:[%s9239_s25 + $0x154] sm:$0xf0] }
 0x130   : > { %2294 = vmatpush.bf16.msra.mxu2 %v6875_v6  ;;  %v6811_v24 = vor.u32 %v8761_v22, %v6810_v21  ;;  %v7018_v6 = vld [vmem:[%s9239_s25 + $0xf0] sm:$0xf]  ;;  %v8746_v21 = vld [vmem:[%s9239_s25 + $0xe4] sm:$0xf] }
 0x131   : > { %1975 = vmatpush.bf16.msra.mxu0 %v6695_v20  ;;  %v7019_v9 = vor.u32 %v8749_v7, %v7018_v6  ;;  %v8727_v6 = vld [vmem:[%s9239_s25 + $0x44] sm:$0xf0]  ;;  %v8726_v7 = vld [vmem:[%s9239_s25 + $0x44] sm:$0xf] }
 0x132   : > { %1957 = vmatpush.bf16.msra.mxu3 %v6723_v31  ;;  %v6675_v31 = vor.u32 %v8703_v28, %v6674_v27  ;;  %v6858_v27 = vld [vmem:[%s9239_s25 + $0x1b0] sm:$0xf]  ;;  %v8773_v28 = vld [vmem:[%s9239_s25 + $0x1b4] sm:$0xf0] }
 0x133   : > { %v6859_v30 = vor.u32 %v8773_v28, %v6858_v27  ;;  %v8750_v27 = vld [vmem:[%s9239_s25 + $0x104] sm:$0xf] }
 0x134   : > { %2295 = vmatpush.bf16.msra.mxu2 %v6867_v18  ;;  %v6783_v18 = vor.u32 %v8752_v15, %v6780_v16  ;;  %v8738_v15 = vld [vmem:[%s9239_s25 + $0xa4] sm:$0xf]  ;;  %v6980_v16 = vld [vmem:[%s9239_s25 + $0xa8] sm:$0xf0] }
 0x135   : > { %1976 = vmatpush.bf16.msra.mxu0 %v6687_v26 }
 0x136   : > { %1958 = vmatpush.bf16.msra.mxu3 %v6715_v44  ;;  %v8765_v44 = vld [vmem:[%s9239_s25 + $0x174] sm:$0xf0] }
 0x137   : > { %v6827_v46 = vor.u32 %v8765_v44, %v6826_v41  ;;  %v8770_v41 = vld [vmem:[%s9239_s25 + $0x1a4] sm:$0xf]  ;;  %v6852_v44 = vld [vmem:[%s9239_s25 + $0x1a8] sm:$0xf0] }
 0x138   : > { %2296 = vmatpush.bf16.msra.mxu2 %v6859_v30  ;;  %v6954_v30 = vld [vmem:[%s9239_s25 + $0x70] sm:$0xf] }
 0x139   : > { %1977 = vmatpush.bf16.msra.mxu0 %v6679_v32  ;;  %2278 = vmatpush.bf16.msra.mxu1 %v6827_v46  ;;  %v6794_v46 = vld [vmem:[%s9239_s25 + $0x130] sm:$0xf] }
 0x13a   : > { %1959 = vmatpush.bf16.msra.mxu3 %v6707_v56 }
 0x13d   : > { %2279 = vmatpush.bf16.msra.mxu1 %v6819_v12  ;;  %v6778_v12 = vld [vmem:[%s9239_s25 + $0x110] sm:$0xf] }
 0x13e   : > { %1960 = vmatpush.bf16.msra.mxu3 %v6699_v13  ;;  %v6820_v13 = vld [vmem:[%s9239_s25 + $0x168] sm:$0xf0] }
 0x13f   : > { %v6823_v14 = vor.u32 %v8762_v11, %v6820_v13  ;;  %v7020_v11 = vld [vmem:[%s9239_s25 + $0xf8] sm:$0xf0] }
 0x140   : > { %v7023_v13 = vor.u32 %v8748_v10, %v7020_v11  ;;  %v6978_v11 = vld [vmem:[%s9239_s25 + $0xa0] sm:$0xf] }
 0x141   : > { %2280 = vmatpush.bf16.msra.mxu1 %v6811_v24  ;;  %v6770_v24 = vld [vmem:[%s9239_s25 + $0x100] sm:$0xf] }
 0x142   : > { %1961 = vmatpush.bf16.msra.mxu3 %v6691_v19  ;;  %v6868_v19 = vld [vmem:[%s9239_s25 + $0x1c8] sm:$0xf0] }
 0x143   : > { %v6871_v20 = vor.u32 %v8774_v17, %v6868_v19  ;;  %v7010_v19 = vld [vmem:[%s9239_s25 + $0xe0] sm:$0xf] }
 0x146   : > { %1962 = vmatpush.bf16.msra.mxu3 %v6683_v25  ;;  %v6812_v25 = vld [vmem:[%s9239_s25 + $0x158] sm:$0xf0] }
 0x147   : > { %v6815_v26 = vor.u32 %v8760_v23, %v6812_v25  ;;  %v7012_v23 = vld [vmem:[%s9239_s25 + $0xe8] sm:$0xf0] }
 0x148   : > { %v7015_v25 = vor.u32 %v8746_v21, %v7012_v23 }
 0x14a   : > { %1963 = vmatpush.bf16.msra.mxu3 %v6675_v31  ;;  %v6860_v31 = vld [vmem:[%s9239_s25 + $0x1b8] sm:$0xf0] }
 0x14b   : > { %v6863_v32 = vor.u32 %v8772_v29, %v6860_v31  ;;  %v6772_v29 = vld [vmem:[%s9239_s25 + $0x108] sm:$0xf0]  ;;  %v8733_v31 = vld [vmem:[%s9239_s25 + $0x74] sm:$0xf0] }
 0x190   : > { %v1591_v36 = vpop.f32.mrf.mxu3 }
 0x191   : > { %v1592_v40 = vadd.f32 %v9148_v33, %v1591_v36 }
 0x193   : > { %v1597_v45 = vmax.f32 %v1592_v40, 0.0  ;;  %v8771_v40 = vld [vmem:[%s9239_s25 + $0x1a4] sm:$0xf0] }
 0x194   : > { %v6851_v42 = vor.u32 %v8771_v40, %v6850_v39  ;;  %v8744_v39 = vld [vmem:[%s9239_s25 + $0xd4] sm:$0xf]  ;;  %v7004_v40 = vld [vmem:[%s9239_s25 + $0xd8] sm:$0xf0] }
 0x195   : > { %1599 = vst [vmem:[#allocation3 + $0x1] sm:$0xff] %v1597_v45 }
 0x196   : > { %2297 = vmatpush.bf16.msra.mxu2 %v6851_v42  ;;  %v7007_v42 = vor.u32 %v8744_v39, %v7004_v40  ;;  %v8734_v39 = vld [vmem:[%s9239_s25 + $0x84] sm:$0xf] }
 0x198   : > { %v1594_v47 = vpop.f32.mrf.mxu3 }
 0x199   : > { %v1595_v49 = vadd.f32 %v9148_v33, %v1594_v47  ;;  %v6802_v33 = vld [vmem:[%s9239_s25 + $0x140] sm:$0xf]  ;;  %v8757_v47 = vld [vmem:[%s9239_s25 + $0x134] sm:$0xf0] }
 0x19a   : > { %v6803_v36 = vor.u32 %v8759_v34, %v6802_v33  ;;  %v6955_v33 = vor.u32 %v8733_v31, %v6954_v30  ;;  %v8732_v34 = vld [vmem:[%s9239_s25 + $0x74] sm:$0xf]  ;;  %v6914_v30 = vld [vmem:[%s9239_s25 + $0x20] sm:$0xf]  ;;  %v8723_v31 = vld [vmem:[%s9239_s25 + $0x24] sm:$0xf0] }
 0x19b   : > { %v1598_v53 = vmax.f32 %v1595_v49, 0.0  ;;  %v6795_v49 = vor.u32 %v8757_v47, %v6794_v46  ;;  %v6959_v37 = vor.u32 %v8732_v34, %v6956_v35  ;;  %v8730_v46 = vld [vmem:[%s9239_s25 + $0x64] sm:$0xf]  ;;  %v6915_v34 = vor.u32 %v8723_v31, %v6914_v30  ;;  %v6916_v35 = vld [vmem:[%s9239_s25 + $0x28] sm:$0xf0] }
 0x19c   : > { %v1601_v60 = vld [vmem:[#allocation3] sm:$0xff]  ;;  %2281 = vmatpush.bf16.msra.mxu1 %v6803_v36  ;;  %v7002_v36 = vld [vmem:[%s9239_s25 + $0xd0] sm:$0xf]  ;;  %v8812_v31 = vld [vmem:[%s9239_s25 + $0x2f4] sm:$0xf] }
 0x19d   : > { %1600 = vst [vmem:[#allocation3 + $0x9] sm:$0xff] %v1598_v53  ;;  %v1622_v56 = vpack.c.bf16 %v1598_v53, %v1597_v45  ;;  %v6855_v45 = vor.u32 %v8770_v41, %v6852_v44  ;;  %v8769_v53 = vld [vmem:[%s9239_s25 + $0x194] sm:$0xf0]  ;;  %v6946_v44 = vld [vmem:[%s9239_s25 + $0x60] sm:$0xf] }
 0x19f   : > { %1728 = vmatmul.bf16.vlgmr.msrb.gmra.mxu3 %v1622_v56  ;;  %1742 = vmatmul.bf16.vlgmr.msrb.gmra.mxu0 %v1622_v56  ;;  %v6844_v56 = vld [vmem:[%s9239_s25 + $0x198] sm:$0xf0] }
 0x1a0   : > { %2320 = vmatpush.bf16.msrb.mxu0 %v6895_v54  ;;  %2306 = vmatpush.bf16.msrb.mxu3 %v6831_v55  ;;  %v8768_v54 = vld [vmem:[%s9239_s25 + $0x194] sm:$0xf]  ;;  %v6843_v55 = vor.u32 %v8769_v53, %v6842_v52  ;;  %v8742_v53 = vld [vmem:[%s9239_s25 + $0xc4] sm:$0xf] }
 0x1a1   : > { %2282 = vmatpush.bf16.msra.mxu1 %v6795_v49  ;;  %v6847_v57 = vor.u32 %v8768_v54, %v6844_v56  ;;  %v6951_v49 = vor.u32 %v8730_v46, %v6948_v48  ;;  %v6996_v54 = vld [vmem:[%s9239_s25 + $0xc8] sm:$0xf0]  ;;  %v6938_v56 = vld [vmem:[%s9239_s25 + $0x50] sm:$0xf]  ;;  %v8721_v46 = vld [vmem:[%s9239_s25 + $0x14] sm:$0xf0] }
 0x1a2   : > { %2298 = vmatpush.bf16.msra.mxu2 %v6843_v55  ;;  %v6999_v55 = vor.u32 %v8742_v53, %v6996_v54  ;;  %v6908_v48 = vld [vmem:[%s9239_s25 + $0x18] sm:$0xf0]  ;;  %v8719_v53 = vld [vmem:[%s9239_s25 + $0x4] sm:$0xf0]  ;;  %v8718_v54 = vld [vmem:[%s9239_s25 + $0x4] sm:$0xf] }
 0x1a4   : > { %v1602_v61 = vld [vmem:[#allocation3 + $0x8] sm:$0xff]  ;;  %2321 = vmatpush.bf16.msrb.mxu0 %v6887_v59  ;;  %2307 = vmatpush.bf16.msrb.mxu3 %v6823_v14  ;;  %v8755_v59 = vld [vmem:[%s9239_s25 + $0x124] sm:$0xf0]  ;;  %v8753_v14 = vld [vmem:[%s9239_s25 + $0x114] sm:$0xf0] }
 0x1a5   : > { %v1603_v62 = vpack.c.bf16 %v1602_v61, %v1601_v60  ;;  %v1856_v63 = vld [vmem:[#allocation3 + $0x2] sm:$0xff]  ;;  %v1857_v0 = vld [vmem:[#allocation3 + $0xa] sm:$0xff]  ;;  %v8754_v60 = vld [vmem:[%s9239_s25 + $0x124] sm:$0xf]  ;;  %v6787_v61 = vor.u32 %v8755_v59, %v6786_v58  ;;  %v6779_v17 = vor.u32 %v8753_v14, %v6778_v12 }
 0x1a6   : > { %v1858_v1 = vpack.c.bf16 %v1857_v0, %v1856_v63  ;;  %v6834_v0 = vld [vmem:[%s9239_s25 + $0x180] sm:$0xf]  ;;  %v8728_v58 = vld [vmem:[%s9239_s25 + $0x54] sm:$0xf]  ;;  %v8739_v12 = vld [vmem:[%s9239_s25 + $0xa4] sm:$0xf0] }
 0x1a7   : > { %1836 = vmatmul.bf16.vlgmr.msrb.gmra.mxu1 %v1603_v62  ;;  %1850 = vmatmul.bf16.vlgmr.msrb.gmra.mxu2 %v1603_v62  ;;  %v6788_v62 = vld [vmem:[%s9239_s25 + $0x128] sm:$0xf0]  ;;  %v6979_v14 = vor.u32 %v8739_v12, %v6978_v11 }
 0x1a8   : > { %2322 = vmatpush.bf16.msrb.mxu0 %v6879_v8  ;;  %2308 = vmatpush.bf16.msrb.mxu3 %v6815_v26  ;;  %v6791_v63 = vor.u32 %v8754_v60, %v6788_v62  ;;  %v6839_v8 = vor.u32 %v8766_v2, %v6836_v5  ;;  %v8751_v26 = vld [vmem:[%s9239_s25 + $0x104] sm:$0xf0]  ;;  %v6940_v60 = vld [vmem:[%s9239_s25 + $0x58] sm:$0xf0]  ;;  %v6986_v62 = vld [vmem:[%s9239_s25 + $0xb0] sm:$0xf] }
 0x1a9   : > { %2283 = vmatpush.bf16.msra.mxu1 %v6787_v61  ;;  %v6771_v28 = vor.u32 %v8751_v26, %v6770_v24  ;;  %v6943_v61 = vor.u32 %v8728_v58, %v6940_v60  ;;  %v6988_v2 = vld [vmem:[%s9239_s25 + $0xb8] sm:$0xf0]  ;;  %v6930_v5 = vld [vmem:[%s9239_s25 + $0x40] sm:$0xf]  ;;  %v6970_v24 = vld [vmem:[%s9239_s25 + $0x90] sm:$0xf] }
 0x1aa   : > { %v8736_v26 = vld [vmem:[%s9239_s25 + $0x94] sm:$0xf]  ;;  %v6900_v58 = vld [vmem:[%s9239_s25 + $0x8] sm:$0xf0] }
 0x1ac   : > { %2323 = vmatpush.bf16.msrb.mxu0 %v6871_v20  ;;  %2309 = vmatpush.bf16.msrb.mxu3 %v6807_v38  ;;  %v8747_v20 = vld [vmem:[%s9239_s25 + $0xe4] sm:$0xf0]  ;;  %v8745_v38 = vld [vmem:[%s9239_s25 + $0xd4] sm:$0xf0] }
 0x1ad   : > { %2284 = vmatpush.bf16.msra.mxu1 %v6779_v17  ;;  %v7011_v22 = vor.u32 %v8747_v20, %v7010_v19  ;;  %v7003_v41 = vor.u32 %v8745_v38, %v7002_v36  ;;  %v6983_v17 = vor.u32 %v8738_v15, %v6980_v16  ;;  %v8725_v19 = vld [vmem:[%s9239_s25 + $0x34] sm:$0xf0]  ;;  %v8724_v20 = vld [vmem:[%s9239_s25 + $0x34] sm:$0xf]  ;;  %v8735_v38 = vld [vmem:[%s9239_s25 + $0x84] sm:$0xf0] }
 0x1af   : > { %1964 = vmatmul.bf16.vlgmr.msra.gmra.mxu3 %v1858_v1  ;;  %1978 = vmatmul.bf16.vlgmr.msra.gmra.mxu0 %v1858_v1  ;;  %v8767_v1 = vld [vmem:[%s9239_s25 + $0x184] sm:$0xf0] }
 0x1b0   : > { %2324 = vmatpush.bf16.msrb.mxu0 %v6863_v32  ;;  %2310 = vmatpush.bf16.msrb.mxu3 %v6799_v51  ;;  %v6835_v4 = vor.u32 %v8767_v1, %v6834_v0  ;;  %v6775_v32 = vor.u32 %v8750_v27, %v6772_v29  ;;  %v8743_v51 = vld [vmem:[%s9239_s25 + $0xc4] sm:$0xf0]  ;;  %v8740_v0 = vld [vmem:[%s9239_s25 + $0xb4] sm:$0xf] }
 0x1b1   : > { %2285 = vmatpush.bf16.msra.mxu1 %v6771_v28  ;;  %v6995_v52 = vor.u32 %v8743_v51, %v6994_v50  ;;  %v6972_v28 = vld [vmem:[%s9239_s25 + $0x98] sm:$0xf0]  ;;  %v1988_v51 = vld [vmem:[%s9234_s21] sm:$0x3] }
 0x1b2   : > { %2299 = vmatpush.bf16.msra.mxu2 %v6835_v4  ;;  %v6991_v4 = vor.u32 %v8740_v0, %v6988_v2  ;;  %v6975_v29 = vor.u32 %v8736_v26, %v6972_v28  ;;  %v1991_v60 = vperm.slane %v1988_v51, 1  ;;  %v7178_v28 = vld [vmem:[%s9239_s25 + $0x2f0] sm:$0xf] }
 0x1b4   : > { %2325 = vmatpush.bf16.msrb.mxu0 %v6855_v45  ;;  %2311 = vmatpush.bf16.msrb.mxu3 %v6791_v63  ;;  %v8731_v45 = vld [vmem:[%s9239_s25 + $0x64] sm:$0xf0]  ;;  %v8741_v63 = vld [vmem:[%s9239_s25 + $0xb4] sm:$0xf0] }
 0x1b5   : > { %2494 = vmatpush.bf16.msrb.mxu1 %v6955_v33  ;;  %v6947_v47 = vor.u32 %v8731_v45, %v6946_v44  ;;  %v6987_v1 = vor.u32 %v8741_v63, %v6986_v62  ;;  %v6906_v45 = vld [vmem:[%s9239_s25 + $0x10] sm:$0xf] }
 0x1b6   : > { %2508 = vmatpush.bf16.msrb.mxu2 %v7019_v9  ;;  %v6932_v9 = vld [vmem:[%s9239_s25 + $0x48] sm:$0xf0] }
 0x1b7   : > { %v6935_v10 = vor.u32 %v8726_v7, %v6932_v9 }
 0x1b8   : > { %2326 = vmatpush.bf16.msrb.mxu0 %v6847_v57  ;;  %2312 = vmatpush.bf16.msrb.mxu3 %v6783_v18  ;;  %v8729_v57 = vld [vmem:[%s9239_s25 + $0x54] sm:$0xf0]  ;;  %v6922_v18 = vld [vmem:[%s9239_s25 + $0x30] sm:$0xf] }
 0x1b9   : > { %2495 = vmatpush.bf16.msrb.mxu1 %v6947_v47  ;;  %v6939_v59 = vor.u32 %v8729_v57, %v6938_v56  ;;  %v6923_v21 = vor.u32 %v8725_v19, %v6922_v18  ;;  %v8720_v47 = vld [vmem:[%s9239_s25 + $0x14] sm:$0xf] }
 0x1ba   : > { %2509 = vmatpush.bf16.msrb.mxu2 %v7011_v22  ;;  %v6924_v22 = vld [vmem:[%s9239_s25 + $0x38] sm:$0xf0]  ;;  %v6911_v50 = vor.u32 %v8720_v47, %v6908_v48  ;;  %v7114_v47 = vld [vmem:[%s9239_s25 + $0x270] sm:$0xf]  ;;  %v8797_v48 = vld [vmem:[%s9239_s25 + $0x274] sm:$0xf0] }
 0x1bb   : > { %v6927_v23 = vor.u32 %v8724_v20, %v6924_v22 }
 0x1bc   : > { %2327 = vmatpush.bf16.msrb.mxu0 %v6839_v8  ;;  %2313 = vmatpush.bf16.msrb.mxu3 %v6775_v32  ;;  %v6931_v8 = vor.u32 %v8727_v6, %v6930_v5  ;;  %v8722_v32 = vld [vmem:[%s9239_s25 + $0x24] sm:$0xf]  ;;  %v1990_v5 = vperm.slane %v1988_v51, 0  ;;  %v7116_v51 = vld [vmem:[%s9239_s25 + $0x278] sm:$0xf0] }
 0x1bd   : > { %2496 = vmatpush.bf16.msrb.mxu1 %v6939_v59  ;;  %v6919_v36 = vor.u32 %v8722_v32, %v6916_v35  ;;  %v7180_v32 = vld [vmem:[%s9239_s25 + $0x2f8] sm:$0xf0] }
 0x1be   : > { %2510 = vmatpush.bf16.msrb.mxu2 %v7003_v41 }
 0x1c0   : > { %2536 = vmatpush.bf16.msra.mxu0 %v7023_v13  ;;  %2522 = vmatpush.bf16.msra.mxu3 %v6959_v37  ;;  %v6962_v37 = vld [vmem:[%s9239_s25 + $0x80] sm:$0xf] }
 0x1c1   : > { %2497 = vmatpush.bf16.msrb.mxu1 %v6931_v8  ;;  %v6963_v41 = vor.u32 %v8735_v38, %v6962_v37 }
 0x1c2   : > { %2511 = vmatpush.bf16.msrb.mxu2 %v6995_v52  ;;  %v6898_v52 = vld [vmem:[%s9239_s25] sm:$0xf] }
 0x1c3   : > { %v6899_v57 = vor.u32 %v8719_v53, %v6898_v52 }
 0x1c4   : > { %2537 = vmatpush.bf16.msra.mxu0 %v7015_v25  ;;  %2523 = vmatpush.bf16.msra.mxu3 %v6951_v49  ;;  %v8737_v25 = vld [vmem:[%s9239_s25 + $0x94] sm:$0xf0]  ;;  %v6907_v49 = vor.u32 %v8721_v46, %v6906_v45  ;;  %v7172_v45 = vld [vmem:[%s9239_s25 + $0x2e8] sm:$0xf0] }
 0x1c5   : > { %v6971_v27 = vor.u32 %v8737_v25, %v6970_v24  ;;  %2498 = vmatpush.bf16.msrb.mxu1 %v6923_v21 }
 0x1c6   : > { %2512 = vmatpush.bf16.msrb.mxu2 %v6987_v1 }
 0x1c8   : > { %2538 = vmatpush.bf16.msra.mxu0 %v7007_v42  ;;  %2524 = vmatpush.bf16.msra.mxu3 %v6943_v61  ;;  %v6964_v42 = vld [vmem:[%s9239_s25 + $0x88] sm:$0xf0]  ;;  %v6903_v61 = vor.u32 %v8718_v54, %v6900_v58  ;;  %v7162_v54 = vld [vmem:[%s9239_s25 + $0x2d0] sm:$0xf]  ;;  %v8808_v58 = vld [vmem:[%s9239_s25 + $0x2d4] sm:$0xf] }
 0x1c9   : > { %2499 = vmatpush.bf16.msrb.mxu1 %v6915_v34  ;;  %v6967_v44 = vor.u32 %v8734_v39, %v6964_v42  ;;  %v7183_v39 = vor.u32 %v8812_v31, %v7180_v32 }
 0x1ca   : > { %2513 = vmatpush.bf16.msrb.mxu2 %v6979_v14 }
 0x1cc   : > { %2539 = vmatpush.bf16.msra.mxu0 %v6999_v55  ;;  %2525 = vmatpush.bf16.msra.mxu3 %v6935_v10 }
 0x1cd   : > { %2500 = vmatpush.bf16.msrb.mxu1 %v6907_v49 }
 0x1ce   : > { %2514 = vmatpush.bf16.msrb.mxu2 %v6971_v27 }
 0x1d0   : > { %2540 = vmatpush.bf16.msra.mxu0 %v6991_v4  ;;  %2526 = vmatpush.bf16.msra.mxu3 %v6927_v23 }
 0x1d1   : > { %2501 = vmatpush.bf16.msrb.mxu1 %v6899_v57 }
 0x1d2   : > { %2515 = vmatpush.bf16.msrb.mxu2 %v6963_v41  ;;  %v8811_v41 = vld [vmem:[%s9239_s25 + $0x2e4] sm:$0xf0] }
 0x1d4   : > { %2541 = vmatpush.bf16.msra.mxu0 %v6983_v17  ;;  %2527 = vmatpush.bf16.msra.mxu3 %v6919_v36 }
 0x1d8   : > { %2542 = vmatpush.bf16.msra.mxu0 %v6975_v29  ;;  %2528 = vmatpush.bf16.msra.mxu3 %v6911_v50  ;;  %v8813_v29 = vld [vmem:[%s9239_s25 + $0x2f4] sm:$0xf0]  ;;  %v8796_v50 = vld [vmem:[%s9239_s25 + $0x274] sm:$0xf] }
 0x1d9   : > { %v7179_v38 = vor.u32 %v8813_v29, %v7178_v28  ;;  %v8790_v28 = vld [vmem:[%s9239_s25 + $0x244] sm:$0xf]  ;;  %v7092_v29 = vld [vmem:[%s9239_s25 + $0x248] sm:$0xf0] }
 0x1dc   : > { %2543 = vmatpush.bf16.msra.mxu0 %v6967_v44  ;;  %2529 = vmatpush.bf16.msra.mxu3 %v6903_v61  ;;  %v8810_v44 = vld [vmem:[%s9239_s25 + $0x2e4] sm:$0xf]  ;;  %v7119_v61 = vor.u32 %v8796_v50, %v7116_v51  ;;  %v8801_v50 = vld [vmem:[%s9239_s25 + $0x294] sm:$0xf0]  ;;  %v8800_v51 = vld [vmem:[%s9239_s25 + $0x294] sm:$0xf] }
 0x1dd   : > { %v7175_v53 = vor.u32 %v8810_v44, %v7172_v45  ;;  %v8788_v44 = vld [vmem:[%s9239_s25 + $0x234] sm:$0xf]  ;;  %v7084_v45 = vld [vmem:[%s9239_s25 + $0x238] sm:$0xf0] }
 0x21c   : > { %v1743_v13 = vpop.f32.mrf.mxu0 }
 0x222   : > { %v1729_v33 = vpop.f32.mrf.mxu3 }
 0x224   : > { %v1745_v40 = vpop.f32.mrf.mxu0  ;;  %v1837_v62 = vpop.f32.mrf.mxu1 }
 0x225   : > { %v1838_v2 = vadd.f32 %v1837_v62, %v1729_v33  ;;  %v7106_v62 = vld [vmem:[%s9239_s25 + $0x260] sm:$0xf] }
 0x22a   : > { %v1851_v55 = vpop.f32.mrf.mxu2  ;;  %v1731_v56 = vpop.f32.mrf.mxu3 }
 0x22b   : > { %v1852_v59 = vadd.f32 %v1851_v55, %v1743_v13  ;;  %v8809_v55 = vld [vmem:[%s9239_s25 + $0x2d4] sm:$0xf0] }
 0x22c   : > { %v1979_v63 = vpop.f32.mrf.mxu0  ;;  %v1839_v14 = vpop.f32.mrf.mxu1 }
 0x22d   : > { %v1985_v0 = vadd.f32 %v1979_v63, %v1852_v59  ;;  %v1840_v17 = vadd.f32 %v1839_v14, %v1731_v56  ;;  %v7164_v59 = vld [vmem:[%s9239_s25 + $0x2d8] sm:$0xf0]  ;;  %v8792_v14 = vld [vmem:[%s9239_s25 + $0x254] sm:$0xf] }
 0x22f   : > { %v1995_v1 = vadd.f32 %v1991_v60, %v1985_v0  ;;  %v8795_v0 = vld [vmem:[%s9239_s25 + $0x264] sm:$0xf0] }
 0x231   : > { %v1999_v4 = vmax.f32 %v1995_v1, 0.0  ;;  %v8794_v1 = vld [vmem:[%s9239_s25 + $0x264] sm:$0xf] }
 0x232   : > { %v1853_v6 = vpop.f32.mrf.mxu2  ;;  %v1965_v7 = vpop.f32.mrf.mxu3 }
 0x233   : > { %v1854_v8 = vadd.f32 %v1853_v6, %v1745_v40  ;;  %v2008_v9 = vrot.slane %v1999_v4, 7  ;;  %v1984_v10 = vadd.f32 %v1965_v7, %v1838_v2  ;;  %v7170_v40 = vld [vmem:[%s9239_s25 + $0x2e0] sm:$0xf]  ;;  %v7108_v2 = vld [vmem:[%s9239_s25 + $0x268] sm:$0xf0]  ;;  %v7163_v4 = vor.u32 %v8809_v55, %v7162_v54 }
 0x234   : > { %v1981_v11 = vpop.f32.mrf.mxu0  ;;  %v7171_v52 = vor.u32 %v8811_v41, %v7170_v40  ;;  %v7154_v6 = vld [vmem:[%s9239_s25 + $0x2c0] sm:$0xf]  ;;  %v8807_v7 = vld [vmem:[%s9239_s25 + $0x2c4] sm:$0xf0]  ;;  %v7095_v40 = vor.u32 %v8790_v28, %v7092_v29  ;;  %v7082_v41 = vld [vmem:[%s9239_s25 + $0x230] sm:$0xf]  ;;  %v7087_v55 = vor.u32 %v8788_v44, %v7084_v45 }
 0x235   : > { %2020 = vst [vmem:[#allocation4 + $0x10] sm:$0xfe] %v2008_v9  ;;  %v1994_v12 = vadd.f32 %v1990_v5, %v1984_v10  ;;  %v1987_v13 = vadd.f32 %v1981_v11, %v1854_v8  ;;  %v8806_v8 = vld [vmem:[%s9239_s25 + $0x2c4] sm:$0xf]  ;;  %v7107_v10 = vor.u32 %v8795_v0, %v7106_v62  ;;  %v7111_v11 = vor.u32 %v8794_v1, %v7108_v2  ;;  %v7122_v0 = vld [vmem:[%s9239_s25 + $0x280] sm:$0xf] }
 0x236   : > { %v8799_v1 = vld [vmem:[%s9239_s25 + $0x284] sm:$0xf0]  ;;  %v8798_v2 = vld [vmem:[%s9239_s25 + $0x284] sm:$0xf] }
 0x237   : > { %v1998_v15 = vmax.f32 %v1994_v12, 0.0  ;;  %v1997_v16 = vadd.f32 %v1991_v60, %v1987_v13  ;;  %v7115_v60 = vor.u32 %v8797_v48, %v7114_v47  ;;  %v7098_v12 = vld [vmem:[%s9239_s25 + $0x250] sm:$0xf]  ;;  %v8793_v13 = vld [vmem:[%s9239_s25 + $0x254] sm:$0xf0] }
 0x239   : > { %v2007_v18 = vrot.slane %v1998_v15, 7  ;;  %v2001_v19 = vmax.f32 %v1997_v16, 0.0  ;;  %v7100_v15 = vld [vmem:[%s9239_s25 + $0x258] sm:$0xf0]  ;;  %v7155_v16 = vor.u32 %v8807_v7, %v7154_v6 }
 0x23a   : > { %v1967_v20 = vpop.f32.mrf.mxu3 }
 0x23b   : > { %2019 = vst [vmem:[#allocation4 + $0x28] sm:$0xfe] %v2007_v18  ;;  %v2011_v21 = vrot.slane %v2001_v19, 7  ;;  %v1986_v22 = vadd.f32 %v1967_v20, %v1840_v17  ;;  %v8805_v19 = vld [vmem:[%s9239_s25 + $0x2b4] sm:$0xf0] }
 0x23c   : > { %v2064_v23 = vld [vmem:[#allocation4 + $0x10] sm:$0xfe] }
 0x23d   : > { %v9705_v24 = vsel %vm2006_vm6, %v2008_v9, %v2011_v21  ;;  %2024 = vst [vmem:[#allocation4 + $0x20] sm:$0x1] %v2011_v21  ;;  %v1996_v25 = vadd.f32 %v1990_v5, %v1986_v22  ;;  %v7167_v5 = vor.u32 %v8808_v58, %v7164_v59  ;;  %v7156_v9 = vld [vmem:[%s9239_s25 + $0x2c8] sm:$0xf0]  ;;  %v8804_v20 = vld [vmem:[%s9239_s25 + $0x2b4] sm:$0xf]  ;;  %v7099_v22 = vor.u32 %v8793_v13, %v7098_v12 }
 0x23e   : > { %2022 = vst [vmem:[#allocation4] sm:$0xff] %v9705_v24  ;;  %v2068_v26 = vpack.c.bf16 %v9705_v24, %v2064_v23  ;;  %v7159_v17 = vor.u32 %v8806_v8, %v7156_v9  ;;  %v7148_v21 = vld [vmem:[%s9239_s25 + $0x2b8] sm:$0xf0]  ;;  %v7103_v23 = vor.u32 %v8792_v14, %v7100_v15  ;;  %v8786_v59 = vld [vmem:[%s9239_s25 + $0x224] sm:$0xf]  ;;  %v7123_v13 = vor.u32 %v8799_v1, %v7122_v0 }
 0x23f   : > { %v2000_v27 = vmax.f32 %v1996_v25, 0.0  ;;  %v7151_v32 = vor.u32 %v8804_v20, %v7148_v21  ;;  %v7066_v8 = vld [vmem:[%s9239_s25 + $0x210] sm:$0xf]  ;;  %v7068_v12 = vld [vmem:[%s9239_s25 + $0x218] sm:$0xf0] }
 0x240   : > { %v2112_v30 = vshll.u32 %v2068_v26, 16  ;;  %v2110_v34 = vshrl.u32 %v2068_v26, 16  ;;  %v7090_v26 = vld [vmem:[%s9239_s25 + $0x240] sm:$0xf]  ;;  %v8783_v21 = vld [vmem:[%s9239_s25 + $0x204] sm:$0xf0] }
 0x241   : > { %v2009_v33 = vrot.slane %v2000_v27, 7  ;;  %v8791_v27 = vld [vmem:[%s9239_s25 + $0x244] sm:$0xf0]  ;;  %v7058_v20 = vld [vmem:[%s9239_s25 + $0x200] sm:$0xf] }
 0x242   : > { %v2114_v35 = vrot.slane %v2112_v30, 1  ;;  %v2063_v36 = vld [vmem:[#allocation4 + $0x28] sm:$0xfe]  ;;  %v2026_v30 = vld [vmem:[#allocation4 + $0x10] sm:$0xff]  ;;  %v7059_v28 = vor.u32 %v8783_v21, %v7058_v20  ;;  %v8845_v20 = vld [vmem:[%s10393_s3 + $0xf8] sm:$0xff] }
 0x243   : > { %v9714_v37 = vsel %vm2006_vm6, %v2007_v18, %v2009_v33  ;;  %2023 = vst [vmem:[#allocation4 + $0x18] sm:$0x1] %v2009_v33  ;;  %v7146_v18 = vld [vmem:[%s9239_s25 + $0x2b0] sm:$0xf]  ;;  %v7138_v33 = vld [vmem:[%s9239_s25 + $0x2a0] sm:$0xf] }
 0x244   : > { %2021 = vst [vmem:[#allocation4 + $0x8] sm:$0xff] %v9714_v37  ;;  %v2115_v42 = vor.u32 %v2114_v35, %v2110_v34  ;;  %v2067_v46 = vpack.c.bf16 %v9714_v37, %v2063_v36  ;;  %v7147_v31 = vor.u32 %v8805_v19, %v7146_v18  ;;  %v8803_v35 = vld [vmem:[%s9239_s25 + $0x2a4] sm:$0xf0]  ;;  %v8802_v36 = vld [vmem:[%s9239_s25 + $0x2a4] sm:$0xf]  ;;  %vm5851_vm6 = vcmask 40960  }
 0x245   : > { %v2028_v25 = vld [vmem:[#allocation4] sm:$0x7f]  ;;  %v8835_v21 = vld [vmem:[%s10393_s3 + $0xa8] sm:$0xff] }
 0x246   : > { %2300 = vmatmul.bf16.vlgmr.msra.gmra.mxu2 %v2115_v42  ;;  %2328 = vmatmul.bf16.vlgmr.msrb.gmra.mxu0 %v2115_v42  ;;  %v2105_v49 = vshll.u32 %v2067_v46, 16  ;;  %v2103_v56 = vshrl.u32 %v2067_v46, 16  ;;  %v2030_v34 = vpack.c.bf16 %v2028_v25, %v2026_v30  ;;  %v8789_v42 = vld [vmem:[%s9239_s25 + $0x234] sm:$0xf0]  ;;  %v7139_v46 = vor.u32 %v8803_v35, %v7138_v33  ;;  %v2550_v25 = vld [vmem:[#allocation4 + $0x28] sm:$0xfc] }
 0x247   : > { %2780 = vmatpush.bf16.msra.mxu2 %v7179_v38  ;;  %2808 = vmatpush.bf16.msrb.mxu0 %v7183_v39  ;;  %v7140_v38 = vld [vmem:[%s9239_s25 + $0x2a8] sm:$0xf0]  ;;  %v7091_v39 = vor.u32 %v8791_v27, %v7090_v26  ;;  %v7083_v54 = vor.u32 %v8789_v42, %v7082_v41  ;;  %v2556_v30 = vpack.c.bf16 %v9714_v37, %v2550_v25 }
 0x248   : > { %v2107_v57 = vrot.slane %v2105_v49, 1  ;;  %v7143_v47 = vor.u32 %v8802_v36, %v7140_v38  ;;  %v7130_v49 = vld [vmem:[%s9239_s25 + $0x290] sm:$0xf]  ;;  %v8843_v25 = vld [vmem:[%s10393_s3 + $0xe8] sm:$0xff] }
 0x249   : > { %v7131_v62 = vor.u32 %v8801_v50, %v7130_v49 }
 0x24a   : > { %v2108_v63 = vor.u32 %v2107_v57, %v2103_v56  ;;  %v7074_v56 = vld [vmem:[%s9239_s25 + $0x220] sm:$0xf]  ;;  %v8787_v57 = vld [vmem:[%s9239_s25 + $0x224] sm:$0xf0] }
 0x24b   : > { %2781 = vmatpush.bf16.msra.mxu2 %v7171_v52  ;;  %2809 = vmatpush.bf16.msrb.mxu0 %v7175_v53  ;;  %v2027_v48 = vld [vmem:[#allocation4 + $0x8] sm:$0x7f]  ;;  %v7132_v52 = vld [vmem:[%s9239_s25 + $0x298] sm:$0xf0]  ;;  %v7075_v6 = vor.u32 %v8787_v57, %v7074_v56 }
 0x24c   : > { %2286 = vmatmul.bf16.vlgmr.msra.gmra.mxu1 %v2108_v63  ;;  %2314 = vmatmul.bf16.vlgmr.msrb.gmra.mxu3 %v2108_v63  ;;  %v2025_v53 = vld [vmem:[#allocation4 + $0x28] sm:$0xff]  ;;  %v7135_v63 = vor.u32 %v8800_v51, %v7132_v52 }
 0x24d   : > { %2766 = vmatpush.bf16.msra.mxu1 %v7115_v60  ;;  %2794 = vmatpush.bf16.msrb.mxu3 %v7119_v61  ;;  %v2029_v58 = vpack.c.bf16 %v2027_v48, %v2025_v53  ;;  %v7076_v60 = vld [vmem:[%s9239_s25 + $0x228] sm:$0xf0]  ;;  %v2555_v61 = vld [vmem:[#allocation4 + $0x20] sm:$0x1]  ;;  %v8821_v53 = vld [vmem:[%s10393_s3 + $0x38] sm:$0xff] }
 0x24e   : > { %v7079_v7 = vor.u32 %v8786_v59, %v7076_v60  ;;  %v2559_v9 = vpack.c.bf16 %v2555_v61, %v2555_v61 }
 0x24f   : > { %2782 = vmatpush.bf16.msra.mxu2 %v7163_v4  ;;  %2810 = vmatpush.bf16.msrb.mxu0 %v7167_v5  ;;  %v7124_v4 = vld [vmem:[%s9239_s25 + $0x288] sm:$0xf0]  ;;  %v2551_v5 = vld [vmem:[#allocation4 + $0x10] sm:$0xfc] }
 0x250   : > { %v7127_v14 = vor.u32 %v8798_v2, %v7124_v4  ;;  %v2557_v15 = vpack.c.bf16 %v9705_v24, %v2551_v5  ;;  %v2602_v19 = vrot.slane %v2559_v9, 1 }
 0x251   : > { %2767 = vmatpush.bf16.msra.mxu1 %v7107_v10  ;;  %2795 = vmatpush.bf16.msrb.mxu3 %v7111_v11  ;;  %v8785_v10 = vld [vmem:[%s9239_s25 + $0x214] sm:$0xf0]  ;;  %v8784_v11 = vld [vmem:[%s9239_s25 + $0x214] sm:$0xf] }
 0x252   : > { %v7071_v18 = vor.u32 %v8784_v11, %v7068_v12  ;;  %v2601_v26 = vrot.slane %v2557_v15, 1 }
 0x253   : > { %2783 = vmatpush.bf16.msra.mxu2 %v7155_v16  ;;  %2811 = vmatpush.bf16.msrb.mxu0 %v7159_v17  ;;  %v2554_v16 = vld [vmem:[#allocation4 + $0x18] sm:$0x1]  ;;  %v7067_v17 = vor.u32 %v8785_v10, %v7066_v8 }
 0x254   : > { %v2558_v27 = vpack.c.bf16 %v2554_v16, %v2554_v16  ;;  %v2603_v24 = vsel %vm1570_vm2, %v2601_v26, %v2602_v19  ;;  %v8837_v10 = vld [vmem:[%s10393_s3 + $0xb8] sm:$0xff] }
 0x255   : > { %2768 = vmatpush.bf16.msra.mxu1 %v7099_v22  ;;  %2796 = vmatpush.bf16.msrb.mxu3 %v7103_v23  ;;  %v8782_v22 = vld [vmem:[%s9239_s25 + $0x204] sm:$0xf]  ;;  %v7060_v23 = vld [vmem:[%s9239_s25 + $0x208] sm:$0xf0]  ;;  %v8833_v26 = vld [vmem:[%s10393_s3 + $0x98] sm:$0xff] }
 0x256   : > { %2516 = vmatmul.bf16.vlgmr.msrb.gmra.mxu2 %v2030_v34  ;;  %2544 = vmatmul.bf16.vlgmr.msra.gmra.mxu0 %v2030_v34  ;;  %v7063_v29 = vor.u32 %v8782_v22, %v7060_v23  ;;  %v8844_v22 = vld [vmem:[%s10393_s3 + $0xf0] sm:$0xff]  ;;  %v8834_v23 = vld [vmem:[%s10393_s3 + $0xa0] sm:$0xff] }
 0x257   : > { %2784 = vmatpush.bf16.msra.mxu2 %v7147_v31  ;;  %2812 = vmatpush.bf16.msrb.mxu0 %v7151_v32  ;;  %v2599_v31 = vrot.slane %v2558_v27, 1  ;;  %v2598_v32 = vrot.slane %v2556_v30, 1  ;;  %v8832_v27 = vld [vmem:[%s10393_s3 + $0x90] sm:$0xff]  ;;  %v8842_v30 = vld [vmem:[%s10393_s3 + $0xe0] sm:$0xff] }
 0x259   : > { %2769 = vmatpush.bf16.msra.mxu1 %v7091_v39  ;;  %2797 = vmatpush.bf16.msrb.mxu3 %v7095_v40  ;;  %v2600_v33 = vsel %vm1570_vm2, %v2598_v32, %v2599_v31  ;;  %v8819_v31 = vld [vmem:[%s10393_s3 + $0x28] sm:$0xff] }
 0x25a   : > { %v8827_v32 = vld [vmem:[%s10393_s3 + $0x68] sm:$0xff] }
 0x25b   : > { %2785 = vmatpush.bf16.msra.mxu2 %v7139_v46  ;;  %2813 = vmatpush.bf16.msrb.mxu0 %v7143_v47 }
 0x25c   : > { %2502 = vmatmul.bf16.vlgmr.msrb.gmra.mxu1 %v2029_v58  ;;  %2530 = vmatmul.bf16.vlgmr.msra.gmra.mxu3 %v2029_v58 }
 0x25d   : > { %2770 = vmatpush.bf16.msra.mxu1 %v7083_v54  ;;  %2798 = vmatpush.bf16.msrb.mxu3 %v7087_v55  ;;  %v8829_v54 = vld [vmem:[%s10393_s3 + $0x78] sm:$0xff] }
 0x25f   : > { %2786 = vmatpush.bf16.msra.mxu2 %v7131_v62  ;;  %2814 = vmatpush.bf16.msrb.mxu0 %v7135_v63 }
 0x261   : > { %2771 = vmatpush.bf16.msra.mxu1 %v7075_v6  ;;  %2799 = vmatpush.bf16.msrb.mxu3 %v7079_v7 }
 0x263   : > { %2787 = vmatpush.bf16.msra.mxu2 %v7123_v13  ;;  %2815 = vmatpush.bf16.msrb.mxu0 %v7127_v14 }
 0x265   : > { %2772 = vmatpush.bf16.msra.mxu1 %v7067_v17  ;;  %2800 = vmatpush.bf16.msrb.mxu3 %v7071_v18  ;;  %v8836_v18 = vld [vmem:[%s10393_s3 + $0xb0] sm:$0xff] }
 0x266   : > { %2788 = vmatmul.bf16.vlgmr.msra.gmra.mxu2 %v2603_v24  ;;  %2816 = vmatmul.bf16.vlgmr.msrb.gmra.mxu0 %v2603_v24  ;;  %v8828_v24 = vld [vmem:[%s10393_s3 + $0x70] sm:$0xff] }
 0x267   : > { %3213 = vmatpush.bf16.msra.mxu0 %v8829_v54 }
 0x269   : > { %2773 = vmatpush.bf16.msra.mxu1 %v7059_v28  ;;  %2801 = vmatpush.bf16.msrb.mxu3 %v7063_v29  ;;  %v8820_v28 = vld [vmem:[%s10393_s3 + $0x30] sm:$0xff]  ;;  %v8831_v29 = vld [vmem:[%s10393_s3 + $0x88] sm:$0xff] }
 0x26b   : > { %3214 = vmatpush.bf16.msra.mxu0 %v8828_v24 }
 0x26c   : > { %2774 = vmatmul.bf16.vlgmr.msra.gmra.mxu1 %v2600_v33  ;;  %2802 = vmatmul.bf16.vlgmr.msrb.gmra.mxu3 %v2600_v33  ;;  %v8830_v33 = vld [vmem:[%s10393_s3 + $0x80] sm:$0xff] }
 0x26d   : > { %3200 = vmatpush.bf16.msra.mxu3 %v8821_v53  ;;  %v8860_v53 = vld [vmem:[%s10393_s3 + $0x170] sm:$0xff] }
 0x26f   : > { %3215 = vmatpush.bf16.msra.mxu0 %v8827_v32 }
 0x271   : > { %3201 = vmatpush.bf16.msra.mxu3 %v8820_v28 }
 0x275   : > { %3202 = vmatpush.bf16.msra.mxu3 %v8819_v31 }
 0x2c3   : > { %v2329_v34 = vpop.f32.mrf.mxu0 }
 0x2c9   : > { %v2287_v35 = vpop.f32.mrf.mxu1  ;;  %v2301_v36 = vpop.f32.mrf.mxu2 }
 0x2ca   : > { %v2302_v57 = vadd.f32 %v2301_v36, %v2287_v35  ;;  %v8853_v35 = vld [vmem:[%s10393_s3 + $0x138] sm:$0xff]  ;;  %v8818_v36 = vld [vmem:[%s10393_s3 + $0x20] sm:$0xff] }
 0x2cb   : > { %v2331_v38 = vpop.f32.mrf.mxu0  ;;  %3203 = vmatpush.bf16.msra.mxu3 %v8818_v36 }
 0x2cf   : > { %v2315_v39 = vpop.f32.mrf.mxu3 }
 0x2d0   : > { %v2330_v4 = vadd.f32 %v2329_v34, %v2315_v39  ;;  %v8841_v34 = vld [vmem:[%s10393_s3 + $0xd8] sm:$0xff]  ;;  %v8840_v39 = vld [vmem:[%s10393_s3 + $0xd0] sm:$0xff] }
 0x2d1   : > { %v2289_v40 = vpop.f32.mrf.mxu1  ;;  %v2303_v41 = vpop.f32.mrf.mxu2 }
 0x2d2   : > { %v2304_v55 = vadd.f32 %v2303_v41, %v2289_v40  ;;  %v8817_v40 = vld [vmem:[%s10393_s3 + $0x18] sm:$0xff]  ;;  %v8852_v41 = vld [vmem:[%s10393_s3 + $0x130] sm:$0xff] }
 0x2d3   : > { %v2545_v42 = vpop.f32.mrf.mxu0  ;;  %3204 = vmatpush.bf16.msra.mxu3 %v8817_v40 }
 0x2d7   : > { %v2317_v37 = vpop.f32.mrf.mxu3 }
 0x2d8   : > { %v2332_v63 = vadd.f32 %v2331_v38, %v2317_v37  ;;  %v8826_v38 = vld [vmem:[%s10393_s3 + $0x60] sm:$0xff]  ;;  %v8825_v37 = vld [vmem:[%s10393_s3 + $0x58] sm:$0xff] }
 0x2d9   : > { %v2503_v44 = vpop.f32.mrf.mxu1  ;;  %v2517_v45 = vpop.f32.mrf.mxu2  ;;  %3216 = vmatpush.bf16.msra.mxu0 %v8826_v38 }
 0x2da   : > { %v2504_v60 = vadd.f32 %v2503_v44, %v2302_v57  ;;  %v8816_v44 = vld [vmem:[%s10393_s3 + $0x10] sm:$0xff]  ;;  %v8822_v57 = vld [vmem:[%s10393_s3 + $0x40] sm:$0xff] }
 0x2db   : > { %v2547_v49 = vpop.f32.mrf.mxu0  ;;  %3205 = vmatpush.bf16.msra.mxu3 %v8816_v44  ;;  %v8877_v44 = vld [vmem:[%s9259_s14 + $0x78] sm:$0xff] }
 0x2dc   : > { %v2518_v5 = vadd.f32 %v2517_v45, %v2504_v60  ;;  %v8851_v45 = vld [vmem:[%s10393_s3 + $0x128] sm:$0xff] }
 0x2dd   : > { %3217 = vmatpush.bf16.msra.mxu0 %v8825_v37 }
 0x2df   : > { %v2531_v46 = vpop.f32.mrf.mxu3 }
 0x2e0   : > { %v2532_v8 = vadd.f32 %v2531_v46, %v2330_v4  ;;  %v8824_v46 = vld [vmem:[%s10393_s3 + $0x50] sm:$0xff] }
 0x2e1   : > { %v2505_v47 = vpop.f32.mrf.mxu1  ;;  %v2519_v48 = vpop.f32.mrf.mxu2  ;;  %3218 = vmatpush.bf16.msra.mxu0 %v8824_v46  ;;  %v8876_v46 = vld [vmem:[%s9259_s14 + $0x70] sm:$0xff] }
 0x2e2   : > { %v2506_v58 = vadd.f32 %v2505_v47, %v2304_v55  ;;  %v2546_v16 = vadd.f32 %v2545_v42, %v2532_v8  ;;  %v8839_v42 = vld [vmem:[%s10393_s3 + $0xc8] sm:$0xff]  ;;  %v8838_v47 = vld [vmem:[%s10393_s3 + $0xc0] sm:$0xff] }
 0x2e3   : > { %v2817_v56 = vpop.f32.mrf.mxu0  ;;  %v8814_v55 = vld [vmem:[%s10393_s3] sm:$0xff] }
 0x2e4   : > { %v2520_v0 = vadd.f32 %v2519_v48, %v2506_v58  ;;  %v8861_v48 = vld [vmem:[%s10393_s3 + $0x178] sm:$0xff] }
 0x2e7   : > { %v2533_v50 = vpop.f32.mrf.mxu3 }
 0x2e8   : > { %v2534_v6 = vadd.f32 %v2533_v50, %v2332_v63  ;;  %v8850_v50 = vld [vmem:[%s10393_s3 + $0x120] sm:$0xff] }
 0x2e9   : > { %v2775_v51 = vpop.f32.mrf.mxu1  ;;  %v2789_v52 = vpop.f32.mrf.mxu2  ;;  %v8858_v63 = vld [vmem:[%s10393_s3 + $0x160] sm:$0xff] }
 0x2ea   : > { %v2790_v1 = vadd.f32 %v2789_v52, %v2775_v51  ;;  %v2548_v13 = vadd.f32 %v2547_v49, %v2534_v6  ;;  %v8815_v49 = vld [vmem:[%s10393_s3 + $0x8] sm:$0xff]  ;;  %v2826_v51 = vld [vmem:[%s9244_s29] sm:$0x3] }
 0x2eb   : > { %v2819_v11 = vpop.f32.mrf.mxu0  ;;  %v8823_v52 = vld [vmem:[%s10393_s3 + $0x48] sm:$0xff]  ;;  %v2828_v54 = vperm.slane %v2826_v51, 0  ;;  %3206 = vmatpush.bf16.msra.mxu3 %v8815_v49  ;;  %v2829_v4 = vperm.slane %v2826_v51, 1 }
 0x2ec   : > { %v2822_v9 = vadd.f32 %v2790_v1, %v2518_v5  ;;  %3219 = vmatpush.bf16.msra.mxu0 %v8823_v52  ;;  %v8847_v1 = vld [vmem:[%s10393_s3 + $0x108] sm:$0xff]  ;;  %v8846_v5 = vld [vmem:[%s10393_s3 + $0x100] sm:$0xff] }
 0x2ed   : > { %v8883_v49 = vld [vmem:[%s9259_s14 + $0xa8] sm:$0xff]  ;;  %v8882_v52 = vld [vmem:[%s9259_s14 + $0xa0] sm:$0xff] }
 0x2ef   : > { %v2803_v59 = vpop.f32.mrf.mxu3  ;;  %3207 = vmatpush.bf16.msra.mxu3 %v8814_v55  ;;  %v8881_v55 = vld [vmem:[%s9259_s14 + $0x98] sm:$0xff] }
 0x2f0   : > { %v2818_v14 = vadd.f32 %v2817_v56, %v2803_v59  ;;  %v8849_v56 = vld [vmem:[%s10393_s3 + $0x118] sm:$0xff]  ;;  %v8859_v59 = vld [vmem:[%s10393_s3 + $0x168] sm:$0xff]  ;;  %3220 = vmatpush.bf16.msra.mxu0 %v8822_v57 }
 0x2f1   : > { %v2777_v61 = vpop.f32.mrf.mxu1  ;;  %v2791_v62 = vpop.f32.mrf.mxu2 }
 0x2f2   : > { %v2792_v2 = vadd.f32 %v2791_v62, %v2777_v61  ;;  %v2823_v19 = vadd.f32 %v2818_v14, %v2546_v16  ;;  %v8848_v61 = vld [vmem:[%s10393_s3 + $0x110] sm:$0xff]  ;;  %v8855_v14 = vld [vmem:[%s10393_s3 + $0x148] sm:$0xff] }
 0x2f4   : > { %v2824_v7 = vadd.f32 %v2792_v2, %v2520_v0  ;;  %v8857_v2 = vld [vmem:[%s10393_s3 + $0x158] sm:$0xff]  ;;  %3511 = vmatpush.bf16.msrb.mxu0 %v8877_v44 }
 0x2f6   : > { %7184 = vmatpush.msk.msrb.mxu1 %vm1570_vm2, %v2824_v7  ;;  %v8856_v7 = vld [vmem:[%s10393_s3 + $0x150] sm:$0xff] }
 0x2f7   : > { %v2805_v12 = vpop.f32.mrf.mxu3 }
 0x2f8   : > { %v2820_v15 = vadd.f32 %v2819_v11, %v2805_v12  ;;  %2856 = vmatpush.msrb.mxu1 %v2822_v9  ;;  %3512 = vmatpush.bf16.msrb.mxu0 %v8876_v46 }
 0x2f9   : > { %7185 = vmatmul.msk.f32.vlgmr.msrb.gmra.mxu1 %vm2832_vm7, %v9494_v43 }
 0x2fa   : > { %v2825_v17 = vadd.f32 %v2820_v15, %v2548_v13  ;;  %3078 = vmatpush.bf16.msra.mxu1 %v8837_v10 }
 0x2fc   : > { %7186 = vmatpush.msk.msrb.mxu2 %vm1570_vm2, %v2825_v17 }
 0x2fe   : > { %2876 = vmatpush.msrb.mxu2 %v2823_v19  ;;  %3079 = vmatpush.bf16.msra.mxu1 %v8836_v18  ;;  %v8854_v19 = vld [vmem:[%s10393_s3 + $0x140] sm:$0xff]  ;;  %s10410_s3 = sld [smem:[#allocation23_spill]] }
 0x2ff   : > { %7187 = vmatmul.msk.f32.vlgmr.msrb.gmra.mxu2 %vm2832_vm7, %v9494_v43  ;;  %vm5742_vm7 = vcmask 123904  }
 0x300   : > { %3091 = vmatpush.bf16.msra.mxu2 %v8845_v20 }
 0x302   : > { %3080 = vmatpush.bf16.msra.mxu1 %v8835_v21 }
 0x304   : > { %3092 = vmatpush.bf16.msra.mxu2 %v8844_v22 }
 0x306   : > { %3081 = vmatpush.bf16.msra.mxu1 %v8834_v23 }
 0x308   : > { %3093 = vmatpush.bf16.msra.mxu2 %v8843_v25 }
 0x30a   : > { %3082 = vmatpush.bf16.msra.mxu1 %v8833_v26 }
 0x30c   : > { %3094 = vmatpush.bf16.msra.mxu2 %v8842_v30 }
 0x30e   : > { %3083 = vmatpush.bf16.msra.mxu1 %v8832_v27 }
 0x310   : > { %3095 = vmatpush.bf16.msra.mxu2 %v8841_v34 }
 0x312   : > { %3084 = vmatpush.bf16.msra.mxu1 %v8831_v29 }
 0x314   : > { %3096 = vmatpush.bf16.msra.mxu2 %v8840_v39 }
 0x316   : > { %3085 = vmatpush.bf16.msra.mxu1 %v8830_v33 }
 0x318   : > { %3097 = vmatpush.bf16.msra.mxu2 %v8839_v42  ;;  %v8885_v42 = vld [vmem:[%s9259_s14 + $0xb8] sm:$0xff] }
 0x31a   : > { %3367 = vmatpush.bf16.msrb.mxu1 %v8853_v35 }
 0x31c   : > { %3098 = vmatpush.bf16.msra.mxu2 %v8838_v47 }
 0x31e   : > { %3368 = vmatpush.bf16.msrb.mxu1 %v8852_v41 }
 0x320   : > { %3380 = vmatpush.bf16.msrb.mxu2 %v8861_v48 }
 0x322   : > { %3369 = vmatpush.bf16.msrb.mxu1 %v8851_v45  ;;  %v8884_v45 = vld [vmem:[%s9259_s14 + $0xb0] sm:$0xff] }
 0x324   : > { %3381 = vmatpush.bf16.msrb.mxu2 %v8860_v53  ;;  %v8874_v53 = vld [vmem:[%s9259_s14 + $0x60] sm:$0xff] }
 0x326   : > { %3370 = vmatpush.bf16.msrb.mxu1 %v8850_v50  ;;  %v8875_v50 = vld [vmem:[%s9259_s14 + $0x68] sm:$0xff] }
 0x327   : > { %3513 = vmatpush.bf16.msrb.mxu0 %v8875_v50 }
 0x328   : > { %3382 = vmatpush.bf16.msrb.mxu2 %v8859_v59 }
 0x32a   : > { %3371 = vmatpush.bf16.msrb.mxu1 %v8849_v56 }
 0x32b   : > { %3514 = vmatpush.bf16.msrb.mxu0 %v8874_v53  ;;  %v7722_v53 = vld [vmem:[%s9289_s20 + $0x118] sm:$0xf0] }
 0x32c   : > { %3383 = vmatpush.bf16.msrb.mxu2 %v8858_v63  ;;  %v8869_v63 = vld [vmem:[%s9259_s14 + $0x38] sm:$0xff] }
 0x32e   : > { %3372 = vmatpush.bf16.msrb.mxu1 %v8848_v61 }
 0x330   : > { %3384 = vmatpush.bf16.msrb.mxu2 %v8857_v2  ;;  %v8867_v2 = vld [vmem:[%s9259_s14 + $0x28] sm:$0xff] }
 0x332   : > { %3373 = vmatpush.bf16.msrb.mxu1 %v8847_v1 }
 0x334   : > { %3385 = vmatpush.bf16.msrb.mxu2 %v8856_v7  ;;  %v8880_v7 = vld [vmem:[%s9259_s14 + $0x90] sm:$0xff] }
 0x336   : > { %3374 = vmatpush.bf16.msrb.mxu1 %v8846_v5  ;;  %v8873_v5 = vld [vmem:[%s9259_s14 + $0x58] sm:$0xff] }
 0x337   : > { %3515 = vmatpush.bf16.msrb.mxu0 %v8873_v5  ;;  %v8916_v5 = vld [vmem:[%s9289_s20 + $0x64] sm:$0xf] }
 0x338   : > { %3386 = vmatpush.bf16.msrb.mxu2 %v8855_v14  ;;  %v8899_v14 = vld [vmem:[%s9279_s6 + $0x8] sm:$0xff] }
 0x33c   : > { %3387 = vmatpush.bf16.msrb.mxu2 %v8854_v19 }
 0x376   : > { %v2858_v58 = vpop.f32.mrf.mxu1 }
 0x377   : > { %v2859_v60 = vadd.f32 %v2858_v58, %v2828_v54 }
 0x379   : > { %v2881_v62 = vmax.f32 %v2859_v60, 0.0 }
 0x37b   : > { %v2885_v0 = vrot.slane %v2881_v62, 7 }
 0x37d   : > { %2889 = vst [vmem:[#allocation5] sm:$0xfe] %v2885_v0 }
 0x37e   : > { %2891 = vst [vmem:[#allocation5 + $0x10] sm:$0x1] %v2885_v0  ;;  %v8868_v0 = vld [vmem:[%s9259_s14 + $0x30] sm:$0xff] }
 0x382   : > { %v2878_v6 = vpop.f32.mrf.mxu2 }
 0x383   : > { %v2879_v8 = vadd.f32 %v2878_v6, %v2829_v4  ;;  %v8866_v4 = vld [vmem:[%s9259_s14 + $0x20] sm:$0xff]  ;;  %v8865_v6 = vld [vmem:[%s9259_s14 + $0x18] sm:$0xff] }
 0x384   : > { %v2929_v9 = vld [vmem:[#allocation5] sm:$0xfe] }
 0x385   : > { %v2893_v10 = vld [vmem:[#allocation5] sm:$0x7f]  ;;  %v2882_v11 = vmax.f32 %v2879_v8, 0.0  ;;  %v2931_v12 = vpack.c.bf16 %v2929_v9, %v2929_v9  ;;  %v3228_v28 = vld [vmem:[#allocation5 + $0x10] sm:$0x1] }
 0x386   : > { %v2895_v13 = vpack.c.bf16 %v2893_v10, %v2893_v10  ;;  %v3226_v27 = vld [vmem:[#allocation5] sm:$0xfc]  ;;  %v8879_v10 = vld [vmem:[%s9259_s14 + $0x88] sm:$0xff] }
 0x387   : > { %v2886_v15 = vrot.slane %v2882_v11, 7  ;;  %v2967_v16 = vshrl.u32 %v2931_v12, 16  ;;  %v2969_v17 = vshll.u32 %v2931_v12, 16  ;;  %v3230_v31 = vpack.c.bf16 %v3228_v28, %v3226_v27  ;;  %v8872_v8 = vld [vmem:[%s9259_s14 + $0x50] sm:$0xff]  ;;  %v8871_v11 = vld [vmem:[%s9259_s14 + $0x48] sm:$0xff] }
 0x388   : > { %3208 = vmatmul.bf16.vlgmr.msra.gmra.mxu3 %v2895_v13  ;;  %v8864_v9 = vld [vmem:[%s9259_s14 + $0x10] sm:$0xff]  ;;  %3516 = vmatpush.bf16.msrb.mxu0 %v8872_v8  ;;  %v8863_v12 = vld [vmem:[%s9259_s14 + $0x8] sm:$0xff]  ;;  %v8878_v13 = vld [vmem:[%s9259_s14 + $0x80] sm:$0xff] }
 0x389   : > { %2890 = vst [vmem:[#allocation5 + $0x8] sm:$0xfe] %v2886_v15  ;;  %v2971_v18 = vrot.slane %v2969_v17, 1  ;;  %v3267_v32 = vrot.slane %v3230_v31, 1  ;;  %v8898_v17 = vld [vmem:[%s9279_s6] sm:$0xff] }
 0x38a   : > { %2892 = vst [vmem:[#allocation5 + $0x18] sm:$0x1] %v2886_v15  ;;  %v8870_v15 = vld [vmem:[%s9259_s14 + $0x40] sm:$0xff] }
 0x38b   : > { %v2972_v20 = vor.u32 %v2971_v18, %v2967_v16  ;;  %v8862_v16 = vld [vmem:[%s9259_s14] sm:$0xff] }
 0x38c   : > { %3517 = vmatpush.bf16.msrb.mxu0 %v8871_v11  ;;  %v9149_v18 = vld [vmem:[%s9254_s8] ss:$0 sm:$0xff]  ;;  %v8948_v31 = vld [vmem:[%s9289_s20 + $0x164] sm:$0xf]  ;;  %v7882_v11 = vld [vmem:[%s9289_s20 + $0x58] sm:$0xf0] }
 0x38d   : > { %3086 = vmatmul.bf16.vlgmr.msra.gmra.mxu1 %v2972_v20 }
 0x38e   : > { %3652 = vmatpush.bf16.msra.mxu1 %v8885_v42  ;;  %v7738_v42 = vld [vmem:[%s9289_s20 + $0x138] sm:$0xf0] }
 0x390   : > { %v2894_v21 = vld [vmem:[#allocation5 + $0x8] sm:$0x7f]  ;;  %3518 = vmatpush.bf16.msrb.mxu0 %v8870_v15 }
 0x391   : > { %v2930_v22 = vld [vmem:[#allocation5 + $0x8] sm:$0xfe]  ;;  %v2896_v23 = vpack.c.bf16 %v2894_v21, %v2894_v21  ;;  %v3229_v34 = vld [vmem:[#allocation5 + $0x18] sm:$0x1] }
 0x392   : > { %v2932_v25 = vpack.c.bf16 %v2930_v22, %v2930_v22  ;;  %v3227_v33 = vld [vmem:[#allocation5 + $0x8] sm:$0xfc]  ;;  %3653 = vmatpush.bf16.msra.mxu1 %v8884_v45  ;;  %v8950_v22 = vld [vmem:[%s9289_s20 + $0x174] sm:$0xf]  ;;  %v9878_v45 = vld [vmem:[#allocation4 + $0x8] sm:$0xff] }
 0x393   : > { %3221 = vmatmul.bf16.vlgmr.msra.gmra.mxu0 %v2896_v23  ;;  %v3231_v35 = vpack.c.bf16 %v3229_v34, %v3227_v33  ;;  %v7770_v23 = vld [vmem:[%s9289_s20 + $0x178] sm:$0xf0]  ;;  %v8946_v34 = vld [vmem:[%s9289_s20 + $0x154] sm:$0xf] }
 0x394   : > { %v2976_v26 = vshll.u32 %v2932_v25, 16  ;;  %v2974_v24 = vshrl.u32 %v2932_v25, 16 }
 0x395   : > { %v3268_v36 = vrot.slane %v3231_v35, 1  ;;  %v7754_v35 = vld [vmem:[%s9289_s20 + $0x158] sm:$0xf0] }
 0x396   : > { %v2978_v29 = vrot.slane %v2976_v26, 1  ;;  %3654 = vmatpush.bf16.msra.mxu1 %v8883_v49  ;;  %v4007_v49 = vld [vmem:[#allocation4 + $0x28] sm:$0xfe] }
 0x397   : > { %v4011_v50 = vpack.c.bf16 %v9878_v45, %v4007_v49 }
 0x398   : > { %v2979_v30 = vor.u32 %v2978_v29, %v2974_v24 }
 0x39a   : > { %3099 = vmatmul.bf16.vlgmr.msra.gmra.mxu2 %v2979_v30  ;;  %3655 = vmatpush.bf16.msra.mxu1 %v8882_v52  ;;  %v7773_v30 = vor.u32 %v8950_v22, %v7770_v23  ;;  %v8938_v52 = vld [vmem:[%s9289_s20 + $0x114] sm:$0xf]  ;;  %v7850_v23 = vld [vmem:[%s9289_s20 + $0x18] sm:$0xf0] }
 0x39b   : > { %v8906_v22 = vld [vmem:[%s9289_s20 + $0x14] sm:$0xf] }
 0x39d   : > { %3375 = vmatmul.bf16.vlgmr.msrb.gmra.mxu1 %v3267_v32  ;;  %v7762_v32 = vld [vmem:[%s9289_s20 + $0x168] sm:$0xf0] }
 0x39e   : > { %3656 = vmatpush.bf16.msra.mxu1 %v8881_v55  ;;  %v7765_v33 = vor.u32 %v8948_v31, %v7762_v32  ;;  %v4052_v55 = vshll.u32 %v4011_v50, 16  ;;  %v8980_v31 = vld [vmem:[%s9289_s20 + $0x264] sm:$0xf]  ;;  %v8050_v32 = vld [vmem:[%s9289_s20 + $0x268] sm:$0xf0] }
 0x3a2   : > { %3657 = vmatpush.bf16.msra.mxu1 %v8880_v7 }
 0x3a6   : > { %3658 = vmatpush.bf16.msra.mxu1 %v8879_v10  ;;  %v8914_v10 = vld [vmem:[%s9289_s20 + $0x54] sm:$0xf] }
 0x3aa   : > { %3388 = vmatmul.bf16.vlgmr.msrb.gmra.mxu2 %v3268_v36  ;;  %3659 = vmatpush.bf16.msra.mxu1 %v8878_v13  ;;  %v7757_v36 = vor.u32 %v8946_v34, %v7754_v35  ;;  %v8912_v13 = vld [vmem:[%s9289_s20 + $0x44] sm:$0xf]  ;;  %v8053_v35 = vor.u32 %v8980_v31, %v8050_v32  ;;  %v8903_v32 = vld [vmem:[%s9279_s6 + $0x28] sm:$0xff] }
 0x3ae   : > { %3922 = vmatpush.bf16.msrb.mxu1 %v8899_v14  ;;  %v7874_v14 = vld [vmem:[%s9289_s20 + $0x48] sm:$0xf0] }
 0x3af   : > { %v7877_v15 = vor.u32 %v8912_v13, %v7874_v14 }
 0x3b2   : > { %3923 = vmatpush.bf16.msrb.mxu1 %v8898_v17  ;;  %v7866_v17 = vld [vmem:[%s9289_s20 + $0x38] sm:$0xf0] }
 0x40a   : > { %v3087_v38 = vpop.f32.mrf.mxu1 }
 0x40b   : > { %v3209_v39 = vpop.f32.mrf.mxu3 }
 0x410   : > { %v3222_v40 = vpop.f32.mrf.mxu0 }
 0x412   : > { %v3089_v41 = vpop.f32.mrf.mxu1 }
 0x413   : > { %v3211_v37 = vpop.f32.mrf.mxu3  ;;  %v3859_v41 = vld [vmem:[#allocation8] sm:$0x1] }
 0x414   : > { %v8942_v37 = vld [vmem:[%s9289_s20 + $0x134] sm:$0xf]  ;;  %v3860_v44 = vpack.c.bf16 %v3859_v41, %v3859_v41  ;;  %v8034_v41 = vld [vmem:[%s9289_s20 + $0x248] sm:$0xf0] }
 0x415   : > { %v7741_v46 = vor.u32 %v8942_v37, %v7738_v42  ;;  %v8974_v42 = vld [vmem:[%s9289_s20 + $0x234] sm:$0xf] }
 0x418   : > { %v3224_v47 = vpop.f32.mrf.mxu0 }
 0x419   : > { %v8940_v47 = vld [vmem:[%s9289_s20 + $0x124] sm:$0xf] }
 0x41a   : > { %v3376_v48 = vpop.f32.mrf.mxu1 }
 0x41d   : > { %v3100_v51 = vpop.f32.mrf.mxu2 }
 0x41e   : > { %v3101_v57 = vadd.f32 %v3100_v51, %v3087_v38  ;;  %v8944_v38 = vld [vmem:[%s9289_s20 + $0x144] sm:$0xf] }
 0x420   : > { %v3210_v58 = vadd.f32 %v3209_v39, %v3101_v57  ;;  %v7746_v39 = vld [vmem:[%s9289_s20 + $0x148] sm:$0xf0] }
 0x422   : > { %v3378_v54 = vpop.f32.mrf.mxu1  ;;  %v3223_v60 = vadd.f32 %v3222_v40, %v3210_v58  ;;  %v7749_v40 = vor.u32 %v8944_v38, %v7746_v39  ;;  %v8936_v58 = vld [vmem:[%s9289_s20 + $0x104] sm:$0xf]  ;;  %v8042_v38 = vld [vmem:[%s9289_s20 + $0x258] sm:$0xf0] }
 0x423   : > { %v4009_v54 = vld [vmem:[#allocation4 + $0x18] sm:$0x1] }
 0x424   : > { %v4013_v57 = vpack.c.bf16 %v4009_v54, %v4009_v54  ;;  %v8968_v54 = vld [vmem:[%s9289_s20 + $0x204] sm:$0xf] }
 0x425   : > { %v3102_v56 = vpop.f32.mrf.mxu2 }
 0x426   : > { %v7725_v56 = vor.u32 %v8938_v52, %v7722_v53  ;;  %v4509_v52 = vld [vmem:[#allocation4 + $0x18] sm:$0x3] }
 0x42d   : > { %v3389_v59 = vpop.f32.mrf.mxu2 }
 0x42e   : > { %v3390_v61 = vadd.f32 %v3389_v59, %v3376_v48  ;;  %v7730_v48 = vld [vmem:[%s9289_s20 + $0x128] sm:$0xf0] }
 0x42f   : > { %v7733_v51 = vor.u32 %v8940_v47, %v7730_v48  ;;  %v7714_v59 = vld [vmem:[%s9289_s20 + $0x108] sm:$0xf0]  ;;  %v8972_v47 = vld [vmem:[%s9289_s20 + $0x224] sm:$0xf] }
 0x430   : > { %v3393_v62 = vadd.f32 %v3390_v61, %v3223_v60  ;;  %v8918_v60 = vld [vmem:[%s9289_s20 + $0x74] sm:$0xf]  ;;  %v7898_v61 = vld [vmem:[%s9289_s20 + $0x78] sm:$0xf0]  ;;  %v8018_v48 = vld [vmem:[%s9289_s20 + $0x228] sm:$0xf0] }
 0x431   : > { %v8021_v49 = vor.u32 %v8972_v47, %v8018_v48  ;;  %v8960_v48 = vld [vmem:[%s9289_s20 + $0x1c4] sm:$0xf] }
 0x432   : > { %7444 = vmatpush.msk.msrb.mxu3 %vm1570_vm2, %v3393_v62  ;;  %v4054_v62 = vrot.slane %v4052_v55, 1  ;;  %v8002_v55 = vld [vmem:[%s9289_s20 + $0x208] sm:$0xf0] }
 0x433   : > { %7445 = vmatmul.msk.f32.vlgmr.msrb.gmra.mxu3 %vm3398_vm8, %v9494_v43  ;;  %vm5857_vm8 = vcmask 57344  }
 0x434   : > { %3572 = vmatpush.bf16.msra.mxu3 %v8869_v63  ;;  %v7717_v63 = vor.u32 %v8936_v58, %v7714_v59  ;;  %v4513_v58 = vpack.c.bf16 %v4509_v52, %v4509_v52  ;;  %v8005_v59 = vor.u32 %v8968_v54, %v8002_v55  ;;  %v7802_v54 = vld [vmem:[%s9289_s20 + $0x1b8] sm:$0xf0]  ;;  %v9970_v55 = vld [vmem:[#allocation4] sm:$0xff] }
 0x435   : > { %v3391_v1 = vpop.f32.mrf.mxu2 }
 0x436   : > { %v4057_v1 = vshll.u32 %v4013_v57, 16 }
 0x438   : > { %3573 = vmatpush.bf16.msra.mxu3 %v8868_v0  ;;  %v4050_v0 = vshrl.u32 %v4011_v50, 16  ;;  %v4059_v7 = vrot.slane %v4057_v1, 1  ;;  %v8970_v50 = vld [vmem:[%s9289_s20 + $0x214] sm:$0xf]  ;;  %v9004_v1 = vld [vmem:[%s10392_s4 + $0x20] sm:$0xff] }
 0x43c   : > { %3574 = vmatpush.bf16.msra.mxu3 %v8867_v2  ;;  %v7901_v2 = vor.u32 %v8918_v60, %v7898_v61  ;;  %v9007_v60 = vld [vmem:[%s10392_s4 + $0x38] sm:$0xff] }
 0x440   : > { %3575 = vmatpush.bf16.msra.mxu3 %v8866_v4  ;;  %v4055_v4 = vor.u32 %v4054_v62, %v4050_v0  ;;  %v4553_v62 = vrot.slane %v4513_v58, 1  ;;  %v7794_v58 = vld [vmem:[%s9289_s20 + $0x1a8] sm:$0xf0] }
 0x444   : > { %3576 = vmatpush.bf16.msra.mxu3 %v8865_v6  ;;  %v7890_v6 = vld [vmem:[%s9289_s20 + $0x68] sm:$0xf0] }
 0x445   : > { %v7893_v8 = vor.u32 %v8916_v5, %v7890_v6  ;;  %v9001_v5 = vld [vmem:[%s10392_s4 + $0x8] sm:$0xff]  ;;  %v9000_v6 = vld [vmem:[%s10392_s4] sm:$0xff] }
 0x448   : > { %3577 = vmatpush.bf16.msra.mxu3 %v8864_v9  ;;  %v9893_v9 = vsel %vm4048_vm11, %v4055_v4, %v4059_v7  ;;  %v9002_v4 = vld [vmem:[%s10392_s4 + $0x10] sm:$0xff]  ;;  %v9063_v7 = vld [vmem:[%s9309_s30 + $0x78] sm:$0xff] }
 0x44c   : > { %3578 = vmatpush.bf16.msra.mxu3 %v8863_v12  ;;  %v7885_v12 = vor.u32 %v8914_v10, %v7882_v11  ;;  %v9062_v11 = vld [vmem:[%s9309_s30 + $0x70] sm:$0xff] }
 0x450   : > { %3579 = vmatpush.bf16.msra.mxu3 %v8862_v16  ;;  %v8910_v16 = vld [vmem:[%s9289_s20 + $0x34] sm:$0xf] }
 0x4b6   : > { %v3421_v19 = vpop.f32.mrf.mxu3 }
 0x4b7   : > { %v3422_v20 = vadd.f32 %v9149_v18, %v3421_v19  ;;  %v7869_v18 = vor.u32 %v8910_v16, %v7866_v17  ;;  %v8908_v19 = vld [vmem:[%s9289_s20 + $0x24] sm:$0xf]  ;;  %v9059_v16 = vld [vmem:[%s9309_s30 + $0x58] sm:$0xff] }
 0x4b9   : > { %v3424_v21 = vmax.f32 %v3422_v20, 0.0  ;;  %v7858_v20 = vld [vmem:[%s9289_s20 + $0x28] sm:$0xf0] }
 0x4bb   : > { %3425 = vst [vmem:[#allocation6 + $0x1] sm:$0xf] %v3424_v21  ;;  %v7861_v21 = vor.u32 %v8908_v19, %v7858_v20 }
 0x4c2   : > { %v3444_v25 = vld [vmem:[#allocation6 + $0x1] sm:$0x7] }
 0x4c3   : > { %v3426_v26 = vld [vmem:[#allocation6] sm:$0x7]  ;;  %v3445_v28 = vpack.c.bf16 %v3444_v25, %v3444_v25  ;;  %v7853_v25 = vor.u32 %v8906_v22, %v7850_v23  ;;  %v8889_v22 = vld [vmem:[%s10395_s22 + $0x18] sm:$0xff]  ;;  %v9057_v23 = vld [vmem:[%s9309_s30 + $0x48] sm:$0xff] }
 0x4c4   : > { %v3585_v27 = vld [vmem:[#allocation6 + $0x2] sm:$0x7]  ;;  %v3427_v24 = vpack.c.bf16 %v3426_v26, %v3426_v26  ;;  %v8904_v26 = vld [vmem:[%s9289_s20 + $0x4] sm:$0xf] }
 0x4c5   : > { %v3586_v29 = vpack.c.bf16 %v3585_v27, %v3585_v27  ;;  %3519 = vmatmul.bf16.vlgmr.msrb.gmra.mxu0 %v3445_v28  ;;  %v7842_v27 = vld [vmem:[%s9289_s20 + $0x8] sm:$0xf0]  ;;  %v8982_v28 = vld [vmem:[%s9289_s20 + $0x274] sm:$0xf] }
 0x4c6   : > { %3580 = vmatmul.bf16.vlgmr.msra.gmra.mxu3 %v3427_v24  ;;  %v8058_v24 = vld [vmem:[%s9289_s20 + $0x278] sm:$0xf0] }
 0x4c7   : > { %3660 = vmatmul.bf16.vlgmr.msra.gmra.mxu1 %v3586_v29  ;;  %v7845_v29 = vor.u32 %v8904_v26, %v7842_v27 }
 0x4c8   : > { %4263 = vmatpush.bf16.msra.mxu1 %v7773_v30  ;;  %v8061_v30 = vor.u32 %v8982_v28, %v8058_v24  ;;  %v9056_v28 = vld [vmem:[%s9309_s30 + $0x40] sm:$0xff]  ;;  %v8887_v24 = vld [vmem:[%s10395_s22 + $0x8] sm:$0xff] }
 0x4cc   : > { %4264 = vmatpush.bf16.msra.mxu1 %v7765_v33  ;;  %v3969_v33 = vld [vmem:[#allocation4 + $0x28] sm:$0xff] }
 0x4cd   : > { %v9913_v34 = vpack.c.bf16 %v9878_v45, %v3969_v33 }
 0x4d0   : > { %4265 = vmatpush.bf16.msra.mxu1 %v7757_v36  ;;  %v8978_v36 = vld [vmem:[%s9289_s20 + $0x254] sm:$0xf] }
 0x4d1   : > { %v8045_v39 = vor.u32 %v8978_v36, %v8042_v38  ;;  %v7834_v36 = vld [vmem:[%s9289_s20 + $0x1f8] sm:$0xf0] }
 0x4d4   : > { %4266 = vmatpush.bf16.msra.mxu1 %v7749_v40  ;;  %v8976_v40 = vld [vmem:[%s9289_s20 + $0x244] sm:$0xf] }
 0x4d5   : > { %v8037_v37 = vor.u32 %v8976_v40, %v8034_v41  ;;  %v8964_v41 = vld [vmem:[%s9289_s20 + $0x1e4] sm:$0xf] }
 0x4d7   : > { %7664 = vmatmul.msk.bf16.vlgmr.msrb.gmra.mxu1 %vm3884_vm10, %v3860_v44  ;;  %v8026_v44 = vld [vmem:[%s9289_s20 + $0x238] sm:$0xf0] }
 0x4d8   : > { %4267 = vmatpush.bf16.msra.mxu1 %v7741_v46  ;;  %v8029_v46 = vor.u32 %v8974_v42, %v8026_v44  ;;  %v8962_v44 = vld [vmem:[%s9289_s20 + $0x1d4] sm:$0xf] }
 0x4dc   : > { %4268 = vmatpush.bf16.msra.mxu1 %v7733_v51  ;;  %v8010_v51 = vld [vmem:[%s9289_s20 + $0x218] sm:$0xf0] }
 0x4dd   : > { %v8013_v53 = vor.u32 %v8970_v50, %v8010_v51  ;;  %v3929_v50 = vld [vmem:[#allocation8 + $0x2] sm:$0x1] }
 0x4de   : > { %v3930_v52 = vpack.c.bf16 %v3929_v50, %v3929_v50  ;;  %v3970_v50 = vld [vmem:[#allocation4 + $0x10] sm:$0xff] }
 0x4e0   : > { %4269 = vmatpush.bf16.msra.mxu1 %v7725_v56  ;;  %v4507_v56 = vld [vmem:[#allocation4 + $0x28] sm:$0xfc] }
 0x4e1   : > { %v4511_v57 = vpack.c.bf16 %v9878_v45, %v4507_v56  ;;  %v9005_v45 = vld [vmem:[%s10392_s4 + $0x28] sm:$0xff] }
 0x4e3   : > { %v4552_v61 = vrot.slane %v4511_v57, 1  ;;  %v8956_v57 = vld [vmem:[%s9289_s20 + $0x1a4] sm:$0xf] }
 0x4e4   : > { %4270 = vmatpush.bf16.msra.mxu1 %v7717_v63  ;;  %v9006_v63 = vld [vmem:[%s10392_s4 + $0x30] sm:$0xff] }
 0x4e5   : > { %v9932_v0 = vsel %vm1570_vm2, %v4552_v61, %v4553_v62  ;;  %v7797_v61 = vor.u32 %v8956_v57, %v7794_v58  ;;  %v8954_v62 = vld [vmem:[%s9289_s20 + $0x194] sm:$0xf]  ;;  %v8895_v57 = vld [vmem:[%s10395_s22 + $0x48] sm:$0xff] }
 0x4e7   : > { %4271 = vmatmul.bf16.vlgmr.msra.gmra.mxu1 %v9893_v9 }
 0x4e8   : > { %4479 = vmatpush.bf16.msrb.mxu1 %v7901_v2  ;;  %v9003_v2 = vld [vmem:[%s10392_s4 + $0x18] sm:$0xff] }
 0x4ec   : > { %4480 = vmatpush.bf16.msrb.mxu1 %v7893_v8  ;;  %v4810_v8 = vld [vmem:[#allocation5] sm:$0xff] }
 0x4ed   : > { %v4812_v10 = vpack.c.bf16 %v4810_v8, %v4810_v8  ;;  %v7962_v8 = vld [vmem:[%s9289_s20 + $0xf8] sm:$0xf0] }
 0x4f0   : > { %4481 = vmatpush.bf16.msrb.mxu1 %v7885_v12  ;;  %v9061_v12 = vld [vmem:[%s9309_s30 + $0x68] sm:$0xff] }
 0x4f4   : > { %4482 = vmatpush.bf16.msrb.mxu1 %v7877_v15  ;;  %v9060_v15 = vld [vmem:[%s9309_s30 + $0x60] sm:$0xff] }
 0x4f8   : > { %4483 = vmatpush.bf16.msrb.mxu1 %v7869_v18 }
 0x4fc   : > { %4484 = vmatpush.bf16.msrb.mxu1 %v7861_v21  ;;  %v9058_v21 = vld [vmem:[%s9309_s30 + $0x50] sm:$0xff] }
 0x500   : > { %4485 = vmatpush.bf16.msrb.mxu1 %v7853_v25  ;;  %v8888_v25 = vld [vmem:[%s10395_s22 + $0x10] sm:$0xff] }
 0x504   : > { %4486 = vmatpush.bf16.msrb.mxu1 %v7845_v29  ;;  %v5343_v29 = vld [vmem:[#allocation6 + $0x1] sm:$0xf] }
 0x505   : > { %v5344_v31 = vpack.c.bf16 %v5343_v29, %v5343_v29  ;;  %v7930_v29 = vld [vmem:[%s9289_s20 + $0xb8] sm:$0xf0] }
 0x507   : > { %4487 = vmatmul.bf16.vlgmr.msrb.gmra.mxu1 %v9913_v34 }
 0x508   : > { %4748 = vmatpush.bf16.msra.mxu1 %v8061_v30  ;;  %v3700_v30 = vld [vmem:[#allocation7] sm:$0x1] }
 0x509   : > { %v3701_v33 = vpack.c.bf16 %v3700_v30, %v3700_v30  ;;  %v8924_v30 = vld [vmem:[%s9289_s20 + $0xa4] sm:$0xf] }
 0x50c   : > { %4749 = vmatpush.bf16.msra.mxu1 %v8053_v35  ;;  %v8966_v35 = vld [vmem:[%s9289_s20 + $0x1f4] sm:$0xf] }
 0x50d   : > { %v7837_v40 = vor.u32 %v8966_v35, %v7834_v36  ;;  %v8922_v35 = vld [vmem:[%s9289_s20 + $0x94] sm:$0xf]  ;;  %v7914_v36 = vld [vmem:[%s9289_s20 + $0x98] sm:$0xf0] }
 0x510   : > { %4750 = vmatpush.bf16.msra.mxu1 %v8045_v39  ;;  %v8902_v39 = vld [vmem:[%s9279_s6 + $0x20] sm:$0xff] }
 0x514   : > { %4751 = vmatpush.bf16.msra.mxu1 %v8037_v37  ;;  %v7826_v37 = vld [vmem:[%s9289_s20 + $0x1e8] sm:$0xf0] }
 0x515   : > { %v7829_v42 = vor.u32 %v8964_v41, %v7826_v37  ;;  %v8897_v41 = vld [vmem:[%s10395_s22 + $0x58] sm:$0xff]  ;;  %v8998_v37 = vld [vmem:[%s9289_s20 + $0x2f4] sm:$0xf] }
 0x516   : > { %3844 = vmatpush.bf16.msrb.mxu3 %v8897_v41  ;;  %v7736_v41 = vld [vmem:[%s9289_s20 + $0x130] sm:$0xf] }
 0x518   : > { %4752 = vmatpush.bf16.msra.mxu1 %v8029_v46  ;;  %v7818_v46 = vld [vmem:[%s9289_s20 + $0x1d8] sm:$0xf0] }
 0x519   : > { %v7821_v47 = vor.u32 %v8962_v44, %v7818_v46 }
 0x51c   : > { %4753 = vmatpush.bf16.msra.mxu1 %v8021_v49  ;;  %v7810_v49 = vld [vmem:[%s9289_s20 + $0x1c8] sm:$0xf0] }
 0x51d   : > { %v7813_v51 = vor.u32 %v8960_v48, %v7810_v49  ;;  %v8996_v48 = vld [vmem:[%s9289_s20 + $0x2e4] sm:$0xf]  ;;  %v8114_v49 = vld [vmem:[%s9289_s20 + $0x2e8] sm:$0xf0] }
 0x520   : > { %4754 = vmatpush.bf16.msra.mxu1 %v8013_v53  ;;  %v8958_v53 = vld [vmem:[%s9289_s20 + $0x1b4] sm:$0xf] }
 0x521   : > { %v7805_v56 = vor.u32 %v8958_v53, %v7802_v54  ;;  %v8117_v53 = vor.u32 %v8996_v48, %v8114_v49  ;;  %v8994_v54 = vld [vmem:[%s9289_s20 + $0x2d4] sm:$0xf] }
 0x522   : > { %v9074_v49 = vld [vmem:[%s10396_s23 + $0x10] sm:$0xff] }
 0x524   : > { %4755 = vmatpush.bf16.msra.mxu1 %v8005_v59  ;;  %v4008_v59 = vld [vmem:[#allocation4 + $0x10] sm:$0xfe] }
 0x527   : > { %4756 = vmatmul.bf16.vlgmr.msra.gmra.mxu1 %v9932_v0 }
 0x528   : > { %5119 = vmatpush.bf16.msrb.mxu1 %v9007_v60  ;;  %v4012_v60 = vpack.c.bf16 %v9970_v55, %v4008_v59 }
 0x52c   : > { %5120 = vmatpush.bf16.msrb.mxu1 %v9006_v63  ;;  %v7786_v63 = vld [vmem:[%s9289_s20 + $0x198] sm:$0xf0] }
 0x530   : > { %5121 = vmatpush.bf16.msrb.mxu1 %v9005_v45  ;;  %v4010_v45 = vld [vmem:[#allocation4 + $0x20] sm:$0x1] }
 0x534   : > { %5122 = vmatpush.bf16.msrb.mxu1 %v9004_v1  ;;  %v4064_v1 = vshll.u32 %v4012_v60, 16 }
 0x538   : > { %5123 = vmatpush.bf16.msrb.mxu1 %v9003_v2  ;;  %v7789_v2 = vor.u32 %v8954_v62, %v7786_v63  ;;  %v8894_v62 = vld [vmem:[%s10395_s22 + $0x40] sm:$0xff]  ;;  %v7768_v63 = vld [vmem:[%s9289_s20 + $0x170] sm:$0xf] }
 0x53c   : > { %5124 = vmatpush.bf16.msrb.mxu1 %v9002_v4  ;;  %v4014_v4 = vpack.c.bf16 %v4010_v45, %v4010_v45  ;;  %v8951_v45 = vld [vmem:[%s9289_s20 + $0x174] sm:$0xf0] }
 0x540   : > { %5125 = vmatpush.bf16.msrb.mxu1 %v9001_v5  ;;  %v8952_v5 = vld [vmem:[%s9289_s20 + $0x184] sm:$0xf] }
 0x542   : > { %v3520_v13 = vpop.f32.mrf.mxu0 }
 0x544   : > { %5126 = vmatpush.bf16.msrb.mxu1 %v9000_v6  ;;  %v3661_v14 = vpop.f32.mrf.mxu1  ;;  %v7778_v6 = vld [vmem:[%s9289_s20 + $0x188] sm:$0xf0] }
 0x547   : > { %5127 = vmatmul.bf16.vlgmr.msrb.gmra.mxu1 %v4812_v10  ;;  %v4066_v10 = vrot.slane %v4064_v1, 1 }
 0x548   : > { %5410 = vmatpush.bf16.msra.mxu1 %v9063_v7  ;;  %v8934_v7 = vld [vmem:[%s9289_s20 + $0xf4] sm:$0xf] }
 0x549   : > { %v3581_v17 = vpop.f32.mrf.mxu3 }
 0x54a   : > { %v3582_v18 = vadd.f32 %v3581_v17, %v3520_v13  ;;  %v3522_v19 = vpop.f32.mrf.mxu0  ;;  %v4069_v13 = vshll.u32 %v4014_v4, 16  ;;  %v7954_v17 = vld [vmem:[%s9289_s20 + $0xe8] sm:$0xf0]  ;;  %v7769_v4 = vor.u32 %v8951_v45, %v7768_v63  ;;  %v8937_v63 = vld [vmem:[%s9289_s20 + $0x104] sm:$0xf0]  ;;  %v9012_v45 = vld [vmem:[%s10392_s4 + $0x60] sm:$0xff] }
 0x54c   : > { %5411 = vmatpush.bf16.msra.mxu1 %v9062_v11  ;;  %v3665_v20 = vadd.f32 %v3661_v14, %v3582_v18  ;;  %v3663_v3 = vpop.f32.mrf.mxu1  ;;  %v7781_v11 = vor.u32 %v8952_v5, %v7778_v6  ;;  %v7965_v14 = vor.u32 %v8934_v7, %v7962_v8  ;;  %v4071_v18 = vrot.slane %v4069_v13, 1  ;;  %v8090_v5 = vld [vmem:[%s9289_s20 + $0x2b8] sm:$0xf0]  ;;  %v7760_v6 = vld [vmem:[%s9289_s20 + $0x160] sm:$0xf] }
 0x54d   : > { %v8930_v3 = vld [vmem:[%s9289_s20 + $0xd4] sm:$0xf]  ;;  %v8949_v7 = vld [vmem:[%s9289_s20 + $0x164] sm:$0xf0]  ;;  %v8082_v13 = vld [vmem:[%s9289_s20 + $0x2a8] sm:$0xf0] }
 0x54e   : > { %7574 = vmatpush.msk.msra.mxu2 %vm3673_vm13, %v3665_v20  ;;  %v7761_v8 = vor.u32 %v8949_v7, %v7760_v6  ;;  %v9011_v6 = vld [vmem:[%s10392_s4 + $0x58] sm:$0xff]  ;;  %v9010_v7 = vld [vmem:[%s10392_s4 + $0x50] sm:$0xff] }
 0x54f   : > { %7575 = vmatmul.msk.f32.vlgmr.msra.gmra.mxu2 %vm3670_vm14, %v9494_v43  ;;  %v8886_v43 = vld [vmem:[%s10395_s22] sm:$0xff] }
 0x550   : > { %5412 = vmatpush.bf16.msra.mxu1 %v9061_v12  ;;  %3793 = vmatpush.bf16.msrb.mxu2 %v8889_v22  ;;  %v4062_v12 = vshrl.u32 %v4012_v60, 16  ;;  %v8992_v60 = vld [vmem:[%s9289_s20 + $0x2c4] sm:$0xf] }
 0x551   : > { %v3583_v26 = vpop.f32.mrf.mxu3 }
 0x554   : > { %5413 = vmatpush.bf16.msra.mxu1 %v9060_v15  ;;  %3794 = vmatpush.bf16.msrb.mxu2 %v8888_v25  ;;  %v9952_v27 = vpop.f32.mrf.mxu1  ;;  %v4067_v15 = vor.u32 %v4066_v10, %v4062_v12  ;;  %v7938_v25 = vld [vmem:[%s9289_s20 + $0xc8] sm:$0xf0] }
 0x556   : > { %v9985_v20 = vsel %vm4048_vm11, %v4067_v15, %v4071_v18  ;;  %v8947_v15 = vld [vmem:[%s9289_s20 + $0x154] sm:$0xf0]  ;;  %v8986_v18 = vld [vmem:[%s9289_s20 + $0x294] sm:$0xf] }
 0x558   : > { %5414 = vmatpush.bf16.msra.mxu1 %v9059_v16  ;;  %3795 = vmatpush.bf16.msrb.mxu2 %v8887_v24  ;;  %v8932_v16 = vld [vmem:[%s9289_s20 + $0xe4] sm:$0xf]  ;;  %v8926_v24 = vld [vmem:[%s9289_s20 + $0xb4] sm:$0xf] }
 0x559   : > { %v7957_v19 = vor.u32 %v8932_v16, %v7954_v17 }
 0x55c   : > { %5415 = vmatpush.bf16.msra.mxu1 %v9058_v21  ;;  %3796 = vmatpush.bf16.msrb.mxu2 %v8886_v43  ;;  %v3927_v38 = vpop.f32.mrf.mxu1  ;;  %v7946_v21 = vld [vmem:[%s9289_s20 + $0xd8] sm:$0xf0]  ;;  %v7933_v43 = vor.u32 %v8926_v24, %v7930_v29  ;;  %v8066_v24 = vld [vmem:[%s9289_s20 + $0x288] sm:$0xf0]  ;;  %v4508_v29 = vld [vmem:[#allocation4 + $0x10] sm:$0xfc] }
 0x55d   : > { %v7949_v22 = vor.u32 %v8930_v3, %v7946_v21  ;;  %v7917_v38 = vor.u32 %v8922_v35, %v7914_v36  ;;  %v7744_v3 = vld [vmem:[%s9289_s20 + $0x140] sm:$0xf]  ;;  %v8945_v21 = vld [vmem:[%s9289_s20 + $0x144] sm:$0xf0]  ;;  %v9015_v35 = vld [vmem:[%s10392_s4 + $0x78] sm:$0xff] }
 0x55f   : > { %7617 = vmatmul.msk.bf16.vlgmr.msrb.gmra.mxu2 %vm3745_vm15, %v3701_v33 }
 0x560   : > { %5416 = vmatpush.bf16.msra.mxu1 %v9057_v23  ;;  %3957 = vmatpush.bf16.msra.mxu2 %v8903_v32  ;;  %v8928_v23 = vld [vmem:[%s9289_s20 + $0xc4] sm:$0xf] }
 0x564   : > { %5417 = vmatpush.bf16.msra.mxu1 %v9056_v28  ;;  %3958 = vmatpush.bf16.msra.mxu2 %v8902_v39  ;;  %v9992_v26 = vpop.f32.mrf.mxu1  ;;  %v7941_v28 = vor.u32 %v8928_v23, %v7938_v25  ;;  %v8920_v39 = vld [vmem:[%s9289_s20 + $0x84] sm:$0xf]  ;;  %v4510_v23 = vld [vmem:[#allocation4 + $0x20] sm:$0x3] }
 0x567   : > { %5418 = vmatmul.bf16.vlgmr.msra.gmra.mxu1 %v5344_v31  ;;  %v7922_v31 = vld [vmem:[%s9289_s20 + $0xa8] sm:$0xf0] }
 0x568   : > { %4277 = vmatpush.bf16.msrb.mxu2 %v7837_v40  ;;  %v7925_v33 = vor.u32 %v8924_v30, %v7922_v31  ;;  %v7906_v40 = vld [vmem:[%s9289_s20 + $0x88] sm:$0xf0]  ;;  %v4514_v30 = vpack.c.bf16 %v4510_v23, %v4510_v23  ;;  %v8919_v23 = vld [vmem:[%s9289_s20 + $0x74] sm:$0xf0] }
 0x569   : > { %v7909_v46 = vor.u32 %v8920_v39, %v7906_v40  ;;  %v8893_v39 = vld [vmem:[%s10395_s22 + $0x38] sm:$0xff] }
 0x56a   : > { %v9075_v40 = vld [vmem:[%s10396_s23 + $0x18] sm:$0xff]  ;;  %3753 = vmatpush.bf16.msra.mxu0 %v8893_v39 }
 0x56b   : > { %5670 = vmatpush.bf16.msrb.mxu1 %v9075_v40 }
 0x56c   : > { %4278 = vmatpush.bf16.msrb.mxu2 %v7829_v42  ;;  %v9998_v32 = vpop.f32.mrf.mxu1  ;;  %v8122_v42 = vld [vmem:[%s9289_s20 + $0x2f8] sm:$0xf0] }
 0x56f   : > { %7677 = vmatmul.msk.bf16.vlgmr.msra.gmra.mxu2 %vm3884_vm10, %v3930_v52  ;;  %v10013_v52 = vpack.c.bf16 %v9970_v55, %v3970_v50  ;;  %v8941_v50 = vld [vmem:[%s9289_s20 + $0x124] sm:$0xf0]  ;;  %5671 = vmatpush.bf16.msrb.mxu1 %v9074_v49  ;;  %v7872_v49 = vld [vmem:[%s9289_s20 + $0x40] sm:$0xf] }
 0x570   : > { %4279 = vmatpush.bf16.msrb.mxu2 %v7821_v47  ;;  %v8125_v47 = vor.u32 %v8998_v37, %v8122_v42  ;;  %v8943_v37 = vld [vmem:[%s9289_s20 + $0x134] sm:$0xf0] }
 0x571   : > { %v7737_v42 = vor.u32 %v8943_v37, %v7736_v41  ;;  %v9051_v37 = vld [vmem:[%s9309_s30 + $0x18] sm:$0xff] }
 0x574   : > { %4280 = vmatpush.bf16.msrb.mxu2 %v7813_v51  ;;  %v8896_v51 = vld [vmem:[%s10395_s22 + $0x50] sm:$0xff] }
 0x575   : > { %3845 = vmatpush.bf16.msrb.mxu3 %v8896_v51 }
 0x578   : > { %4281 = vmatpush.bf16.msrb.mxu2 %v7805_v56  ;;  %v8106_v56 = vld [vmem:[%s9289_s20 + $0x2d8] sm:$0xf0] }
 0x579   : > { %v8109_v58 = vor.u32 %v8994_v54, %v8106_v56  ;;  %3846 = vmatpush.bf16.msrb.mxu3 %v8895_v57  ;;  %v7720_v54 = vld [vmem:[%s9289_s20 + $0x110] sm:$0xf]  ;;  %v8939_v56 = vld [vmem:[%s9289_s20 + $0x114] sm:$0xf0]  ;;  %v9013_v57 = vld [vmem:[%s10392_s4 + $0x68] sm:$0xff] }
 0x57c   : > { %4282 = vmatpush.bf16.msrb.mxu2 %v7797_v61  ;;  %v8098_v61 = vld [vmem:[%s9289_s20 + $0x2c8] sm:$0xf0] }
 0x57d   : > { %v8101_v1 = vor.u32 %v8992_v60, %v8098_v61  ;;  %3847 = vmatpush.bf16.msrb.mxu3 %v8894_v62  ;;  %v9073_v60 = vld [vmem:[%s10396_s23 + $0x8] sm:$0xff]  ;;  %v7721_v61 = vor.u32 %v8939_v56, %v7720_v54  ;;  %v7712_v62 = vld [vmem:[%s9289_s20 + $0x100] sm:$0xf] }
 0x57e   : > { %5672 = vmatpush.bf16.msrb.mxu1 %v9073_v60  ;;  %v9049_v56 = vld [vmem:[%s9309_s30 + $0x8] sm:$0xff] }
 0x580   : > { %4283 = vmatpush.bf16.msrb.mxu2 %v7789_v2  ;;  %v8990_v2 = vld [vmem:[%s9289_s20 + $0x2b4] sm:$0xf] }
 0x581   : > { %4235 = vmatpush.bf16.msra.mxu3 %v7769_v4  ;;  %v8093_v10 = vor.u32 %v8990_v2, %v8090_v5  ;;  %v9072_v2 = vld [vmem:[%s10396_s23] sm:$0xff]  ;;  %v7713_v5 = vor.u32 %v8937_v63, %v7712_v62  ;;  %v8909_v63 = vld [vmem:[%s9289_s20 + $0x24] sm:$0xf0] }
 0x582   : > { %5673 = vmatpush.bf16.msrb.mxu1 %v9072_v2  ;;  %v7856_v62 = vld [vmem:[%s9289_s20 + $0x20] sm:$0xf] }
 0x584   : > { %4284 = vmatpush.bf16.msrb.mxu2 %v7781_v11  ;;  %v10007_v44 = vpop.f32.mrf.mxu1  ;;  %v8988_v11 = vld [vmem:[%s9289_s20 + $0x2a4] sm:$0xf] }
 0x585   : > { %4236 = vmatpush.bf16.msra.mxu3 %v7761_v8  ;;  %v8085_v17 = vor.u32 %v8988_v11, %v8082_v13  ;;  %v9009_v8 = vld [vmem:[%s10392_s4 + $0x48] sm:$0xff]  ;;  %v9008_v11 = vld [vmem:[%s10392_s4 + $0x40] sm:$0xff] }
 0x587   : > { %4285 = vmatmul.bf16.vlgmr.msrb.gmra.mxu2 %v9985_v20 }
 0x588   : > { %4493 = vmatpush.bf16.msra.mxu2 %v7965_v14  ;;  %v7752_v14 = vld [vmem:[%s9289_s20 + $0x150] sm:$0xf] }
 0x589   : > { %v7753_v16 = vor.u32 %v8947_v15, %v7752_v14  ;;  %v9055_v14 = vld [vmem:[%s9309_s30 + $0x38] sm:$0xff] }
 0x58b   : > { %4237 = vmatpush.bf16.msra.mxu3 %v7753_v16  ;;  %v4811_v16 = vld [vmem:[#allocation5 + $0x8] sm:$0xff] }
 0x58c   : > { %4494 = vmatpush.bf16.msra.mxu2 %v7957_v19  ;;  %v10019_v59 = vpop.f32.mrf.mxu1  ;;  %v8074_v19 = vld [vmem:[%s9289_s20 + $0x298] sm:$0xf0] }
 0x58d   : > { %v8077_v25 = vor.u32 %v8986_v18, %v8074_v19  ;;  %v4813_v18 = vpack.c.bf16 %v4811_v16, %v4811_v16  ;;  %v9054_v19 = vld [vmem:[%s9309_s30 + $0x30] sm:$0xff] }
 0x590   : > { %4495 = vmatpush.bf16.msra.mxu2 %v7949_v22  ;;  %v7745_v22 = vor.u32 %v8945_v21, %v7744_v3  ;;  %v9053_v21 = vld [vmem:[%s9309_s30 + $0x28] sm:$0xff] }
 0x592   : > { %4238 = vmatpush.bf16.msra.mxu3 %v7745_v22  ;;  %v7896_v22 = vld [vmem:[%s9289_s20 + $0x70] sm:$0xf] }
 0x594   : > { %4496 = vmatpush.bf16.msra.mxu2 %v7941_v28  ;;  %v8984_v28 = vld [vmem:[%s9289_s20 + $0x284] sm:$0xf] }
 0x596   : > { %4239 = vmatpush.bf16.msra.mxu3 %v7737_v42  ;;  %v8915_v42 = vld [vmem:[%s9289_s20 + $0x54] sm:$0xf0] }
 0x598   : > { %4497 = vmatpush.bf16.msra.mxu2 %v7933_v43  ;;  %v4512_v43 = vpack.c.bf16 %v9970_v55, %v4508_v29  ;;  %v9014_v55 = vld [vmem:[%s10392_s4 + $0x70] sm:$0xff]  ;;  %v7897_v29 = vor.u32 %v8919_v23, %v7896_v22  ;;  %v8981_v22 = vld [vmem:[%s9289_s20 + $0x264] sm:$0xf0] }
 0x59a   : > { %v4555_v36 = vrot.slane %v4512_v43, 1 }
 0x59c   : > { %4498 = vmatpush.bf16.msra.mxu2 %v7925_v33  ;;  %v8069_v33 = vor.u32 %v8984_v28, %v8066_v24 }
 0x5a0   : > { %4499 = vmatpush.bf16.msra.mxu2 %v7917_v38  ;;  %v4556_v38 = vrot.slane %v4514_v30, 1 }
 0x5a2   : > { %v10054_v48 = vsel %vm1570_vm2, %v4555_v36, %v4556_v38  ;;  %v7888_v36 = vld [vmem:[%s9289_s20 + $0x60] sm:$0xf]  ;;  %v8917_v38 = vld [vmem:[%s9289_s20 + $0x64] sm:$0xf0]  ;;  %vm3857_vm2 = vcmask 253952  }
 0x5a3   : > { %v7889_v41 = vor.u32 %v8917_v38, %v7888_v36  ;;  %v8024_v36 = vld [vmem:[%s9289_s20 + $0x230] sm:$0xf]  ;;  %v8975_v38 = vld [vmem:[%s9289_s20 + $0x234] sm:$0xf0] }
 0x5a4   : > { %4500 = vmatpush.bf16.msra.mxu2 %v7909_v46  ;;  %v10031_v12 = vpop.f32.mrf.mxu1  ;;  %v8892_v46 = vld [vmem:[%s10395_s22 + $0x30] sm:$0xff] }
 0x5a5   : > { %3754 = vmatpush.bf16.msra.mxu0 %v8892_v46 }
 0x5a7   : > { %4501 = vmatmul.bf16.vlgmr.msra.gmra.mxu2 %v10013_v52 }
 0x5a8   : > { %4762 = vmatpush.bf16.msrb.mxu2 %v8125_v47  ;;  %v7728_v47 = vld [vmem:[%s9289_s20 + $0x120] sm:$0xf] }
 0x5ac   : > { %4763 = vmatpush.bf16.msrb.mxu2 %v8117_v53  ;;  %v10043_v31 = vpop.f32.mrf.mxu1  ;;  %v7729_v53 = vor.u32 %v8941_v50, %v7728_v47  ;;  %v9050_v47 = vld [vmem:[%s9309_s30 + $0x10] sm:$0xff]  ;;  %v8913_v50 = vld [vmem:[%s9289_s20 + $0x44] sm:$0xf0] }
 0x5ad   : > { %v7873_v54 = vor.u32 %v8913_v50, %v7872_v49  ;;  %v8969_v49 = vld [vmem:[%s9289_s20 + $0x204] sm:$0xf0] }
 0x5ae   : > { %4240 = vmatpush.bf16.msra.mxu3 %v7729_v53 }
 0x5b0   : > { %4764 = vmatpush.bf16.msrb.mxu2 %v8109_v58  ;;  %v8891_v58 = vld [vmem:[%s10395_s22 + $0x28] sm:$0xff] }
 0x5b1   : > { %3755 = vmatpush.bf16.msra.mxu0 %v8891_v58  ;;  %v8911_v58 = vld [vmem:[%s9289_s20 + $0x34] sm:$0xf0] }
 0x5b2   : > { %4241 = vmatpush.bf16.msra.mxu3 %v7721_v61  ;;  %v9048_v61 = vld [vmem:[%s9309_s30] sm:$0xff] }
 0x5b4   : > { %4765 = vmatpush.bf16.msrb.mxu2 %v8101_v1  ;;  %v8890_v1 = vld [vmem:[%s10395_s22 + $0x20] sm:$0xff] }
 0x5b5   : > { %3756 = vmatpush.bf16.msra.mxu0 %v8890_v1  ;;  %v5325_v1 = vld [vmem:[#allocation6] sm:$0xf] }
 0x5b6   : > { %4242 = vmatpush.bf16.msra.mxu3 %v7713_v5  ;;  %v5326_v5 = vpack.c.bf16 %v5325_v1, %v5325_v1  ;;  %v9018_v1 = vld [vmem:[%s10392_s4 + $0x90] sm:$0xff] }
 0x5b8   : > { %4766 = vmatpush.bf16.msrb.mxu2 %v8093_v10  ;;  %v9150_v10 = vld [vmem:[%s10397_s26] ss:$0 sm:$0xff]  ;;  %s6394_s26 = sshll.u32 %s10419_s16, 2 }
 0x5bc   : > { %4767 = vmatpush.bf16.msrb.mxu2 %v8085_v17 }
 0x5c0   : > { %4768 = vmatpush.bf16.msrb.mxu2 %v8077_v25  ;;  %v9052_v25 = vld [vmem:[%s9309_s30 + $0x20] sm:$0xff] }
 0x5c4   : > { %4769 = vmatpush.bf16.msrb.mxu2 %v8069_v33  ;;  %v10058_v51 = vpop.f32.mrf.mxu1 }
 0x5c7   : > { %4770 = vmatmul.bf16.vlgmr.msrb.gmra.mxu2 %v10054_v48 }
 0x5c8   : > { %5132 = vmatpush.bf16.msra.mxu2 %v9015_v35 }
 0x5cc   : > { %5133 = vmatpush.bf16.msra.mxu2 %v9014_v55  ;;  %v5130_v4 = vpop.f32.mrf.mxu1  ;;  %v7880_v55 = vld [vmem:[%s9289_s20 + $0x50] sm:$0xf] }
 0x5cd   : > { %v7881_v46 = vor.u32 %v8915_v42, %v7880_v55  ;;  %v7857_v4 = vor.u32 %v8909_v63, %v7856_v62  ;;  %v8008_v55 = vld [vmem:[%s9289_s20 + $0x210] sm:$0xf]  ;;  %v8971_v42 = vld [vmem:[%s9289_s20 + $0x214] sm:$0xf0]  ;;  %v4848_v63 = vld [vmem:[#allocation5 + $0x10] sm:$0x1] }
 0x5ce   : > { %v4846_v62 = vld [vmem:[#allocation5] sm:$0xfe] }
 0x5d0   : > { %5134 = vmatpush.bf16.msra.mxu2 %v9013_v57  ;;  %v7864_v57 = vld [vmem:[%s9289_s20 + $0x30] sm:$0xf] }
 0x5d1   : > { %v7865_v60 = vor.u32 %v8911_v58, %v7864_v57  ;;  %v9021_v57 = vld [vmem:[%s10392_s4 + $0xa8] sm:$0xff] }
 0x5d2   : > { %v3694_v13 = vpop.f32.mrf.mxu2 }
 0x5d3   : > { %v3695_v15 = vadd.f32 %v9150_v10, %v3694_v13  ;;  %v9081_v13 = vld [vmem:[%s10396_s23 + $0x48] sm:$0xff] }
 0x5d4   : > { %5135 = vmatpush.bf16.msra.mxu2 %v9012_v45  ;;  %v9083_v45 = vld [vmem:[%s10396_s23 + $0x58] sm:$0xff] }
 0x5d5   : > { %v3697_v17 = vmax.f32 %v3695_v15, 0.0  ;;  %v8983_v15 = vld [vmem:[%s9289_s20 + $0x274] sm:$0xf0] }
 0x5d7   : > { %3699 = vst.msk [vmem:[#allocation7 + $0x1] sm:$0x3] %vm3698_vm1, %v3697_v17 }
 0x5d8   : > { %5136 = vmatpush.bf16.msra.mxu2 %v9011_v6  ;;  %v7848_v6 = vld [vmem:[%s9289_s20 + $0x10] sm:$0xf] }
 0x5dc   : > { %5137 = vmatpush.bf16.msra.mxu2 %v9010_v7  ;;  %v8907_v7 = vld [vmem:[%s9289_s20 + $0x14] sm:$0xf0] }
 0x5dd   : > { %v7849_v10 = vor.u32 %v8907_v7, %v7848_v6  ;;  %v8901_v6 = vld [vmem:[%s9279_s6 + $0x18] sm:$0xff]  ;;  %v9016_v7 = vld [vmem:[%s10392_s4 + $0x80] sm:$0xff] }
 0x5de   : > { %v3710_v28 = vld [vmem:[#allocation7 + $0x1] sm:$0x1]  ;;  %v3802_v24 = vld [vmem:[#allocation7 + $0x2] sm:$0x1]  ;;  %3894 = vmatpush.bf16.msrb.mxu0 %v8901_v6  ;;  %v9070_v6 = vld [vmem:[%s9309_s30 + $0xb0] sm:$0xff] }
 0x5df   : > { %v5578_v43 = vld [vmem:[#allocation7] sm:$0x3]  ;;  %v3711_v30 = vpack.c.bf16 %v3710_v28, %v3710_v28  ;;  %v3803_v33 = vpack.c.bf16 %v3802_v24, %v3802_v24  ;;  %v8040_v28 = vld [vmem:[%s9289_s20 + $0x250] sm:$0xf] }
 0x5e0   : > { %5138 = vmatpush.bf16.msra.mxu2 %v9009_v8  ;;  %v5579_v35 = vpack.c.bf16 %v5578_v43, %v5578_v43  ;;  %v9082_v8 = vld [vmem:[%s10396_s23 + $0x50] sm:$0xff]  ;;  %v8979_v24 = vld [vmem:[%s9289_s20 + $0x254] sm:$0xf0] }
 0x5e1   : > { %7600 = vmatmul.msk.bf16.vlgmr.msra.gmra.mxu0 %vm3745_vm15, %v3711_v30  ;;  %7642 = vmatmul.msk.bf16.vlgmr.msrb.gmra.mxu3 %vm3745_vm15, %v3803_v33  ;;  %v8041_v43 = vor.u32 %v8979_v24, %v8040_v28  ;;  %v8032_v30 = vld [vmem:[%s9289_s20 + $0x240] sm:$0xf]  ;;  %v8977_v33 = vld [vmem:[%s9289_s20 + $0x244] sm:$0xf0] }
 0x5e2   : > { %4451 = vmatpush.bf16.msrb.mxu3 %v7897_v29  ;;  %v10088_v40 = vpop.f32.mrf.mxu2  ;;  %8551 = vmatmul.msk.bf16.vlgmr.msrb.gmra.mxu1 %vm3745_vm15, %v5579_v35  ;;  %v8033_v35 = vor.u32 %v8977_v33, %v8032_v30  ;;  %v9037_v24 = vld [vmem:[%s10392_s4 + $0x128] sm:$0xff]  ;;  %v7816_v33 = vld [vmem:[%s9289_s20 + $0x1d0] sm:$0xf] }
 0x5e4   : > { %5139 = vmatpush.bf16.msra.mxu2 %v9008_v11  ;;  %v10078_v3 = vpop.f32.mrf.mxu1  ;;  %v8905_v11 = vld [vmem:[%s9289_s20 + $0x4] sm:$0xf0] }
 0x5e6   : > { %4452 = vmatpush.bf16.msrb.mxu3 %v7889_v41  ;;  %v8016_v41 = vld [vmem:[%s9289_s20 + $0x220] sm:$0xf] }
 0x5e7   : > { %5140 = vmatmul.bf16.vlgmr.msra.gmra.mxu2 %v4813_v18 }
 0x5e8   : > { %5471 = vmatpush.bf16.msrb.mxu2 %v9055_v14  ;;  %v8056_v14 = vld [vmem:[%s9289_s20 + $0x270] sm:$0xf] }
 0x5e9   : > { %v8057_v18 = vor.u32 %v8983_v15, %v8056_v14  ;;  %v7832_v14 = vld [vmem:[%s9289_s20 + $0x1f0] sm:$0xf]  ;;  %v8967_v15 = vld [vmem:[%s9289_s20 + $0x1f4] sm:$0xf0] }
 0x5ea   : > { %4453 = vmatpush.bf16.msrb.mxu3 %v7881_v46  ;;  %v3800_v53 = vpop.f32.mrf.mxu2  ;;  %v8009_v46 = vor.u32 %v8971_v42, %v8008_v55 }
 0x5eb   : > { %v9023_v53 = vld [vmem:[%s10392_s4 + $0xb8] sm:$0xff] }
 0x5ec   : > { %5472 = vmatpush.bf16.msrb.mxu2 %v9054_v19  ;;  %v5421_v39 = vpop.f32.mrf.mxu1  ;;  %v9080_v19 = vld [vmem:[%s10396_s23 + $0x40] sm:$0xff] }
 0x5ed   : > { %v8025_v39 = vor.u32 %v8975_v38, %v8024_v36 }
 0x5ee   : > { %4454 = vmatpush.bf16.msrb.mxu3 %v7873_v54 }
 0x5f0   : > { %5473 = vmatpush.bf16.msrb.mxu2 %v9053_v21  ;;  %v8048_v21 = vld [vmem:[%s9289_s20 + $0x260] sm:$0xf] }
 0x5f1   : > { %4243 = vmatmul.bf16.vlgmr.msra.gmra.mxu3 %v9893_v9  ;;  %v7840_v9 = vld [vmem:[%s9289_s20] sm:$0xf]  ;;  %v8049_v23 = vor.u32 %v8981_v22, %v8048_v21  ;;  %v8965_v22 = vld [vmem:[%s9289_s20 + $0x1e4] sm:$0xf0] }
 0x5f2   : > { %4455 = vmatpush.bf16.msrb.mxu3 %v7865_v60  ;;  %v10105_v2 = vpop.f32.mrf.mxu2  ;;  %v7841_v17 = vor.u32 %v8905_v11, %v7840_v9  ;;  %v9020_v60 = vld [vmem:[%s10392_s4 + $0xa0] sm:$0xff] }
 0x5f3   : > { %v7824_v21 = vld [vmem:[%s9289_s20 + $0x1e0] sm:$0xf] }
 0x5f4   : > { %5474 = vmatpush.bf16.msrb.mxu2 %v9052_v25  ;;  %v5679_v25 = vld [vmem:[#allocation7 + $0x2] sm:$0x3] }
 0x5f5   : > { %v5680_v29 = vpack.c.bf16 %v5679_v25, %v5679_v25  ;;  %v7825_v25 = vor.u32 %v8965_v22, %v7824_v21  ;;  %v3854_v22 = vld [vmem:[%s10399_s2] sm:$0x1]  ;;  %s9202_s2 = smov 104  }
 0x5f6   : > { %4456 = vmatpush.bf16.msrb.mxu3 %v7857_v4  ;;  %v4850_v4 = vpack.c.bf16 %v4848_v63, %v4846_v62  ;;  %v9032_v62 = vld [vmem:[%s10392_s4 + $0x100] sm:$0xff]  ;;  %v9071_v63 = vld [vmem:[%s9309_s30 + $0xb8] sm:$0xff] }
 0x5f8   : > { %5475 = vmatpush.bf16.msrb.mxu2 %v9051_v37 }
 0x5fa   : > { %4457 = vmatpush.bf16.msrb.mxu3 %v7849_v10  ;;  %v3962_v16 = vpop.f32.mrf.mxu2  ;;  %v4886_v10 = vshrl.u32 %v4850_v4, 16 }
 0x5fc   : > { %5476 = vmatpush.bf16.msrb.mxu2 %v9050_v47  ;;  %v8000_v47 = vld [vmem:[%s9289_s20 + $0x200] sm:$0xf] }
 0x5fd   : > { %v8001_v50 = vor.u32 %v8969_v49, %v8000_v47  ;;  %v7808_v49 = vld [vmem:[%s9289_s20 + $0x1c0] sm:$0xf] }
 0x5fe   : > { %4458 = vmatpush.bf16.msrb.mxu3 %v7841_v17 }
 0x600   : > { %5477 = vmatpush.bf16.msrb.mxu2 %v9049_v56  ;;  %v9022_v56 = vld [vmem:[%s10392_s4 + $0xb0] sm:$0xff] }
 0x601   : > { %4459 = vmatmul.bf16.vlgmr.msrb.gmra.mxu3 %v9913_v34  ;;  %v8973_v34 = vld [vmem:[%s9289_s20 + $0x224] sm:$0xf0] }
 0x602   : > { %4720 = vmatpush.bf16.msra.mxu3 %v8057_v18  ;;  %v8017_v37 = vor.u32 %v8973_v34, %v8016_v41  ;;  %v9038_v18 = vld [vmem:[%s10392_s4 + $0x130] sm:$0xff]  ;;  %v9035_v34 = vld [vmem:[%s10392_s4 + $0x118] sm:$0xff] }
 0x604   : > { %5478 = vmatpush.bf16.msrb.mxu2 %v9048_v61  ;;  %v9019_v61 = vld [vmem:[%s10392_s4 + $0x98] sm:$0xff] }
 0x606   : > { %4721 = vmatpush.bf16.msra.mxu3 %v8049_v23  ;;  %v10151_v23 = vld [vmem:[%s10398_s28] sm:$0x3]  ;;  %s1226_s28 = scalar_lea.vmem %s10404_s18, %s6394_s26 }
 0x607   : > { %5479 = vmatmul.bf16.vlgmr.msrb.gmra.mxu2 %v5326_v5  ;;  %v4888_v5 = vshll.u32 %v4850_v4, 16  ;;  %v4783_v30 = vperm.slane %v10151_v23, 1  ;;  %v7784_v4 = vld [vmem:[%s9289_s20 + $0x190] sm:$0xf] }
 0x608   : > { %5721 = vmatpush.bf16.msra.mxu2 %v9083_v45 }
 0x609   : > { %v4890_v9 = vrot.slane %v4888_v5, 1 }
 0x60a   : > { %4722 = vmatpush.bf16.msra.mxu3 %v8041_v43  ;;  %v4286_v54 = vpop.f32.mrf.mxu2 }
 0x60b   : > { %v4287_v16 = vadd.f32 %v4286_v54, %v9992_v26  ;;  %v4891_v17 = vor.u32 %v4890_v9, %v4886_v10  ;;  %v8959_v54 = vld [vmem:[%s9289_s20 + $0x1b4] sm:$0xf0]  ;;  %v8953_v10 = vld [vmem:[%s9289_s20 + $0x184] sm:$0xf0] }
 0x60c   : > { %5722 = vmatpush.bf16.msra.mxu2 %v9082_v8  ;;  %v9039_v8 = vld [vmem:[%s10392_s4 + $0x138] sm:$0xff]  ;;  %v9069_v9 = vld [vmem:[%s9309_s30 + $0xa8] sm:$0xff] }
 0x60d   : > { %v4489_v28 = vadd.f32 %v10007_v44, %v4287_v16 }
 0x60e   : > { %4723 = vmatpush.bf16.msra.mxu3 %v8033_v35  ;;  %v8963_v35 = vld [vmem:[%s9289_s20 + $0x1d4] sm:$0xf0] }
 0x60f   : > { %v7817_v44 = vor.u32 %v8963_v35, %v7816_v33  ;;  %v9064_v33 = vld [vmem:[%s9309_s30 + $0x80] sm:$0xff]  ;;  %v7960_v35 = vld [vmem:[%s9289_s20 + $0xf0] sm:$0xf] }
 0x610   : > { %5723 = vmatpush.bf16.msra.mxu2 %v9081_v13  ;;  %v8900_v13 = vld [vmem:[%s9279_s6 + $0x10] sm:$0xff] }
 0x611   : > { %3895 = vmatpush.bf16.msrb.mxu0 %v8900_v13 }
 0x612   : > { %4724 = vmatpush.bf16.msra.mxu3 %v8025_v39  ;;  %v4288_v58 = vpop.f32.mrf.mxu2  ;;  %v9036_v39 = vld [vmem:[%s10392_s4 + $0x120] sm:$0xff] }
 0x613   : > { %v4289_v36 = vadd.f32 %v4288_v58, %v9998_v32  ;;  %v5147_v58 = vld [vmem:[#allocation5 + $0x10] sm:$0x3] }
 0x614   : > { %5724 = vmatpush.bf16.msra.mxu2 %v9080_v19  ;;  %v7833_v19 = vor.u32 %v8967_v15, %v7832_v14  ;;  %v9068_v15 = vld [vmem:[%s9309_s30 + $0xa0] sm:$0xff] }
 0x616   : > { %4725 = vmatpush.bf16.msra.mxu3 %v8017_v37  ;;  %4249 = vmatpush.bf16.msra.mxu0 %v7833_v19 }
 0x617   : > { %8576 = vmatmul.msk.bf16.vlgmr.msra.gmra.mxu2 %vm3745_vm15, %v5680_v29 }
 0x61a   : > { %4726 = vmatpush.bf16.msra.mxu3 %v8009_v46  ;;  %4250 = vmatpush.bf16.msra.mxu0 %v7825_v25  ;;  %v9034_v46 = vld [vmem:[%s10392_s4 + $0x110] sm:$0xff] }
 0x61e   : > { %4727 = vmatpush.bf16.msra.mxu3 %v8001_v50  ;;  %4251 = vmatpush.bf16.msra.mxu0 %v7817_v44 }
 0x621   : > { %4728 = vmatmul.bf16.vlgmr.msra.gmra.mxu3 %v9932_v0  ;;  %v9017_v0 = vld [vmem:[%s10392_s4 + $0x88] sm:$0xff] }
 0x622   : > { %4997 = vmatpush.bf16.msrb.mxu3 %v9023_v53  ;;  %v7800_v53 = vld [vmem:[%s9289_s20 + $0x1b0] sm:$0xf] }
 0x626   : > { %4998 = vmatpush.bf16.msrb.mxu3 %v9022_v56  ;;  %v9033_v56 = vld [vmem:[%s10392_s4 + $0x108] sm:$0xff] }
 0x62a   : > { %4999 = vmatpush.bf16.msrb.mxu3 %v9021_v57  ;;  %v4502_v45 = vpop.f32.mrf.mxu2  ;;  %v7801_v57 = vor.u32 %v8959_v54, %v7800_v53  ;;  %v7928_v53 = vld [vmem:[%s9289_s20 + $0xb0] sm:$0xf]  ;;  %v8927_v54 = vld [vmem:[%s9289_s20 + $0xb4] sm:$0xf0] }
 0x62b   : > { %v4503_v26 = vadd.f32 %v4502_v45, %v4489_v28 }
 0x62e   : > { %5000 = vmatpush.bf16.msrb.mxu3 %v9020_v60  ;;  %v7792_v60 = vld [vmem:[%s9289_s20 + $0x1a0] sm:$0xf] }
 0x632   : > { %5001 = vmatpush.bf16.msrb.mxu3 %v9019_v61  ;;  %v4504_v11 = vpop.f32.mrf.mxu2  ;;  %v8957_v61 = vld [vmem:[%s9289_s20 + $0x1a4] sm:$0xf0] }
 0x636   : > { %5002 = vmatpush.bf16.msrb.mxu3 %v9018_v1  ;;  %v7793_v1 = vor.u32 %v8957_v61, %v7792_v60 }
 0x63a   : > { %5003 = vmatpush.bf16.msrb.mxu3 %v9017_v0  ;;  %v8955_v0 = vld [vmem:[%s9289_s20 + $0x194] sm:$0xf0] }
 0x63e   : > { %5004 = vmatpush.bf16.msrb.mxu3 %v9016_v7  ;;  %v7785_v7 = vor.u32 %v8955_v0, %v7784_v4  ;;  %v7904_v4 = vld [vmem:[%s9289_s20 + $0x80] sm:$0xf]  ;;  %v8921_v0 = vld [vmem:[%s9289_s20 + $0x84] sm:$0xf0] }
 0x641   : > { %5005 = vmatmul.bf16.vlgmr.msrb.gmra.mxu3 %v4891_v17  ;;  %v9067_v17 = vld [vmem:[%s9309_s30 + $0x98] sm:$0xff] }
 0x642   : > { %5286 = vmatpush.bf16.msra.mxu3 %v9039_v8  ;;  %v7776_v8 = vld [vmem:[%s9289_s20 + $0x180] sm:$0xf] }
 0x646   : > { %5287 = vmatpush.bf16.msra.mxu3 %v9038_v18 }
 0x64a   : > { %v4771_v29 = vpop.f32.mrf.mxu2  ;;  %5288 = vmatpush.bf16.msra.mxu3 %v9037_v24  ;;  %v9066_v24 = vld [vmem:[%s9309_s30 + $0x90] sm:$0xff] }
 0x64b   : > { %v4772_v43 = vadd.f32 %v4771_v29, %v10031_v12  ;;  %v4491_v12 = vadd.f32 %v10019_v59, %v4289_v36  ;;  %v8961_v59 = vld [vmem:[%s9289_s20 + $0x1c4] sm:$0xf0]  ;;  %v8935_v36 = vld [vmem:[%s9289_s20 + $0xf4] sm:$0xf0] }
 0x64c   : > { %v7809_v50 = vor.u32 %v8961_v59, %v7808_v49  ;;  %v7961_v44 = vor.u32 %v8935_v36, %v7960_v35  ;;  %v7936_v49 = vld [vmem:[%s9289_s20 + $0xc0] sm:$0xf]  ;;  %v8929_v59 = vld [vmem:[%s9289_s20 + $0xc4] sm:$0xf0] }
 0x64d   : > { %v4777_v38 = vadd.f32 %v4772_v43, %v4503_v26  ;;  %v4505_v37 = vadd.f32 %v4504_v11, %v4491_v12  ;;  %v7777_v11 = vor.u32 %v8953_v10, %v7776_v8  ;;  %v8064_v36 = vld [vmem:[%s9289_s20 + $0x280] sm:$0xf] }
 0x64e   : > { %5289 = vmatpush.bf16.msra.mxu3 %v9036_v39  ;;  %4252 = vmatpush.bf16.msra.mxu0 %v7809_v50  ;;  %v7937_v50 = vor.u32 %v8929_v59, %v7936_v49  ;;  %v4849_v49 = vld [vmem:[#allocation5 + $0x18] sm:$0x1]  ;;  %v9026_v59 = vld [vmem:[%s10392_s4 + $0xd0] sm:$0xff] }
 0x64f   : > { %v4787_v41 = vadd.f32 %v4783_v30, %v4777_v38  ;;  %v5484_v38 = vld [vmem:[#allocation6 + $0x2] sm:$0xf] }
 0x651   : > { %4798 = vrot.lane.b32.xlu0 %v4787_v41, %s9201_s1  ;;  %v5485_v41 = vpack.c.bf16 %v5484_v38, %v5484_v38  ;;  %v8985_v38 = vld [vmem:[%s9289_s20 + $0x284] sm:$0xf0] }
 0x652   : > { %v4773_v32 = vpop.f32.mrf.mxu2  ;;  %5290 = vmatpush.bf16.msra.mxu3 %v9035_v34  ;;  %4253 = vmatpush.bf16.msra.mxu0 %v7801_v57  ;;  %v7952_v34 = vld [vmem:[%s9289_s20 + $0xe0] sm:$0xf] }
 0x653   : > { %v4774_v55 = vadd.f32 %v4773_v32, %v10043_v31  ;;  %v5145_v31 = vld [vmem:[#allocation5] sm:$0xfc]  ;;  %v8933_v32 = vld [vmem:[%s9289_s20 + $0xe4] sm:$0xf0]  ;;  %v7920_v57 = vld [vmem:[%s9289_s20 + $0xa0] sm:$0xf] }
 0x654   : > { %v5149_v45 = vpack.c.bf16 %v5147_v58, %v5145_v31  ;;  %v7929_v31 = vor.u32 %v8927_v54, %v7928_v53  ;;  %v8925_v58 = vld [vmem:[%s9289_s20 + $0xa4] sm:$0xf0] }
 0x655   : > { %v4779_v42 = vadd.f32 %v4774_v55, %v4505_v37  ;;  %v7953_v37 = vor.u32 %v8933_v32, %v7952_v34  ;;  %v7944_v55 = vld [vmem:[%s9289_s20 + $0xd0] sm:$0xf]  ;;  %v7921_v61 = vor.u32 %v8925_v58, %v7920_v57  ;;  %v9029_v34 = vld [vmem:[%s10392_s4 + $0xe8] sm:$0xff] }
 0x656   : > { %5291 = vmatpush.bf16.msra.mxu3 %v9034_v46  ;;  %v5186_v5 = vrot.slane %v5149_v45, 1  ;;  %4254 = vmatpush.bf16.msra.mxu0 %v7793_v1 }
 0x657   : > { %v4789_v47 = vadd.f32 %v4783_v30, %v4779_v42  ;;  %v9065_v30 = vld [vmem:[%s9309_s30 + $0x88] sm:$0xff]  ;;  %v8931_v42 = vld [vmem:[%s9289_s20 + $0xd4] sm:$0xf0] }
 0x659   : > { %4802 = vrot.lane.b32.xlu1 %v4789_v47, %s9201_s1  ;;  %v7945_v47 = vor.u32 %v8931_v42, %v7944_v55  ;;  %v9027_v55 = vld [vmem:[%s10392_s4 + $0xd8] sm:$0xff] }
 0x65a   : > { %5292 = vmatpush.bf16.msra.mxu3 %v9033_v56  ;;  %4255 = vmatpush.bf16.msra.mxu0 %v7785_v7 }
 0x65e   : > { %5293 = vmatpush.bf16.msra.mxu3 %v9032_v62  ;;  %v3758_v14 = vpop.f32.mrf.mxu0  ;;  %4256 = vmatpush.bf16.msra.mxu0 %v7777_v11  ;;  %v7912_v62 = vld [vmem:[%s9289_s20 + $0x90] sm:$0xf]  ;;  %v8997_v11 = vld [vmem:[%s9289_s20 + $0x2e4] sm:$0xf0] }
 0x65f   : > { %v10185_v16 = vpop.f32.mrf.mxu1  ;;  %v3799_v18 = vadd.f32 %v10088_v40, %v3758_v14 }
 0x661   : > { %5294 = vmatmul.bf16.vlgmr.msra.gmra.mxu3 %v5186_v5  ;;  %v8120_v5 = vld [vmem:[%s9289_s20 + $0x2f0] sm:$0xf] }
 0x662   : > { %5551 = vmatpush.bf16.msrb.mxu3 %v9071_v63  ;;  %v8923_v63 = vld [vmem:[%s9289_s20 + $0x94] sm:$0xf0] }
 0x663   : > { %v7913_v1 = vor.u32 %v8923_v63, %v7912_v62  ;;  %v9046_v62 = vld [vmem:[%s10392_s4 + $0x170] sm:$0xff]  ;;  %v9045_v63 = vld [vmem:[%s10392_s4 + $0x168] sm:$0xff] }
 0x664   : > { %v3849_v21 = vpop.f32.mrf.mxu3 }
 0x665   : > { %v3853_v25 = vadd.f32 %v3849_v21, %v3799_v18  ;;  %v8993_v21 = vld [vmem:[%s9289_s20 + $0x2c4] sm:$0xf0] }
 0x666   : > { %5552 = vmatpush.bf16.msrb.mxu3 %v9070_v6  ;;  %v3760_v28 = vpop.f32.mrf.mxu0  ;;  %v8999_v6 = vld [vmem:[%s9289_s20 + $0x2f4] sm:$0xf0] }
 0x667   : > { %v3855_v29 = vadd.f32 %v3854_v22, %v3853_v25  ;;  %v5677_v26 = vpop.f32.mrf.mxu1  ;;  %v8121_v7 = vor.u32 %v8999_v6, %v8120_v5  ;;  %v8088_v28 = vld [vmem:[%s9289_s20 + $0x2b0] sm:$0xf]  ;;  %v9089_v5 = vld [vmem:[%s10400_s7 + $0x28] sm:$0xff] }
 0x668   : > { %v8080_v26 = vld [vmem:[%s9289_s20 + $0x2a0] sm:$0xf]  ;;  %v9085_v6 = vld [vmem:[%s10400_s7 + $0x8] sm:$0xff]  ;;  %5841 = vmatpush.bf16.msrb.mxu2 %v9089_v5 }
 0x669   : > { %v3856_v43 = vmax.f32 %v3855_v29, 0.0  ;;  %5806 = vmatpush.bf16.msra.mxu1 %v9085_v6  ;;  %v5859_v5 = vld [vmem:[#allocation9] sm:$0x1] }
 0x66a   : > { %v10182_v13 = vpop.f32.mrf.mxu2  ;;  %5553 = vmatpush.bf16.msrb.mxu3 %v9069_v9  ;;  %v8112_v9 = vld [vmem:[%s9289_s20 + $0x2e0] sm:$0xf]  ;;  %v5860_v6 = vpack.c.bf16 %v5859_v5, %v5859_v5 }
 0x66b   : > { %3858 = vst.msk [vmem:[#allocation8 + $0x1] sm:$0x1] %vm3857_vm2, %v3856_v43  ;;  %v8113_v14 = vor.u32 %v8997_v11, %v8112_v9  ;;  %v8989_v43 = vld [vmem:[%s9289_s20 + $0x2a4] sm:$0xf0]  ;;  %v5813_v9 = vld [vmem:[#allocation8 + $0x2] sm:$0x1] }
 0x66c   : > { %v3851_v40 = vpop.f32.mrf.mxu3  ;;  %v9084_v11 = vld [vmem:[%s10400_s7] sm:$0xff] }
 0x66d   : > { %v8072_v40 = vld [vmem:[%s9289_s20 + $0x290] sm:$0xf]  ;;  %5807 = vmatpush.bf16.msra.mxu1 %v9084_v11 }
 0x66e   : > { %5554 = vmatpush.bf16.msrb.mxu3 %v9068_v15  ;;  %v8104_v15 = vld [vmem:[%s9289_s20 + $0x2d0] sm:$0xf] }
 0x672   : > { %v5143_v19 = vpop.f32.mrf.mxu2  ;;  %5555 = vmatpush.bf16.msrb.mxu3 %v9067_v17  ;;  %v3865_v39 = vld [vmem:[#allocation8 + $0x1] sm:$0x1]  ;;  %v8995_v17 = vld [vmem:[%s9289_s20 + $0x2d4] sm:$0xf0] }
 0x673   : > { %v3866_v12 = vpack.c.bf16 %v3865_v39, %v3865_v39  ;;  %v8105_v18 = vor.u32 %v8995_v17, %v8104_v15  ;;  %v8096_v19 = vld [vmem:[%s9289_s20 + $0x2c0] sm:$0xf]  ;;  %v8065_v39 = vor.u32 %v8985_v38, %v8064_v36  ;;  %v5814_v15 = vpack.c.bf16 %v5813_v9, %v5813_v9  ;;  %v5146_v17 = vld [vmem:[#allocation5 + $0x8] sm:$0xfc] }
 0x674   : > { %v10210_v60 = vpop.f32.mrf.mxu3  ;;  %v8097_v25 = vor.u32 %v8993_v21, %v8096_v19  ;;  %v5148_v19 = vld [vmem:[#allocation5 + $0x18] sm:$0x3]  ;;  %v9092_v21 = vld [vmem:[%s10401_s10 + $0x10] sm:$0xff]  ;;  %v9087_v38 = vld [vmem:[%s10400_s7 + $0x18] sm:$0xff] }
 0x675   : > { %7655 = vmatmul.msk.bf16.vlgmr.msrb.gmra.mxu0 %vm3884_vm10, %v3866_v12  ;;  %v9030_v12 = vld [vmem:[%s10392_s4 + $0xf0] sm:$0xff] }
 0x676   : > { %5556 = vmatpush.bf16.msrb.mxu3 %v9066_v24  ;;  %4465 = vmatpush.bf16.msrb.mxu0 %v7961_v44  ;;  %v8991_v24 = vld [vmem:[%s9289_s20 + $0x2b4] sm:$0xf0] }
 0x677   : > { %v8089_v29 = vor.u32 %v8991_v24, %v8088_v28  ;;  %v9040_v24 = vld [vmem:[%s10392_s4 + $0x140] sm:$0xff] }
 0x67a   : > { %5557 = vmatpush.bf16.msrb.mxu3 %v9065_v30  ;;  %4466 = vmatpush.bf16.msrb.mxu0 %v7953_v37  ;;  %v9028_v37 = vld [vmem:[%s10392_s4 + $0xe0] sm:$0xff] }
 0x67c   : > { %v10220_v8 = vpop.f32.mrf.mxu3 }
 0x67e   : > { %5558 = vmatpush.bf16.msrb.mxu3 %v9064_v33  ;;  %4467 = vmatpush.bf16.msrb.mxu0 %v7945_v47  ;;  %v8987_v33 = vld [vmem:[%s9289_s20 + $0x294] sm:$0xf0] }
 0x67f   : > { %v8073_v35 = vor.u32 %v8987_v33, %v8072_v40  ;;  %v4847_v47 = vld [vmem:[#allocation5 + $0x8] sm:$0xfe]  ;;  %v9077_v40 = vld [vmem:[%s10396_s23 + $0x28] sm:$0xff] }
 0x681   : > { %5559 = vmatmul.bf16.vlgmr.msrb.gmra.mxu3 %v5485_v41  ;;  %v9031_v41 = vld [vmem:[%s10392_s4 + $0xf8] sm:$0xff] }
 0x682   : > { %4468 = vmatpush.bf16.msrb.mxu0 %v7937_v50  ;;  %v4851_v50 = vpack.c.bf16 %v4849_v49, %v4847_v47  ;;  %v9151_v47 = vld [vmem:[%s10403_s0] ss:$0 sm:$0xff]  ;;  %v9086_v49 = vld [vmem:[%s10400_s7 + $0x10] sm:$0xff]  ;;  %s10364_s0 = sshll.u32 %s10419_s16, 4 }
 0x684   : > { %v10229_v22 = vpop.f32.mrf.mxu3  ;;  %v4895_v53 = vshll.u32 %v4851_v50, 16  ;;  %v4893_v58 = vshrl.u32 %v4851_v50, 16 }
 0x685   : > { %4257 = vmatmul.bf16.vlgmr.msra.gmra.mxu0 %v9985_v20  ;;  %v7905_v20 = vor.u32 %v8921_v0, %v7904_v4  ;;  %v9043_v4 = vld [vmem:[%s10392_s4 + $0x158] sm:$0xff] }
 0x686   : > { %4469 = vmatpush.bf16.msrb.mxu0 %v7929_v31  ;;  %v9047_v31 = vld [vmem:[%s10392_s4 + $0x178] sm:$0xff]  ;;  %v4897_v57 = vrot.slane %v4895_v53, 1 }
 0x68a   : > { %v10201_v46 = vpop.f32.mrf.mxu2  ;;  %4470 = vmatpush.bf16.msrb.mxu0 %v7921_v61  ;;  %v4898_v61 = vor.u32 %v4897_v57, %v4893_v58 }
 0x68c   : > { %v10235_v30 = vpop.f32.mrf.mxu3 }
 0x68e   : > { %4471 = vmatpush.bf16.msrb.mxu0 %v7913_v1  ;;  %v9044_v1 = vld [vmem:[%s10392_s4 + $0x160] sm:$0xff] }
 0x692   : > { %v5482_v56 = vpop.f32.mrf.mxu2  ;;  %4472 = vmatpush.bf16.msrb.mxu0 %v7905_v20  ;;  %v9042_v20 = vld [vmem:[%s10392_s4 + $0x150] sm:$0xff] }
 0x693   : > { %v9024_v56 = vld [vmem:[%s10392_s4 + $0xc0] sm:$0xff] }
 0x695   : > { %4473 = vmatmul.bf16.vlgmr.msrb.gmra.mxu0 %v10013_v52  ;;  %v8081_v52 = vor.u32 %v8989_v43, %v8080_v26  ;;  %v9079_v26 = vld [vmem:[%s10396_s23 + $0x38] sm:$0xff] }
 0x696   : > { %4734 = vmatpush.bf16.msra.mxu0 %v8121_v7  ;;  %v9088_v7 = vld [vmem:[%s10400_s7 + $0x20] sm:$0xff] }
 0x697   : > { %5842 = vmatpush.bf16.msrb.mxu2 %v9088_v7 }
 0x69a   : > { %v10214_v45 = vpop.f32.mrf.mxu2  ;;  %4735 = vmatpush.bf16.msra.mxu0 %v8113_v14  ;;  %v9041_v14 = vld [vmem:[%s10392_s4 + $0x148] sm:$0xff]  ;;  %8611 = vmatmul.msk.bf16.vlgmr.msrb.gmra.mxu2 %vm3884_vm10, %v5814_v15 }
 0x69e   : > { %4736 = vmatpush.bf16.msra.mxu0 %v8105_v18 }
 0x6a2   : > { %v5728_v10 = vpop.f32.mrf.mxu2  ;;  %4737 = vmatpush.bf16.msra.mxu0 %v8097_v25  ;;  %v5744_v25 = vld [vmem:[#allocation8] sm:$0x1] }
 0x6a3   : > { %v9093_v10 = vld [vmem:[%s10401_s10 + $0x18] sm:$0xff]  ;;  %v5745_v28 = vpack.c.bf16 %v5744_v25, %v5744_v25 }
 0x6a4   : > { %v10241_v44 = vpop.f32.mrf.mxu3  ;;  %5893 = vmatpush.bf16.msra.mxu3 %v9093_v10 }
 0x6a5   : > { %8598 = vmatmul.msk.bf16.vlgmr.msra.gmra.mxu1 %vm3884_vm10, %v5745_v28 }
 0x6a6   : > { %4738 = vmatpush.bf16.msra.mxu0 %v8089_v29  ;;  %v5150_v29 = vpack.c.bf16 %v5148_v19, %v5146_v17 }
 0x6a8   : > { %5894 = vmatpush.bf16.msra.mxu3 %v9092_v21  ;;  %v5187_v43 = vrot.slane %v5150_v29, 1 }
 0x6aa   : > { %4739 = vmatpush.bf16.msra.mxu0 %v8081_v52  ;;  %v9078_v52 = vld [vmem:[%s10396_s23 + $0x30] sm:$0xff] }
 0x6ac   : > { %v10247_v32 = vpop.f32.mrf.mxu3 }
 0x6ae   : > { %4740 = vmatpush.bf16.msra.mxu0 %v8073_v35  ;;  %v9076_v35 = vld [vmem:[%s10396_s23 + $0x20] sm:$0xff] }
 0x6b2   : > { %4741 = vmatpush.bf16.msra.mxu0 %v8065_v39  ;;  %v9095_v39 = vld [vmem:[%s10401_s10 + $0x28] sm:$0xff] }
 0x6b3   : > { %5956 = vmatpush.bf16.msrb.mxu1 %v9095_v39 }
 0x6b5   : > { %4742 = vmatmul.bf16.vlgmr.msra.gmra.mxu0 %v10054_v48  ;;  %v9025_v48 = vld [vmem:[%s10392_s4 + $0xc8] sm:$0xff]  ;;  %s10411_s4 = sld [smem:[#allocation30_spill]] }
 0x6b6   : > { %5010 = vmatpush.bf16.msrb.mxu0 %v9031_v41  ;;  %v3965_v41 = vld [vmem:[%s10402_s11] sm:$0x1]  ;;  %s10405_s11 = sld [smem:[#allocation26_spill]] }
 0x6ba   : > { %5011 = vmatpush.bf16.msrb.mxu0 %v9030_v12 }
 0x6bc   : > { %s1218_s18 = scalar_lea.vmem %s10405_s11, %s10364_s0  ;;  %s1249_s11 = scalar_lea.vmem %s9389_s24, %s6394_s26 }
 0x6bd   : > { %s10409_s26 = sld [smem:[#allocation29_spill]]  ;;  %s9203_s0 = smov 80  }
 0x6be   : > { %5012 = vmatpush.bf16.msrb.mxu0 %v9029_v34  ;;  %v5481_v34 = vadd.f32 %v10201_v46, %v10078_v3  ;;  %v9094_v46 = vld [vmem:[%s10401_s10 + $0x20] sm:$0xff] }
 0x6bf   : > { %5957 = vmatpush.bf16.msrb.mxu1 %v9094_v46 }
 0x6c2   : > { %5013 = vmatpush.bf16.msrb.mxu0 %v9028_v37 }
 0x6c4   : > { %v10251_v42 = vpop.f32.mrf.mxu3 }
 0x6c6   : > { %5014 = vmatpush.bf16.msrb.mxu0 %v9027_v55  ;;  %v5588_v55 = vld [vmem:[#allocation7 + $0x1] sm:$0x3] }
 0x6c7   : > { %v5589_v53 = vpack.c.bf16 %v5588_v55, %v5588_v55 }
 0x6ca   : > { %5015 = vmatpush.bf16.msrb.mxu0 %v9026_v59 }
 0x6cc   : > { %v5008_v54 = vpop.f32.mrf.mxu3 }
 0x6cd   : > { %v5928_v54 = vld [vmem:[#allocation9 + $0x2] sm:$0x1] }
 0x6ce   : > { %5016 = vmatpush.bf16.msrb.mxu0 %v9025_v48  ;;  %v9091_v48 = vld [vmem:[%s10401_s10 + $0x8] sm:$0xff] }
 0x6d2   : > { %5017 = vmatpush.bf16.msrb.mxu0 %v9024_v56  ;;  %v9090_v56 = vld [vmem:[%s10401_s10] sm:$0xff] }
 0x6d5   : > { %5018 = vmatmul.bf16.vlgmr.msrb.gmra.mxu0 %v4898_v61 }
 0x6d6   : > { %5299 = vmatpush.bf16.msra.mxu0 %v9047_v31  ;;  %v5929_v31 = vpack.c.bf16 %v5928_v54, %v5928_v54 }
 0x6d8   : > { %8646 = vmatmul.msk.bf16.vlgmr.msrb.gmra.mxu1 %vm3884_vm10, %v5929_v31  ;;  %v4799_v31 = vpop.permute.xlu0 %4798 }
 0x6da   : > { %5300 = vmatpush.bf16.msra.mxu0 %v9046_v62  ;;  %v5750_v62 = vld [vmem:[#allocation8 + $0x1] sm:$0x1] }
 0x6de   : > { %5301 = vmatpush.bf16.msra.mxu0 %v9045_v63 }
 0x6e2   : > { %5302 = vmatpush.bf16.msra.mxu0 %v9044_v1  ;;  %v5751_v1 = vpack.c.bf16 %v5750_v62, %v5750_v62 }
 0x6e4   : > { %v10261_v0 = vpop.f32.mrf.mxu3 }
 0x6e6   : > { %5303 = vmatpush.bf16.msra.mxu0 %v9043_v4 }
 0x6ea   : > { %5304 = vmatpush.bf16.msra.mxu0 %v9042_v20 }
 0x6ec   : > { %v5297_v18 = vpop.f32.mrf.mxu3 }
 0x6ee   : > { %5305 = vmatpush.bf16.msra.mxu0 %v9041_v14  ;;  %v4782_v14 = vperm.slane %v10151_v23, 0 }
 0x6f2   : > { %5306 = vmatpush.bf16.msra.mxu0 %v9040_v24  ;;  %v3897_v33 = vpop.f32.mrf.mxu0 }
 0x6f3   : > { %v3926_v36 = vadd.f32 %v9952_v27, %v3897_v33 }
 0x6f5   : > { %5307 = vmatmul.bf16.vlgmr.msra.gmra.mxu0 %v5187_v43  ;;  %v3964_v12 = vadd.f32 %v10105_v2, %v3926_v36 }
 0x6f6   : > { %5630 = vmatpush.bf16.msrb.mxu0 %v9079_v26 }
 0x6f7   : > { %v3966_v37 = vadd.f32 %v3965_v41, %v3964_v12 }
 0x6f9   : > { %v3967_v59 = vmax.f32 %v3966_v37, 0.0 }
 0x6fa   : > { %5631 = vmatpush.bf16.msrb.mxu0 %v9078_v52  ;;  %v3899_v2 = vpop.f32.mrf.mxu0 }
 0x6fb   : > { %3968 = vst.msk [vmem:[#allocation9 + $0x1] sm:$0x1] %vm3857_vm2, %v3967_v59  ;;  %v5849_v59 = vld [vmem:[%s10410_s3] sm:$0x1]  ;;  %s10416_s3 = sshll.u32 %s10419_s16, 4 }
 0x6fe   : > { %5632 = vmatpush.bf16.msrb.mxu0 %v9077_v40 }
 0x702   : > { %5633 = vmatpush.bf16.msrb.mxu0 %v9076_v35  ;;  %v5865_v58 = vld [vmem:[#allocation9 + $0x1] sm:$0x1]  ;;  %v4258_v63 = vpop.f32.mrf.mxu0 }
 0x703   : > { %v5866_v61 = vpack.c.bf16 %v5865_v58, %v5865_v58  ;;  %v4259_v10 = vadd.f32 %v4258_v63, %v10210_v60  ;;  %v4803_v58 = vpop.permute.xlu1 %4802 }
 0x704   : > { %v5560_v27 = vpop.f32.mrf.mxu3 }
 0x705   : > { %v5564_v50 = vadd.f32 %v5560_v27, %v5481_v34  ;;  %8534 = vmatmul.msk.bf16.vlgmr.msrb.gmra.mxu0 %vm3745_vm15, %v5589_v53  ;;  %8624 = vmatmul.msk.bf16.vlgmr.msra.gmra.mxu3 %vm3884_vm10, %v5866_v61  ;;  %v4461_v9 = vadd.f32 %v10229_v22, %v4259_v10 }
 0x706   : > { %5778 = vmatpush.bf16.msra.mxu0 %v9087_v38 }
 0x707   : > { %v5569_v3 = vadd.f32 %v9151_v47, %v5564_v50 }
 0x709   : > { %5573 = vrot.lane.b32.xlu2 %v5569_v3, %s9202_s2  ;;  %5571 = vst.msk [vmem:[%s1226_s28] sm:$0xf] %vm5570_vm3, %v5569_v3  ;;  %s10406_s28 = sld [smem:[#allocation18_spill]] }
 0x70a   : > { %5779 = vmatpush.bf16.msra.mxu0 %v9086_v49  ;;  %v4260_v4 = vpop.f32.mrf.mxu0  ;;  %s10407_s2 = sld [smem:[#allocation27_spill]] }
 0x70b   : > { %v4261_v18 = vadd.f32 %v4260_v4, %v10220_v8 }
 0x70c   : > { %v5562_v57 = vpop.f32.mrf.mxu3 }
 0x70d   : > { %v4463_v25 = vadd.f32 %v10235_v30, %v4261_v18 }
 0x70e   : > { %5921 = vmatpush.bf16.msrb.mxu0 %v9091_v48 }
 0x70f   : > { %v9152_v35 = vld [vmem:[%s10406_s28] ss:$0 sm:$0xff]  ;;  %s10367_s28 = sshll.u32 %s10419_s16, 1 }
 0x710   : > { %s1230_s5 = scalar_lea.vmem %s10409_s26, %s10367_s28  ;;  %s10414_s26 = sld [smem:[#allocation32_spill]] }
 0x711   : > { %s9205_s28 = smov 122  }
 0x712   : > { %5922 = vmatpush.bf16.msrb.mxu0 %v9090_v56  ;;  %v4474_v20 = vpop.f32.mrf.mxu0 }
 0x713   : > { %v4475_v15 = vadd.f32 %v4474_v20, %v4461_v9 }
 0x715   : > { %8589 = vmatmul.msk.bf16.vlgmr.msra.gmra.mxu0 %vm3884_vm10, %v5751_v1 }
 0x71a   : > { %v4476_v7 = vpop.f32.mrf.mxu0 }
 0x71b   : > { %v4477_v23 = vadd.f32 %v4476_v7, %v4463_v25 }
 0x71d   : > { %v5844_v43 = vpop.f32.mrf.mxu2 }
 0x725   : > { %8633 = vmatmul.msk.bf16.vlgmr.msrb.gmra.mxu0 %vm3884_vm10, %v5860_v6  ;;  %v5846_v39 = vpop.f32.mrf.mxu2 }
 0x732   : > { %v4743_v11 = vpop.f32.mrf.mxu0 }
 0x733   : > { %v4744_v17 = vadd.f32 %v4743_v11, %v10241_v44 }
 0x735   : > { %v4776_v19 = vadd.f32 %v4744_v17, %v4475_v15 }
 0x737   : > { %v4786_v21 = vadd.f32 %v4782_v14, %v4776_v19 }
 0x739   : > { %4796 = vrot.lane.b32.xlu0 %v4786_v21, %s9201_s1  ;;  %4790 = vst.msk [vmem:[%s1218_s18] sm:$0xff] %vm1261_vm0, %v4786_v21 }
 0x73a   : > { %v4745_v60 = vpop.f32.mrf.mxu0 }
 0x73b   : > { %v4746_v22 = vadd.f32 %v4745_v60, %v10247_v32  ;;  %v5809_v32 = vpop.f32.mrf.mxu1 }
 0x73d   : > { %v4778_v44 = vadd.f32 %v4746_v22, %v4477_v23 }
 0x73f   : > { %v4788_v28 = vadd.f32 %v4782_v14, %v4778_v44 }
 0x741   : > { %4800 = vrot.lane.b32.xlu1 %v4788_v28, %s9201_s1  ;;  %4791 = vst.msk [vmem:[%s1218_s18 + $0x8] sm:$0xff] %vm1261_vm0, %v4788_v28  ;;  %s10408_s1 = sld [smem:[#allocation21_spill]]  ;;  %s6393_s18 = sshll.u32 %s10419_s16, 3  ;;  %vm5318_vm0 = vcmask 392192  }
 0x743   : > { %v5811_v36 = vpop.f32.mrf.mxu1 }
 0x752   : > { %v5019_v8 = vpop.f32.mrf.mxu0 }
 0x753   : > { %v5020_v29 = vadd.f32 %v5019_v8, %v10251_v42 }
 0x755   : > { %v5129_v26 = vadd.f32 %v10058_v51, %v5020_v29  ;;  %v5959_v37 = vpop.f32.mrf.mxu1 }
 0x757   : > { %v5142_v40 = vadd.f32 %v10182_v13, %v5129_v26 }
 0x75a   : > { %v5021_v24 = vpop.f32.mrf.mxu0 }
 0x75d   : > { %v5961_v47 = vpop.f32.mrf.mxu1 }
 0x763   : > { %v5574_v30 = vpop.permute.xlu2 %5573 }
 0x764   : > { %5577 = vst.msk [vmem:[%s1249_s11] sm:$0xf] %vm5576_vm4, %v5574_v30  ;;  %s1222_s11 = scalar_lea.vmem %s10407_s2, %s6393_s18  ;;  %s9204_s2 = smov 116  }
 0x772   : > { %v5308_v52 = vpop.f32.mrf.mxu0 }
 0x773   : > { %v5309_v33 = vadd.f32 %v5308_v52, %v10261_v0  ;;  %v9153_v0 = vld [vmem:[%s10408_s1] ss:$0 sm:$0xff]  ;;  %s10413_s1 = sld [smem:[#allocation31_spill]] }
 0x775   : > { %v5312_v38 = vadd.f32 %v5309_v33, %v5142_v40 }
 0x777   : > { %v5317_v42 = vadd.f32 %v9152_v35, %v5312_v38 }
 0x779   : > { %5321 = vrot.lane.b32.xlu2 %v5317_v42, %s9203_s0  ;;  %5319 = vst.msk [vmem:[%s1222_s11] sm:$0xff] %vm5318_vm0, %v5317_v42  ;;  %s10412_s0 = sld [smem:[#allocation25_spill]]  ;;  %s1233_s11 = scalar_lea.vmem %s10411_s4, %s10419_s16 }
 0x77a   : > { %v5310_v51 = vpop.f32.mrf.mxu0  ;;  %s1241_s4 = scalar_lea.vmem %s10414_s26, %s10416_s3  ;;  %s1256_s26 = scalar_lea.vmem %s9399_s19, %s10419_s16 }
 0x77f   : > { %v5964_v46 = vld [vmem:[%s10412_s0] sm:$0x1] }
 0x782   : > { %v5635_v13 = vpop.f32.mrf.mxu0 }
 0x783   : > { %v5676_v41 = vadd.f32 %v10185_v16, %v5635_v13 }
 0x785   : > { %v5730_v12 = vadd.f32 %v10214_v45, %v5676_v41 }
 0x787   : > { %v5735_v34 = vadd.f32 %v9153_v0, %v5730_v12 }
 0x788   : > { %v5896_v49 = vpop.f32.mrf.mxu3 }
 0x789   : > { %5739 = vrot.lane.b32.xlu0 %v5735_v34, %s9204_s2  ;;  %5737 = vst.msk [vmem:[%s1230_s5] sm:$0x3] %vm5736_vm5, %v5735_v34  ;;  %s10415_s5 = sld [smem:[#allocation33_spill]]  ;;  %s1236_s2 = scalar_lea.vmem %s10413_s1, %s10419_s16 }
 0x78a   : > { %v5637_v55 = vpop.f32.mrf.mxu0 }
 0x78f   : > { %s1245_s0 = scalar_lea.vmem %s10415_s5, %s6393_s18 }
 0x790   : > { %v5898_v48 = vpop.f32.mrf.mxu3 }
 0x792   : > { %v5781_v16 = vpop.f32.mrf.mxu0 }
 0x793   : > { %v5810_v27 = vadd.f32 %v5809_v32, %v5781_v16 }
 0x795   : > { %v5848_v50 = vadd.f32 %v5844_v43, %v5810_v27 }
 0x797   : > { %v5850_v45 = vadd.f32 %v5849_v59, %v5848_v50 }
 0x799   : > { %5852 = vst.msk [vmem:[%s1233_s11] sm:$0x1] %vm5851_vm6, %v5850_v45  ;;  %5854 = vrot.lane.b32.xlu1 %v5850_v45, %s9205_s28  ;;  %s1259_s11 = scalar_lea.vmem %s9404_s12, %s10419_s16 }
 0x79a   : > { %v5783_v2 = vpop.f32.mrf.mxu0 }
 0x7a2   : > { %v5924_v53 = vpop.f32.mrf.mxu0 }
 0x7a3   : > { %v5925_v3 = vadd.f32 %v5924_v53, %v5896_v49 }
 0x7a5   : > { %v5963_v54 = vadd.f32 %v5959_v37, %v5925_v3 }
 0x7a7   : > { %v5965_v56 = vadd.f32 %v5964_v46, %v5963_v54 }
 0x7a9   : > { %5966 = vst.msk [vmem:[%s1236_s2] sm:$0x1] %vm5851_vm6, %v5965_v56  ;;  %5968 = vrot.lane.b32.xlu2 %v5965_v56, %s9205_s28  ;;  %s10417_s28 = sshll.u32 %s10419_s16, 1 }
 0x7aa   : > { %v5926_v57 = vpop.f32.mrf.mxu0  ;;  %s1253_s1 = scalar_lea.vmem %s9394_s27, %s10417_s28 }
 0x7ab   : > { %v4797_v61 = vpop.permute.xlu0 %4796 }
 0x7ac   : > { %v4804_v62 = vsel %vm3884_vm10, %v4797_v61, %v4799_v31 }
 0x7ad   : > { %4808 = vst [vmem:[%s1241_s4] sm:$0xff] %v4804_v62 }
 0x7b3   : > { %v4801_v63 = vpop.permute.xlu1 %4800 }
 0x7b4   : > { %v4805_v1 = vsel %vm3884_vm10, %v4801_v63, %v4803_v58 }
 0x7b5   : > { %4809 = vst [vmem:[%s1241_s4 + $0x8] sm:$0xff] %v4805_v1 }
 0x7d3   : > { %v5322_v4 = vpop.permute.xlu2 %5321 }
 0x7d4   : > { %5324 = vst.msk [vmem:[%s1245_s0] sm:$0xff] %vm3745_vm15, %v5322_v4 }
 0x7fb   : > { %v5740_v5 = vpop.permute.xlu0 %5739 }
 0x7fc   : > { %5743 = vst.msk [vmem:[%s1253_s1] sm:$0x3] %vm5742_vm7, %v5740_v5 }
 0x803   : > { %v5969_v6 = vpop.permute.xlu2 %5968 }
 0x804   : > { %5971 = vst.msk [vmem:[%s1259_s11] sm:$0x1] %vm5857_vm8, %v5969_v6 }
 0x80b   : > { %v5855_v20 = vpop.permute.xlu1 %5854 }
 0x80c   : > { %5858 = vst.msk [vmem:[%s1256_s26] sm:$0x1] %vm5857_vm8, %v5855_v20 }
 0x80d PF: > { %s88_s15 = sadd.s32 1, %s9160_s15  }
 0x80e   : > { %p85_p4 = scmp.ge.s32.totalorder %s88_s15, 4  }
 0x810   :  { %87 = sbr.rel (!%p85_p4) target bundleno = 64 (0x40), region = 354 }

</bundles_post_ra>
